<compile_context>
chip_gen: v6e
topology: v6e:2x2x1
jax: 0.10.0
libtpu: 0.0.40
codegen_flags: <defaults>
</compile_context>

<pallas_src>
import jax
import jax.numpy as jnp
from jax.experimental import pallas as pl
from jax.experimental.pallas import tpu as pltpu


def _round_up(x, m):
    return (x + m - 1) // m * m


def _location_kernel(x_ref, w_ref, out_ref, slab_ref):
    # x_ref   : (1, 1, tT + K - 1, C)  bf16  pre-haloed time strip
    # w_ref   : (K*C, D)               bf16  fused conv*dense weight
    # out_ref : (1, tT, D)             f32
    # slab_ref: (tT, K*C)              bf16  VMEM im2col scratch
    tT = slab_ref.shape[0]
    C = x_ref.shape[-1]
    K = w_ref.shape[0] // C
    # In-kernel im2col: K cheap shifted copies (VPU/store filler under the
    # DMA-bound roofline), then a single MXU dot with a real contraction dim.
    for k in range(K):
        slab_ref[:, k * C:(k + 1) * C] = x_ref[0, 0, k:k + tT, :]
    out_ref[0] = jnp.dot(
        slab_ref[...], w_ref[...], preferred_element_type=jnp.float32
    ).astype(out_ref.dtype)


def location_layer_forward(x_ncw, w_conv, w_dense, *, t_tile=1024):
    """x_ncw: (B, 2, T); w_conv: (F, 2, K); w_dense: (D, F).
    Returns (B, T, D) float32 -- identical semantics to LocationLayer.forward."""
    B, C_in, T = x_ncw.shape
    F_, C_in2, K = w_conv.shape
    D, F2 = w_dense.shape
    assert C_in2 == C_in and F2 == F_
    assert K % 2 == 1, "even kernel sizes change SAME-padding semantics"
    pad = (K - 1) // 2
    KC = K * C_in

    # ---- fused weight (K*C_in, D): f32 math, bf16 storage, NO padding -------
    w_fused = jnp.einsum(
        "fck,df->kcd", w_conv.astype(jnp.float32), w_dense.astype(jnp.float32)
    ).reshape(KC, D).astype(jnp.bfloat16)

    # ---- time tiling ---------------------------------------------------------
    tT = min(t_tile, _round_up(T, 8))
    if B == 1 and T > 8:
        # guarantee >=2 grid points so both v7x TensorCores get work
        tT = min(tT, max(8, _round_up(pl.cdiv(T, 2), 8)))
    nT = pl.cdiv(T, tT)
    T_grid = nT * tT
    halo_len = tT + K - 1

    # ---- pre-haloed bf16 time strips: x_tiles[b, i, j, c] = x_pad[b, i*tT+j, c]
    x_tc = jnp.transpose(x_ncw, (0, 2, 1)).astype(jnp.bfloat16)         # (B, T, C)
    x_pad = jnp.pad(x_tc, ((0, 0), (pad, T_grid - T + pad), (0, 0)))    # (B, T_grid+2p, C)
    gather_idx = jnp.arange(nT)[:, None] * tT + jnp.arange(halo_len)[None, :]
    x_tiles = jnp.take(x_pad, gather_idx, axis=1)                       # (B, nT, tT+K-1, C)

    out = pl.pallas_call(
        _location_kernel,
        out_shape=jax.ShapeDtypeStruct((B, T, D), jnp.float32),
        grid_spec=pltpu.PrefetchScalarGridSpec(
            num_scalar_prefetch=0,
            grid=(B, nT),
            in_specs=[
                # last two block dims equal the full array dims -> exempt from (8,128)
                pl.BlockSpec((1, 1, halo_len, C_in), lambda b, t: (b, t, 0, 0)),
                pl.BlockSpec((KC, D), lambda b, t: (0, 0)),
            ],
            out_specs=pl.BlockSpec((1, tT, D), lambda b, t: (b, t, 0)),
            scratch_shapes=[pltpu.VMEM((tT, KC), jnp.bfloat16)],
        ),
        compiler_params=pltpu.CompilerParams(
            dimension_semantics=("parallel", "parallel")),
        cost_estimate=pl.CostEstimate(
            flops=2 * B * T_grid * KC * D,
            transcendentals=0,
            bytes_accessed=(B * nT * halo_len * C_in * 2  # bf16 activation strips
                            + KC * D * 2                  # bf16 fused weight
                            + B * T * D * 4)),            # f32 output
    )(x_tiles, w_fused)
    return out  # exact shape, no post-kernel slice/copy


def _reference_forward(x_ncw, w_conv, w_dense):
    """Pure-JAX f32 reference mirroring the PyTorch module."""
    K = w_conv.shape[2]
    pad = (K - 1) // 2
    y = jax.lax.conv_general_dilated(
        x_ncw, w_conv, window_strides=(1,), padding=[(pad, pad)],
        dimension_numbers=("NCH", "OIH", "NCH"))      # (B, F, T)
    y = jnp.transpose(y, (0, 2, 1))                   # (B, T, F)
    return jnp.einsum("btf,df->btd", y, w_dense)      # (B, T, D)


if __name__ == "__main__":
    # Real Tacotron2 LocationLayer hyperparameters at small batch / sequence.
    B, T = 2, 48
    attention_n_filters = 32
    attention_kernel_size = 31
    attention_dim = 128

    key = jax.random.PRNGKey(0)
    kx, kc, kd = jax.random.split(key, 3)

    x = jax.random.normal(kx, (B, 2, T), dtype=jnp.float32)
    w_conv = jax.random.normal(
        kc, (attention_n_filters, 2, attention_kernel_size),
        dtype=jnp.float32) * 0.1
    w_dense = jax.random.normal(
        kd, (attention_dim, attention_n_filters), dtype=jnp.float32) * 0.1

    out = jax.block_until_ready(location_layer_forward(x, w_conv, w_dense))
    ref = jax.block_until_ready(_reference_forward(x, w_conv, w_dense))

    assert out.shape == (B, T, attention_dim)
    # bf16 matmul operands with f32 accumulation -> loosened tolerance.
    assert jnp.allclose(out, ref, atol=2e-2, rtol=2e-2), "mismatch vs reference"

    print("KERNEL_OK")
</pallas_src>

<mosaic_0001>
module attributes {stable_mosaic.version = 11 : i64} {
  func.func @_location_kernel(%arg0: i32, %arg1: i32, %arg2: memref<1x1x78x2xbf16, #tpu.memory_space<vmem>>, %arg3: memref<62x128xbf16, #tpu.memory_space<vmem>>, %arg4: memref<1x48x128xf32, #tpu.memory_space<vmem>>, %arg5: memref<48x62xbf16, #tpu.memory_space<vmem>>) attributes {dimension_semantics = [#tpu.dimension_semantics<parallel>, #tpu.dimension_semantics<parallel>], iteration_bounds = array<i64: 2, 1>, scalar_prefetch = 0 : i64, scratch_operands = 1 : i64, tpu.core_type = #tpu.core_type<tc>, window_params = [{transform_indices = @transform_0, window_bounds = array<i64: 1, 1, 78, 2>}, {pipeline_mode = #tpu.pipeline_mode<synchronous>, transform_indices = @transform_1, window_bounds = array<i64: 62, 128>}, {transform_indices = @transform_2, window_bounds = array<i64: 1, 48, 128>}]} {
    %c0 = arith.constant 0 : index
    %c0_0 = arith.constant 0 : index
    %c0_1 = arith.constant 0 : index
    %c0_2 = arith.constant 0 : index
    %0 = vector.load %arg2[%c0, %c0_0, %c0_1, %c0_2] : memref<1x1x78x2xbf16, #tpu.memory_space<vmem>>, vector<1x1x48x2xbf16>
    %1 = vector.shape_cast %0 : vector<1x1x48x2xbf16> to vector<48x2xbf16>
    %c0_3 = arith.constant 0 : index
    %c0_4 = arith.constant 0 : index
    %2 = vector.load %arg5[%c0_3, %c0_4] : memref<48x62xbf16, #tpu.memory_space<vmem>>, vector<48x2xbf16>
    tpu.vector_store %arg5[%c0_3, %c0_4], %1 {strides = array<i32>} : memref<48x62xbf16, #tpu.memory_space<vmem>>, vector<48x2xbf16>,
    %c0_5 = arith.constant 0 : index
    %c0_6 = arith.constant 0 : index
    %c1 = arith.constant 1 : index
    %c0_7 = arith.constant 0 : index
    %3 = vector.load %arg2[%c0_5, %c0_6, %c1, %c0_7] : memref<1x1x78x2xbf16, #tpu.memory_space<vmem>>, vector<1x1x48x2xbf16>
    %4 = vector.shape_cast %3 : vector<1x1x48x2xbf16> to vector<48x2xbf16>
    %c0_8 = arith.constant 0 : index
    %c2 = arith.constant 2 : index
    %5 = vector.load %arg5[%c0_8, %c2] : memref<48x62xbf16, #tpu.memory_space<vmem>>, vector<48x2xbf16>
    tpu.vector_store %arg5[%c0_8, %c2], %4 {strides = array<i32>} : memref<48x62xbf16, #tpu.memory_space<vmem>>, vector<48x2xbf16>,
    %c0_9 = arith.constant 0 : index
    %c0_10 = arith.constant 0 : index
    %c2_11 = arith.constant 2 : index
    %c0_12 = arith.constant 0 : index
    %6 = vector.load %arg2[%c0_9, %c0_10, %c2_11, %c0_12] : memref<1x1x78x2xbf16, #tpu.memory_space<vmem>>, vector<1x1x48x2xbf16>
    %7 = vector.shape_cast %6 : vector<1x1x48x2xbf16> to vector<48x2xbf16>
    %c0_13 = arith.constant 0 : index
    %c4 = arith.constant 4 : index
    %8 = vector.load %arg5[%c0_13, %c4] : memref<48x62xbf16, #tpu.memory_space<vmem>>, vector<48x2xbf16>
    tpu.vector_store %arg5[%c0_13, %c4], %7 {strides = array<i32>} : memref<48x62xbf16, #tpu.memory_space<vmem>>, vector<48x2xbf16>,
    %c0_14 = arith.constant 0 : index
    %c0_15 = arith.constant 0 : index
    %c3 = arith.constant 3 : index
    %c0_16 = arith.constant 0 : index
    %9 = vector.load %arg2[%c0_14, %c0_15, %c3, %c0_16] : memref<1x1x78x2xbf16, #tpu.memory_space<vmem>>, vector<1x1x48x2xbf16>
    %10 = vector.shape_cast %9 : vector<1x1x48x2xbf16> to vector<48x2xbf16>
    %c0_17 = arith.constant 0 : index
    %c6 = arith.constant 6 : index
    %11 = vector.load %arg5[%c0_17, %c6] : memref<48x62xbf16, #tpu.memory_space<vmem>>, vector<48x2xbf16>
    tpu.vector_store %arg5[%c0_17, %c6], %10 {strides = array<i32>} : memref<48x62xbf16, #tpu.memory_space<vmem>>, vector<48x2xbf16>,
    %c0_18 = arith.constant 0 : index
    %c0_19 = arith.constant 0 : index
    %c4_20 = arith.constant 4 : index
    %c0_21 = arith.constant 0 : index
    %12 = vector.load %arg2[%c0_18, %c0_19, %c4_20, %c0_21] : memref<1x1x78x2xbf16, #tpu.memory_space<vmem>>, vector<1x1x48x2xbf16>
    %13 = vector.shape_cast %12 : vector<1x1x48x2xbf16> to vector<48x2xbf16>
    %c0_22 = arith.constant 0 : index
    %c8 = arith.constant 8 : index
    %14 = vector.load %arg5[%c0_22, %c8] : memref<48x62xbf16, #tpu.memory_space<vmem>>, vector<48x2xbf16>
    tpu.vector_store %arg5[%c0_22, %c8], %13 {strides = array<i32>} : memref<48x62xbf16, #tpu.memory_space<vmem>>, vector<48x2xbf16>,
    %c0_23 = arith.constant 0 : index
    %c0_24 = arith.constant 0 : index
    %c5 = arith.constant 5 : index
    %c0_25 = arith.constant 0 : index
    %15 = vector.load %arg2[%c0_23, %c0_24, %c5, %c0_25] : memref<1x1x78x2xbf16, #tpu.memory_space<vmem>>, vector<1x1x48x2xbf16>
    %16 = vector.shape_cast %15 : vector<1x1x48x2xbf16> to vector<48x2xbf16>
    %c0_26 = arith.constant 0 : index
    %c10 = arith.constant 10 : index
    %17 = vector.load %arg5[%c0_26, %c10] : memref<48x62xbf16, #tpu.memory_space<vmem>>, vector<48x2xbf16>
    tpu.vector_store %arg5[%c0_26, %c10], %16 {strides = array<i32>} : memref<48x62xbf16, #tpu.memory_space<vmem>>, vector<48x2xbf16>,
    %c0_27 = arith.constant 0 : index
    %c0_28 = arith.constant 0 : index
    %c6_29 = arith.constant 6 : index
    %c0_30 = arith.constant 0 : index
    %18 = vector.load %arg2[%c0_27, %c0_28, %c6_29, %c0_30] : memref<1x1x78x2xbf16, #tpu.memory_space<vmem>>, vector<1x1x48x2xbf16>
    %19 = vector.shape_cast %18 : vector<1x1x48x2xbf16> to vector<48x2xbf16>
    %c0_31 = arith.constant 0 : index
    %c12 = arith.constant 12 : index
    %20 = vector.load %arg5[%c0_31, %c12] : memref<48x62xbf16, #tpu.memory_space<vmem>>, vector<48x2xbf16>
    tpu.vector_store %arg5[%c0_31, %c12], %19 {strides = array<i32>} : memref<48x62xbf16, #tpu.memory_space<vmem>>, vector<48x2xbf16>,
    %c0_32 = arith.constant 0 : index
    %c0_33 = arith.constant 0 : index
    %c7 = arith.constant 7 : index
    %c0_34 = arith.constant 0 : index
    %21 = vector.load %arg2[%c0_32, %c0_33, %c7, %c0_34] : memref<1x1x78x2xbf16, #tpu.memory_space<vmem>>, vector<1x1x48x2xbf16>
    %22 = vector.shape_cast %21 : vector<1x1x48x2xbf16> to vector<48x2xbf16>
    %c0_35 = arith.constant 0 : index
    %c14 = arith.constant 14 : index
    %23 = vector.load %arg5[%c0_35, %c14] : memref<48x62xbf16, #tpu.memory_space<vmem>>, vector<48x2xbf16>
    tpu.vector_store %arg5[%c0_35, %c14], %22 {strides = array<i32>} : memref<48x62xbf16, #tpu.memory_space<vmem>>, vector<48x2xbf16>,
    %c0_36 = arith.constant 0 : index
    %c0_37 = arith.constant 0 : index
    %c8_38 = arith.constant 8 : index
    %c0_39 = arith.constant 0 : index
    %24 = vector.load %arg2[%c0_36, %c0_37, %c8_38, %c0_39] : memref<1x1x78x2xbf16, #tpu.memory_space<vmem>>, vector<1x1x48x2xbf16>
    %25 = vector.shape_cast %24 : vector<1x1x48x2xbf16> to vector<48x2xbf16>
    %c0_40 = arith.constant 0 : index
    %c16 = arith.constant 16 : index
    %26 = vector.load %arg5[%c0_40, %c16] : memref<48x62xbf16, #tpu.memory_space<vmem>>, vector<48x2xbf16>
    tpu.vector_store %arg5[%c0_40, %c16], %25 {strides = array<i32>} : memref<48x62xbf16, #tpu.memory_space<vmem>>, vector<48x2xbf16>,
    %c0_41 = arith.constant 0 : index
    %c0_42 = arith.constant 0 : index
    %c9 = arith.constant 9 : index
    %c0_43 = arith.constant 0 : index
    %27 = vector.load %arg2[%c0_41, %c0_42, %c9, %c0_43] : memref<1x1x78x2xbf16, #tpu.memory_space<vmem>>, vector<1x1x48x2xbf16>
    %28 = vector.shape_cast %27 : vector<1x1x48x2xbf16> to vector<48x2xbf16>
    %c0_44 = arith.constant 0 : index
    %c18 = arith.constant 18 : index
    %29 = vector.load %arg5[%c0_44, %c18] : memref<48x62xbf16, #tpu.memory_space<vmem>>, vector<48x2xbf16>
    tpu.vector_store %arg5[%c0_44, %c18], %28 {strides = array<i32>} : memref<48x62xbf16, #tpu.memory_space<vmem>>, vector<48x2xbf16>,
    %c0_45 = arith.constant 0 : index
    %c0_46 = arith.constant 0 : index
    %c10_47 = arith.constant 10 : index
    %c0_48 = arith.constant 0 : index
    %30 = vector.load %arg2[%c0_45, %c0_46, %c10_47, %c0_48] : memref<1x1x78x2xbf16, #tpu.memory_space<vmem>>, vector<1x1x48x2xbf16>
    %31 = vector.shape_cast %30 : vector<1x1x48x2xbf16> to vector<48x2xbf16>
    %c0_49 = arith.constant 0 : index
    %c20 = arith.constant 20 : index
    %32 = vector.load %arg5[%c0_49, %c20] : memref<48x62xbf16, #tpu.memory_space<vmem>>, vector<48x2xbf16>
    tpu.vector_store %arg5[%c0_49, %c20], %31 {strides = array<i32>} : memref<48x62xbf16, #tpu.memory_space<vmem>>, vector<48x2xbf16>,
    %c0_50 = arith.constant 0 : index
    %c0_51 = arith.constant 0 : index
    %c11 = arith.constant 11 : index
    %c0_52 = arith.constant 0 : index
    %33 = vector.load %arg2[%c0_50, %c0_51, %c11, %c0_52] : memref<1x1x78x2xbf16, #tpu.memory_space<vmem>>, vector<1x1x48x2xbf16>
    %34 = vector.shape_cast %33 : vector<1x1x48x2xbf16> to vector<48x2xbf16>
    %c0_53 = arith.constant 0 : index
    %c22 = arith.constant 22 : index
    %35 = vector.load %arg5[%c0_53, %c22] : memref<48x62xbf16, #tpu.memory_space<vmem>>, vector<48x2xbf16>
    tpu.vector_store %arg5[%c0_53, %c22], %34 {strides = array<i32>} : memref<48x62xbf16, #tpu.memory_space<vmem>>, vector<48x2xbf16>,
    %c0_54 = arith.constant 0 : index
    %c0_55 = arith.constant 0 : index
    %c12_56 = arith.constant 12 : index
    %c0_57 = arith.constant 0 : index
    %36 = vector.load %arg2[%c0_54, %c0_55, %c12_56, %c0_57] : memref<1x1x78x2xbf16, #tpu.memory_space<vmem>>, vector<1x1x48x2xbf16>
    %37 = vector.shape_cast %36 : vector<1x1x48x2xbf16> to vector<48x2xbf16>
    %c0_58 = arith.constant 0 : index
    %c24 = arith.constant 24 : index
    %38 = vector.load %arg5[%c0_58, %c24] : memref<48x62xbf16, #tpu.memory_space<vmem>>, vector<48x2xbf16>
    tpu.vector_store %arg5[%c0_58, %c24], %37 {strides = array<i32>} : memref<48x62xbf16, #tpu.memory_space<vmem>>, vector<48x2xbf16>,
    %c0_59 = arith.constant 0 : index
    %c0_60 = arith.constant 0 : index
    %c13 = arith.constant 13 : index
    %c0_61 = arith.constant 0 : index
    %39 = vector.load %arg2[%c0_59, %c0_60, %c13, %c0_61] : memref<1x1x78x2xbf16, #tpu.memory_space<vmem>>, vector<1x1x48x2xbf16>
    %40 = vector.shape_cast %39 : vector<1x1x48x2xbf16> to vector<48x2xbf16>
    %c0_62 = arith.constant 0 : index
    %c26 = arith.constant 26 : index
    %41 = vector.load %arg5[%c0_62, %c26] : memref<48x62xbf16, #tpu.memory_space<vmem>>, vector<48x2xbf16>
    tpu.vector_store %arg5[%c0_62, %c26], %40 {strides = array<i32>} : memref<48x62xbf16, #tpu.memory_space<vmem>>, vector<48x2xbf16>,
    %c0_63 = arith.constant 0 : index
    %c0_64 = arith.constant 0 : index
    %c14_65 = arith.constant 14 : index
    %c0_66 = arith.constant 0 : index
    %42 = vector.load %arg2[%c0_63, %c0_64, %c14_65, %c0_66] : memref<1x1x78x2xbf16, #tpu.memory_space<vmem>>, vector<1x1x48x2xbf16>
    %43 = vector.shape_cast %42 : vector<1x1x48x2xbf16> to vector<48x2xbf16>
    %c0_67 = arith.constant 0 : index
    %c28 = arith.constant 28 : index
    %44 = vector.load %arg5[%c0_67, %c28] : memref<48x62xbf16, #tpu.memory_space<vmem>>, vector<48x2xbf16>
    tpu.vector_store %arg5[%c0_67, %c28], %43 {strides = array<i32>} : memref<48x62xbf16, #tpu.memory_space<vmem>>, vector<48x2xbf16>,
    %c0_68 = arith.constant 0 : index
    %c0_69 = arith.constant 0 : index
    %c15 = arith.constant 15 : index
    %c0_70 = arith.constant 0 : index
    %45 = vector.load %arg2[%c0_68, %c0_69, %c15, %c0_70] : memref<1x1x78x2xbf16, #tpu.memory_space<vmem>>, vector<1x1x48x2xbf16>
    %46 = vector.shape_cast %45 : vector<1x1x48x2xbf16> to vector<48x2xbf16>
    %c0_71 = arith.constant 0 : index
    %c30 = arith.constant 30 : index
    %47 = vector.load %arg5[%c0_71, %c30] : memref<48x62xbf16, #tpu.memory_space<vmem>>, vector<48x2xbf16>
    tpu.vector_store %arg5[%c0_71, %c30], %46 {strides = array<i32>} : memref<48x62xbf16, #tpu.memory_space<vmem>>, vector<48x2xbf16>,
    %c0_72 = arith.constant 0 : index
    %c0_73 = arith.constant 0 : index
    %c16_74 = arith.constant 16 : index
    %c0_75 = arith.constant 0 : index
    %48 = vector.load %arg2[%c0_72, %c0_73, %c16_74, %c0_75] : memref<1x1x78x2xbf16, #tpu.memory_space<vmem>>, vector<1x1x48x2xbf16>
    %49 = vector.shape_cast %48 : vector<1x1x48x2xbf16> to vector<48x2xbf16>
    %c0_76 = arith.constant 0 : index
    %c32 = arith.constant 32 : index
    %50 = vector.load %arg5[%c0_76, %c32] : memref<48x62xbf16, #tpu.memory_space<vmem>>, vector<48x2xbf16>
    tpu.vector_store %arg5[%c0_76, %c32], %49 {strides = array<i32>} : memref<48x62xbf16, #tpu.memory_space<vmem>>, vector<48x2xbf16>,
    %c0_77 = arith.constant 0 : index
    %c0_78 = arith.constant 0 : index
    %c17 = arith.constant 17 : index
    %c0_79 = arith.constant 0 : index
    %51 = vector.load %arg2[%c0_77, %c0_78, %c17, %c0_79] : memref<1x1x78x2xbf16, #tpu.memory_space<vmem>>, vector<1x1x48x2xbf16>
    %52 = vector.shape_cast %51 : vector<1x1x48x2xbf16> to vector<48x2xbf16>
    %c0_80 = arith.constant 0 : index
    %c34 = arith.constant 34 : index
    %53 = vector.load %arg5[%c0_80, %c34] : memref<48x62xbf16, #tpu.memory_space<vmem>>, vector<48x2xbf16>
    tpu.vector_store %arg5[%c0_80, %c34], %52 {strides = array<i32>} : memref<48x62xbf16, #tpu.memory_space<vmem>>, vector<48x2xbf16>,
    %c0_81 = arith.constant 0 : index
    %c0_82 = arith.constant 0 : index
    %c18_83 = arith.constant 18 : index
    %c0_84 = arith.constant 0 : index
    %54 = vector.load %arg2[%c0_81, %c0_82, %c18_83, %c0_84] : memref<1x1x78x2xbf16, #tpu.memory_space<vmem>>, vector<1x1x48x2xbf16>
    %55 = vector.shape_cast %54 : vector<1x1x48x2xbf16> to vector<48x2xbf16>
    %c0_85 = arith.constant 0 : index
    %c36 = arith.constant 36 : index
    %56 = vector.load %arg5[%c0_85, %c36] : memref<48x62xbf16, #tpu.memory_space<vmem>>, vector<48x2xbf16>
    tpu.vector_store %arg5[%c0_85, %c36], %55 {strides = array<i32>} : memref<48x62xbf16, #tpu.memory_space<vmem>>, vector<48x2xbf16>,
    %c0_86 = arith.constant 0 : index
    %c0_87 = arith.constant 0 : index
    %c19 = arith.constant 19 : index
    %c0_88 = arith.constant 0 : index
    %57 = vector.load %arg2[%c0_86, %c0_87, %c19, %c0_88] : memref<1x1x78x2xbf16, #tpu.memory_space<vmem>>, vector<1x1x48x2xbf16>
    %58 = vector.shape_cast %57 : vector<1x1x48x2xbf16> to vector<48x2xbf16>
    %c0_89 = arith.constant 0 : index
    %c38 = arith.constant 38 : index
    %59 = vector.load %arg5[%c0_89, %c38] : memref<48x62xbf16, #tpu.memory_space<vmem>>, vector<48x2xbf16>
    tpu.vector_store %arg5[%c0_89, %c38], %58 {strides = array<i32>} : memref<48x62xbf16, #tpu.memory_space<vmem>>, vector<48x2xbf16>,
    %c0_90 = arith.constant 0 : index
    %c0_91 = arith.constant 0 : index
    %c20_92 = arith.constant 20 : index
    %c0_93 = arith.constant 0 : index
    %60 = vector.load %arg2[%c0_90, %c0_91, %c20_92, %c0_93] : memref<1x1x78x2xbf16, #tpu.memory_space<vmem>>, vector<1x1x48x2xbf16>
    %61 = vector.shape_cast %60 : vector<1x1x48x2xbf16> to vector<48x2xbf16>
    %c0_94 = arith.constant 0 : index
    %c40 = arith.constant 40 : index
    %62 = vector.load %arg5[%c0_94, %c40] : memref<48x62xbf16, #tpu.memory_space<vmem>>, vector<48x2xbf16>
    tpu.vector_store %arg5[%c0_94, %c40], %61 {strides = array<i32>} : memref<48x62xbf16, #tpu.memory_space<vmem>>, vector<48x2xbf16>,
    %c0_95 = arith.constant 0 : index
    %c0_96 = arith.constant 0 : index
    %c21 = arith.constant 21 : index
    %c0_97 = arith.constant 0 : index
    %63 = vector.load %arg2[%c0_95, %c0_96, %c21, %c0_97] : memref<1x1x78x2xbf16, #tpu.memory_space<vmem>>, vector<1x1x48x2xbf16>
    %64 = vector.shape_cast %63 : vector<1x1x48x2xbf16> to vector<48x2xbf16>
    %c0_98 = arith.constant 0 : index
    %c42 = arith.constant 42 : index
    %65 = vector.load %arg5[%c0_98, %c42] : memref<48x62xbf16, #tpu.memory_space<vmem>>, vector<48x2xbf16>
    tpu.vector_store %arg5[%c0_98, %c42], %64 {strides = array<i32>} : memref<48x62xbf16, #tpu.memory_space<vmem>>, vector<48x2xbf16>,
    %c0_99 = arith.constant 0 : index
    %c0_100 = arith.constant 0 : index
    %c22_101 = arith.constant 22 : index
    %c0_102 = arith.constant 0 : index
    %66 = vector.load %arg2[%c0_99, %c0_100, %c22_101, %c0_102] : memref<1x1x78x2xbf16, #tpu.memory_space<vmem>>, vector<1x1x48x2xbf16>
    %67 = vector.shape_cast %66 : vector<1x1x48x2xbf16> to vector<48x2xbf16>
    %c0_103 = arith.constant 0 : index
    %c44 = arith.constant 44 : index
    %68 = vector.load %arg5[%c0_103, %c44] : memref<48x62xbf16, #tpu.memory_space<vmem>>, vector<48x2xbf16>
    tpu.vector_store %arg5[%c0_103, %c44], %67 {strides = array<i32>} : memref<48x62xbf16, #tpu.memory_space<vmem>>, vector<48x2xbf16>,
    %c0_104 = arith.constant 0 : index
    %c0_105 = arith.constant 0 : index
    %c23 = arith.constant 23 : index
    %c0_106 = arith.constant 0 : index
    %69 = vector.load %arg2[%c0_104, %c0_105, %c23, %c0_106] : memref<1x1x78x2xbf16, #tpu.memory_space<vmem>>, vector<1x1x48x2xbf16>
    %70 = vector.shape_cast %69 : vector<1x1x48x2xbf16> to vector<48x2xbf16>
    %c0_107 = arith.constant 0 : index
    %c46 = arith.constant 46 : index
    %71 = vector.load %arg5[%c0_107, %c46] : memref<48x62xbf16, #tpu.memory_space<vmem>>, vector<48x2xbf16>
    tpu.vector_store %arg5[%c0_107, %c46], %70 {strides = array<i32>} : memref<48x62xbf16, #tpu.memory_space<vmem>>, vector<48x2xbf16>,
    %c0_108 = arith.constant 0 : index
    %c0_109 = arith.constant 0 : index
    %c24_110 = arith.constant 24 : index
    %c0_111 = arith.constant 0 : index
    %72 = vector.load %arg2[%c0_108, %c0_109, %c24_110, %c0_111] : memref<1x1x78x2xbf16, #tpu.memory_space<vmem>>, vector<1x1x48x2xbf16>
    %73 = vector.shape_cast %72 : vector<1x1x48x2xbf16> to vector<48x2xbf16>
    %c0_112 = arith.constant 0 : index
    %c48 = arith.constant 48 : index
    %74 = vector.load %arg5[%c0_112, %c48] : memref<48x62xbf16, #tpu.memory_space<vmem>>, vector<48x2xbf16>
    tpu.vector_store %arg5[%c0_112, %c48], %73 {strides = array<i32>} : memref<48x62xbf16, #tpu.memory_space<vmem>>, vector<48x2xbf16>,
    %c0_113 = arith.constant 0 : index
    %c0_114 = arith.constant 0 : index
    %c25 = arith.constant 25 : index
    %c0_115 = arith.constant 0 : index
    %75 = vector.load %arg2[%c0_113, %c0_114, %c25, %c0_115] : memref<1x1x78x2xbf16, #tpu.memory_space<vmem>>, vector<1x1x48x2xbf16>
    %76 = vector.shape_cast %75 : vector<1x1x48x2xbf16> to vector<48x2xbf16>
    %c0_116 = arith.constant 0 : index
    %c50 = arith.constant 50 : index
    %77 = vector.load %arg5[%c0_116, %c50] : memref<48x62xbf16, #tpu.memory_space<vmem>>, vector<48x2xbf16>
    tpu.vector_store %arg5[%c0_116, %c50], %76 {strides = array<i32>} : memref<48x62xbf16, #tpu.memory_space<vmem>>, vector<48x2xbf16>,
    %c0_117 = arith.constant 0 : index
    %c0_118 = arith.constant 0 : index
    %c26_119 = arith.constant 26 : index
    %c0_120 = arith.constant 0 : index
    %78 = vector.load %arg2[%c0_117, %c0_118, %c26_119, %c0_120] : memref<1x1x78x2xbf16, #tpu.memory_space<vmem>>, vector<1x1x48x2xbf16>
    %79 = vector.shape_cast %78 : vector<1x1x48x2xbf16> to vector<48x2xbf16>
    %c0_121 = arith.constant 0 : index
    %c52 = arith.constant 52 : index
    %80 = vector.load %arg5[%c0_121, %c52] : memref<48x62xbf16, #tpu.memory_space<vmem>>, vector<48x2xbf16>
    tpu.vector_store %arg5[%c0_121, %c52], %79 {strides = array<i32>} : memref<48x62xbf16, #tpu.memory_space<vmem>>, vector<48x2xbf16>,
    %c0_122 = arith.constant 0 : index
    %c0_123 = arith.constant 0 : index
    %c27 = arith.constant 27 : index
    %c0_124 = arith.constant 0 : index
    %81 = vector.load %arg2[%c0_122, %c0_123, %c27, %c0_124] : memref<1x1x78x2xbf16, #tpu.memory_space<vmem>>, vector<1x1x48x2xbf16>
    %82 = vector.shape_cast %81 : vector<1x1x48x2xbf16> to vector<48x2xbf16>
    %c0_125 = arith.constant 0 : index
    %c54 = arith.constant 54 : index
    %83 = vector.load %arg5[%c0_125, %c54] : memref<48x62xbf16, #tpu.memory_space<vmem>>, vector<48x2xbf16>
    tpu.vector_store %arg5[%c0_125, %c54], %82 {strides = array<i32>} : memref<48x62xbf16, #tpu.memory_space<vmem>>, vector<48x2xbf16>,
    %c0_126 = arith.constant 0 : index
    %c0_127 = arith.constant 0 : index
    %c28_128 = arith.constant 28 : index
    %c0_129 = arith.constant 0 : index
    %84 = vector.load %arg2[%c0_126, %c0_127, %c28_128, %c0_129] : memref<1x1x78x2xbf16, #tpu.memory_space<vmem>>, vector<1x1x48x2xbf16>
    %85 = vector.shape_cast %84 : vector<1x1x48x2xbf16> to vector<48x2xbf16>
    %c0_130 = arith.constant 0 : index
    %c56 = arith.constant 56 : index
    %86 = vector.load %arg5[%c0_130, %c56] : memref<48x62xbf16, #tpu.memory_space<vmem>>, vector<48x2xbf16>
    tpu.vector_store %arg5[%c0_130, %c56], %85 {strides = array<i32>} : memref<48x62xbf16, #tpu.memory_space<vmem>>, vector<48x2xbf16>,
    %c0_131 = arith.constant 0 : index
    %c0_132 = arith.constant 0 : index
    %c29 = arith.constant 29 : index
    %c0_133 = arith.constant 0 : index
    %87 = vector.load %arg2[%c0_131, %c0_132, %c29, %c0_133] : memref<1x1x78x2xbf16, #tpu.memory_space<vmem>>, vector<1x1x48x2xbf16>
    %88 = vector.shape_cast %87 : vector<1x1x48x2xbf16> to vector<48x2xbf16>
    %c0_134 = arith.constant 0 : index
    %c58 = arith.constant 58 : index
    %89 = vector.load %arg5[%c0_134, %c58] : memref<48x62xbf16, #tpu.memory_space<vmem>>, vector<48x2xbf16>
    tpu.vector_store %arg5[%c0_134, %c58], %88 {strides = array<i32>} : memref<48x62xbf16, #tpu.memory_space<vmem>>, vector<48x2xbf16>,
    %c0_135 = arith.constant 0 : index
    %c0_136 = arith.constant 0 : index
    %c30_137 = arith.constant 30 : index
    %c0_138 = arith.constant 0 : index
    %90 = vector.load %arg2[%c0_135, %c0_136, %c30_137, %c0_138] : memref<1x1x78x2xbf16, #tpu.memory_space<vmem>>, vector<1x1x48x2xbf16>
    %91 = vector.shape_cast %90 : vector<1x1x48x2xbf16> to vector<48x2xbf16>
    %c0_139 = arith.constant 0 : index
    %c60 = arith.constant 60 : index
    %92 = vector.load %arg5[%c0_139, %c60] : memref<48x62xbf16, #tpu.memory_space<vmem>>, vector<48x2xbf16>
    tpu.vector_store %arg5[%c0_139, %c60], %91 {strides = array<i32>} : memref<48x62xbf16, #tpu.memory_space<vmem>>, vector<48x2xbf16>,
    %c0_140 = arith.constant 0 : index
    %c0_141 = arith.constant 0 : index
    %93 = vector.load %arg5[%c0_140, %c0_141] : memref<48x62xbf16, #tpu.memory_space<vmem>>, vector<48x62xbf16>
    %c0_142 = arith.constant 0 : index
    %c0_143 = arith.constant 0 : index
    %94 = vector.load %arg3[%c0_142, %c0_143] : memref<62x128xbf16, #tpu.memory_space<vmem>>, vector<62x128xbf16>
    %cst = arith.constant dense<0.000000e+00> : vector<48x128xf32>
    %95 = tpu.matmul %93, %94, %cst {dimension_numbers = #tpu.dot_dimension_numbers<[1], [0], [0], [1], [0, 0, 1, 1], [], []>} : vector<48x62xbf16>, vector<62x128xbf16>, vector<48x128xf32> -> vector<48x128xf32>
    %c0_144 = arith.constant 0 : index
    %c0_145 = arith.constant 0 : index
    %c0_146 = arith.constant 0 : index
    %96 = vector.load %arg4[%c0_144, %c0_145, %c0_146] : memref<1x48x128xf32, #tpu.memory_space<vmem>>, vector<1x48x128xf32>
    %97 = vector.shape_cast %96 : vector<1x48x128xf32> to vector<48x128xf32>
    %98 = vector.shape_cast %95 : vector<48x128xf32> to vector<1x48x128xf32>
    tpu.vector_store %arg4[%c0_144, %c0_145, %c0_146], %98 {strides = array<i32>} : memref<1x48x128xf32, #tpu.memory_space<vmem>>, vector<1x48x128xf32>,
    return
  }
  func.func @transform_0(%arg0: i32, %arg1: i32) -> (i32, i32, i32, i32) {
    %c0_i32 = arith.constant 0 : i32
    %c0_i32_0 = arith.constant 0 : i32
    %c0_i32_1 = arith.constant 0 : i32
    return %arg0, %arg1, %c0_i32, %c0_i32_0 : i32, i32, i32, i32
  }
  func.func @transform_1(%arg0: i32, %arg1: i32) -> (i32, i32) {
    %c0_i32 = arith.constant 0 : i32
    %c0_i32_0 = arith.constant 0 : i32
    %c0_i32_1 = arith.constant 0 : i32
    return %c0_i32, %c0_i32_0 : i32, i32
  }
  func.func @transform_2(%arg0: i32, %arg1: i32) -> (i32, i32, i32) {
    %c0_i32 = arith.constant 0 : i32
    %c0_i32_0 = arith.constant 0 : i32
    return %arg0, %arg1, %c0_i32 : i32, i32, i32
  }
}

</mosaic_0001>

<bundles_post_ra>
// kernel: tpu_custom_call.1
= control target key start
LH: loop header
LB: loop body
LE: loop exit
PB: predicated region body
PF: predicated region fallthrough
CT: control target
= control target key end

     0   :  { %7 = vsyncpa [#allocation4], 0  ;;  %s4357_s0 = inlined_call_operand.vmem [shape: bf16[2,1,78,2], index: 0, kind: input, shape index: {}]   ;;  %s4358_s1 = inlined_call_operand.vmem [shape: bf16[62,128], index: 1, kind: input, shape index: {}]   ;;  %s4359_s2 = inlined_call_operand.hbm [shape: f32[2,48,128], index: 2, kind: output, shape index: {}]  }
   0x1   :  { %9 = vsyncpa [#allocation4 + $0x1], 0  ;;  %s2988_s9 = smov 0   ;;  %s2990_s10 = smov 0  }
   0x2   :  { %s2992_s11 = smov 0   ;;  %s2994_s12 = smov 0  }
   0x3   :  { %s2996_s13 = smov 0   ;;  %s2998_s14 = smov 0  }
   0x4 LB: > { %s2694_s15 = sadd.s32 4294967295, %s2937_s14   ;;  %s2695_s16 = sadd.s32 4294967294, %s2937_s14   ;;  %s2937_s14 = sphi %s2998_s14, %s15_s14   ;;  %s2933_s13 = sphi %s2996_s13, %s4385_s13   ;;  %s2929_s12 = sphi %s2994_s12, %s4384_s12   ;;  %s2925_s11 = sphi %s2992_s11, %s4383_s11   ;;  %s2921_s10 = sphi %s2990_s10, %s4382_s10   ;;  %s2917_s9 = sphi %s2988_s9, %s4381_s9  }
   0x5   : > { %s27_s17 = sadd.s32 1, %s2933_s13  ;;  %s85_s18 = sadd.s32 1, %s2925_s11 }
   0x6   : > { %p29_p0 = scmp.ge.s32.totalorder %s27_s17, 2  ;;  %p95_p1 = scmp.ne.s32.totalorder %s2925_s11, %s2921_s10 }
   0x7   : > { %p96_p2 = scmp.eq.s32.totalorder %s2694_s15, 1  ;;  %p101_p3 = scmp.ne.s32.totalorder %s2921_s10, %s2917_s9 }
   0x8   : > { %s4387_s17 = smov (%p29_p0, %s27_s17), 0  ;;  %p102_p5 = scmp.eq.s32.totalorder %s2695_s16, 1 }
   0x9   : > { %p3028_p4 = por %p96_p2, %p95_p1  ;;  %s80_s20 = ssub.s32 %s2933_s13, %s4387_s17 }
   0xa   : > { %p2698_p6 = scmp.ge.s32.totalorder %s2937_s14, 1  ;;  %p83_p7 = scmp.eq.s32.totalorder %s80_s20, 0 }
   0xb   : > { %p3035_p8 = por %p102_p5, %p101_p3  ;;  %p135_p9 = scmp.lt.s32.totalorder %s2937_s14, 3 }
   0xc   : > { %s3041_s22 = scalar_select %p83_p7, %s2925_s11, %s85_s18  }
   0xd   : > { %p136_p10 = pnand %p2698_p6, %p135_p9 }
   0xe   : > { %p161_p11 = scmp.lt.s32.totalorder (!%p136_p10), %s2929_s12, 1  ;;  %s2939_s28 = smov (!%p136_p10), 4  }
   0xf   : > { %139 = sbr.rel (%p136_p10) target bundleno = 724 (0x2d4), region = 28  ;;  %s2940_s29 = smov (!%p136_p10), 2  }
  0x10   : > { %s2941_s30 = smov (!%p136_p10), 6   ;;  %s2942_s3 = smov (!%p136_p10), 8  }
  0x11   : > { %s2943_s4 = smov (!%p136_p10), 10   ;;  %s2944_s5 = smov (!%p136_p10), 12  }
  0x12   : > { %s2945_s6 = smov (!%p136_p10), 14   ;;  %s2946_s7 = smov (!%p136_p10), 16  }
  0x13   : > { %s2947_s8 = smov (!%p136_p10), 18   ;;  %s2948_s15 = smov (!%p136_p10), 20  }
  0x14   : > { %s162_s23 = scalar_select %p161_p11, %s2929_s12, 1  ;;  %vm298_vm0 = vcmask 1042432   ;;  %vm299_vm1 = vcmask 1046532   ;;  %vm192_vm2 = vsmask.f32 3328  ;;  %vm462_vm9 = vcmask 1041408  }
  0x15   : > { %vm3050_vm3 = vmor %vm298_vm0, %vm299_vm1  ;;  %vm193_vm4 = vsmask.f32 7440  ;;  %vm352_vm6 = vsmask.f32 2304  ;;  %vm353_vm7 = vsmask.f32 6416 }
  0x16   : > { %s2764_s24 = smul.u32 40, %s162_s23  ;;  %vm3084_vm5 = vmor %vm192_vm2, %vm193_vm4  ;;  %vm463_vm10 = vcmask 1045508   ;;  %vm516_vm12 = vsmask.f32 1280  ;;  %vm517_vm13 = vsmask.f32 5392 }
  0x17   : > { %vm3124_vm8 = vmor %vm352_vm6, %vm353_vm7  ;;  %vm626_vm15 = vcmask 1040384   ;;  %vm627_vm0 = vcmask 1044484   ;;  %vm178_vm1 = vcmask 11264   ;;  %vm680_vm4 = vsmask.f32 256  ;;  %s2949_s16 = smov 22  }
  0x18   : > { %s3048_s27 = scalar_lea.vmem %s4357_s0, %s2764_s24  ;;  %vm3148_vm11 = vmor %vm462_vm9, %vm463_vm10  ;;  %vm681_vm6 = vsmask.f32 4368  ;;  %s2950_s18 = smov 24   ;;  %vm277_vm9 = vcmask 27664   ;;  %vm338_vm10 = vcmask 44064  }
  0x19   : > { %v284_v1 = vld [vmem:[%s3048_s27] sm:$0xe]  ;;  %v285_v2 = vld [vmem:[%s3048_s27 + $0x4] sm:$0xf]  ;;  %v286_v3 = vld [vmem:[%s3048_s27 + $0x8] sm:$0xf] }
  0x1a   : > { %v2700_v4 = vrot.slane %v284_v1, 9  ;;  %v303_v5 = vrot.slane %v285_v2, 5  ;;  %v306_v6 = vrot.slane %v286_v3, 5  ;;  %v287_v7 = vld [vmem:[%s3048_s27 + $0xc] sm:$0xf]  ;;  %vm3183_vm14 = vmor %vm516_vm12, %vm517_vm13  ;;  %s2951_s20 = smov 26  }
  0x1b   : > { %v309_v8 = vrot.slane %v287_v7, 5  ;;  %v3059_v9 = vld [vmem:[%s3048_s27 + $0x10] sm:$0xf]  ;;  %v185_v10 = vld [vmem:[%s3048_s27] sm:$0xf]  ;;  %vm3215_vm2 = vmor %vm626_vm15, %vm627_vm0  ;;  %s2952_s23 = smov 28  }
  0x1c   : > { %v304_v11 = vsel %vm3050_vm3, %v2700_v4, %v303_v5  ;;  %v305_v12 = vrot.slane %v303_v5, 4  ;;  %v308_v13 = vrot.slane %v306_v6, 4  ;;  %v312_v14 = vrot.slane %v3059_v9, 5  ;;  %v186_v15 = vld [vmem:[%s3048_s27 + $0x4] sm:$0xf]  ;;  %vm3267_vm7 = vmor %vm680_vm4, %vm681_vm6  ;;  %s2953_s24 = smov 30  }
  0x1d   : > { %320 = vrot.lane.b32.xlu0 %v304_v11, %s2939_s28  ;;  %v311_v16 = vrot.slane %v309_v8, 4  ;;  %v196_v17 = vshrl.u32 %v185_v10, 16  ;;  %v199_v18 = vshll.u32 %v185_v10, 16  ;;  %v205_v19 = vshll.u32 %v186_v15, 16  ;;  %v187_v20 = vld [vmem:[%s3048_s27 + $0x8] sm:$0xf] }
  0x1e   : > { %v307_v21 = vsel %vm3050_vm3, %v305_v12, %v306_v6  ;;  %v310_v22 = vsel %vm3050_vm3, %v308_v13, %v309_v8  ;;  %v209_v23 = vshrl.u32 %v186_v15, 16  ;;  %v188_v24 = vld [vmem:[%s3048_s27 + $0xc] sm:$0xf]  ;;  %v215_v25 = vshll.u32 %v187_v20, 16  ;;  %v189_v26 = vld [vmem:[%s3048_s27 + $0x10] sm:$0xf] }
  0x1f   : > { %322 = vrot.lane.b32.xlu1 %v307_v21, %s2939_s28  ;;  %v313_v27 = vsel %vm3050_vm3, %v311_v16, %v312_v14  ;;  %v198_v28 = vrot.slane %v196_v17, 4  ;;  %v201_v29 = vrot.slane %v199_v18, 5  ;;  %v207_v30 = vrot.slane %v205_v19, 5  ;;  %v190_v31 = vld [vmem:[%s3048_s27 + $0x14] sm:$0xf]  ;;  %s2954_s25 = smov 32  }
  0x20   : > { %v217_v32 = vrot.slane %v215_v25, 5  ;;  %v219_v33 = vshrl.u32 %v187_v20, 16  ;;  %v225_v34 = vshll.u32 %v188_v24, 16  ;;  %v229_v35 = vshrl.u32 %v188_v24, 16  ;;  %v191_v40 = vld [vmem:[%s3048_s27 + $0x18] sm:$0x1] }
  0x21   : > { %324 = vrot.lane.b32.xlu0 %v310_v22, %s2939_s28  ;;  %v202_v36 = vor.u32 %v201_v29, %v198_v28  ;;  %v211_v37 = vrot.slane %v209_v23, 4  ;;  %v235_v38 = vshll.u32 %v189_v26, 16  ;;  %v239_v39 = vshrl.u32 %v189_v26, 16  ;;  %v289_v50 = vld [vmem:[%s3048_s27 + $0x14] sm:$0xf]  ;;  %s2955_s26 = smov 34  }
  0x22   : > { %v221_v42 = vrot.slane %v219_v33, 4  ;;  %v227_v43 = vrot.slane %v225_v34, 5  ;;  %v231_v44 = vrot.slane %v229_v35, 4  ;;  %v245_v45 = vshll.u32 %v190_v31, 16  ;;  %v290_v59 = vld [vmem:[%s3048_s27 + $0x18] sm:$0x1] }
  0x23   : > { %326 = vrot.lane.b32.xlu1 %v313_v27, %s2939_s28  ;;  %v203_v46 = vrot.slane %v202_v36, 4  ;;  %v212_v47 = vor.u32 %v211_v37, %v207_v30  ;;  %v237_v48 = vrot.slane %v235_v38, 5  ;;  %v249_v49 = vshrl.u32 %v190_v31, 16  ;;  %v346_v63 = vld [vmem:[%s3048_s27 + $0x4] sm:$0xf] }
  0x24   : > { %v222_v51 = vor.u32 %v221_v42, %v217_v32  ;;  %v232_v52 = vor.u32 %v231_v44, %v227_v43  ;;  %v247_v53 = vrot.slane %v245_v45, 5  ;;  %v255_v54 = vshll.u32 %v191_v40, 16  ;;  %v347_v4 = vld [vmem:[%s3048_s27 + $0x8] sm:$0xf]  ;;  %v345_v8 = vld [vmem:[%s3048_s27] sm:$0xe] }
  0x25   : > { %v208_v55 = vsel %vm3084_vm5, %v203_v46, %v207_v30  ;;  %v213_v56 = vrot.slane %v212_v47, 4  ;;  %v251_v57 = vrot.slane %v249_v49, 4  ;;  %v241_v58 = vrot.slane %v239_v39, 4  ;;  %v348_v15 = vld [vmem:[%s3048_s27 + $0xc] sm:$0xf] }
  0x26   : > { %259 = vrot.lane.b32.xlu0 %v208_v55, %s2940_s29  ;;  %v223_v60 = vrot.slane %v222_v51, 4  ;;  %v233_v61 = vrot.slane %v232_v52, 4  ;;  %v315_v62 = vrot.slane %v289_v50, 5  ;;  %v257_v6 = vrot.slane %v255_v54, 5  ;;  %v349_v20 = vld [vmem:[%s3048_s27 + $0x10] sm:$0xf] }
  0x27   : > { %v218_v1 = vsel %vm3084_vm5, %v213_v56, %v217_v32  ;;  %v252_v2 = vor.u32 %v251_v57, %v247_v53  ;;  %v242_v3 = vor.u32 %v241_v58, %v237_v48  ;;  %v318_v7 = vrot.slane %v290_v59, 5  ;;  %v350_v33 = vld [vmem:[%s3048_s27 + $0x14] sm:$0xf]  ;;  %v351_v40 = vld [vmem:[%s3048_s27 + $0x18] sm:$0x3] }
  0x28   : > { %v228_v5 = vsel %vm3084_vm5, %v223_v60, %v227_v43  ;;  %v238_v10 = vsel %vm3084_vm5, %v233_v61, %v237_v48  ;;  %v365_v12 = vshrl.u32 %v346_v63, 16  ;;  %v368_v13 = vshll.u32 %v346_v63, 16 }
  0x29   : > { %263 = vrot.lane.b32.xlu1 %v228_v5, %s2940_s29  ;;  %v243_v11 = vrot.slane %v242_v3, 4  ;;  %v253_v16 = vrot.slane %v252_v2, 4  ;;  %v317_v17 = vrot.slane %v315_v62, 4  ;;  %v375_v18 = vshrl.u32 %v347_v4, 16  ;;  %v509_v5 = vld [vmem:[%s3048_s27] sm:$0xc] }
  0x2a   : > { %261 = vrot.lane.b32.xlu0 %v218_v1, %s2940_s29  ;;  %v378_v19 = vshll.u32 %v347_v4, 16  ;;  %v314_v22 = vrot.slane %v312_v14, 4  ;;  %v367_v23 = vrot.slane %v365_v12, 5  ;;  %v370_v24 = vrot.slane %v368_v13, 6  ;;  %v449_v1 = vld [vmem:[%s3048_s27 + $0x4] sm:$0xf] }
  0x2b   : > { %v248_v21 = vsel %vm3084_vm5, %v243_v11, %v247_v53  ;;  %v377_v25 = vrot.slane %v375_v18, 5  ;;  %v356_v27 = vshrl.u32 %v345_v8, 16  ;;  %v359_v28 = vshll.u32 %v345_v8, 16  ;;  %v448_v4 = vld [vmem:[%s3048_s27] sm:$0xc] }
  0x2c   : > { %v380_v26 = vrot.slane %v378_v19, 6  ;;  %v371_v29 = vor.u32 %v370_v24, %v367_v23  ;;  %v385_v30 = vshrl.u32 %v348_v15, 16  ;;  %v388_v31 = vshll.u32 %v348_v15, 16  ;;  %v450_v12 = vld [vmem:[%s3048_s27 + $0x8] sm:$0xf] }
  0x2d   : > { %265 = vrot.lane.b32.xlu1 %v238_v10, %s2940_s29  ;;  %v395_v32 = vshrl.u32 %v349_v20, 16  ;;  %v258_v34 = vsel %vm3084_vm5, %v253_v16, %v257_v6  ;;  %v358_v9 = vrot.slane %v356_v27, 5  ;;  %v361_v14 = vrot.slane %v359_v28, 6  ;;  %v453_v19 = vld [vmem:[%s3048_s27 + $0x14] sm:$0xf] }
  0x2e   : > { %267 = vrot.lane.b32.xlu0 %v248_v21, %s2940_s29  ;;  %v398_v35 = vshll.u32 %v349_v20, 16  ;;  %v319_v36 = vsel %vm3050_vm3, %v317_v17, %v318_v7  ;;  %v316_v37 = vsel %vm3050_vm3, %v314_v22, %v315_v62  ;;  %v387_v38 = vrot.slane %v385_v30, 5  ;;  %v510_v7 = vld [vmem:[%s3048_s27 + $0x4] sm:$0xf]  ;;  %v451_v17 = vld [vmem:[%s3048_s27 + $0xc] sm:$0xf] }
  0x2f   : > { %v390_v39 = vrot.slane %v388_v31, 6  ;;  %v373_v42 = vrot.slane %v371_v29, 4  ;;  %v381_v43 = vor.u32 %v380_v26, %v377_v25  ;;  %v362_v44 = vor.u32 %v361_v14, %v358_v9  ;;  %v511_v24 = vld [vmem:[%s3048_s27 + $0x8] sm:$0xf]  ;;  %v452_v28 = vld [vmem:[%s3048_s27 + $0x10] sm:$0xf] }
  0x30   : > { %v405_v45 = vshrl.u32 %v350_v33, 16  ;;  %v397_v48 = vrot.slane %v395_v32, 5  ;;  %v400_v49 = vrot.slane %v398_v35, 6  ;;  %v408_v50 = vshll.u32 %v350_v33, 16  ;;  %v512_v30 = vld [vmem:[%s3048_s27 + $0xc] sm:$0xf] }
  0x31   : > { %269 = vrot.lane.b32.xlu1 %v258_v34, %s2940_s29  ;;  %v391_v47 = vor.u32 %v390_v39, %v387_v38  ;;  %v363_v51 = vrot.slane %v362_v44, 4  ;;  %v415_v53 = vshrl.u32 %v351_v40, 16  ;;  %v418_v54 = vshll.u32 %v351_v40, 16  ;;  %v454_v9 = vld [vmem:[%s3048_s27 + $0x18] sm:$0x3]  ;;  %s2957_s29 = smov 38  }
  0x32   : > { %328 = vrot.lane.b32.xlu0 %v316_v37, %s2939_s28  ;;  %v407_v52 = vrot.slane %v405_v45, 5  ;;  %v383_v55 = vrot.slane %v381_v43, 4  ;;  %v410_v56 = vrot.slane %v408_v50, 6  ;;  %v382_v58 = vsel %vm3124_vm8, %v373_v42, %v381_v43  ;;  %v513_v44 = vld [vmem:[%s3048_s27 + $0x10] sm:$0xf] }
  0x33   : > { %v372_v57 = vsel %vm3124_vm8, %v363_v51, %v371_v29  ;;  %v401_v59 = vor.u32 %v400_v49, %v397_v48  ;;  %v393_v60 = vrot.slane %v391_v47, 4  ;;  %v417_v62 = vrot.slane %v415_v53, 5  ;;  %v514_v50 = vld [vmem:[%s3048_s27 + $0x14] sm:$0xf] }
  0x34   : > { %v411_v61 = vor.u32 %v410_v56, %v407_v52  ;;  %v420_v63 = vrot.slane %v418_v54, 6  ;;  %v392_v2 = vsel %vm3124_vm8, %v383_v55, %v391_v47  ;;  %v467_v6 = vrot.slane %v449_v1, 6  ;;  %v515_v1 = vld [vmem:[%s3048_s27 + $0x18] sm:$0x7] }
  0x35   : > { %330 = vrot.lane.b32.xlu1 %v319_v36, %s2939_s28  ;;  %v403_v3 = vrot.slane %v401_v59, 4  ;;  %v402_v8 = vsel %vm3124_vm8, %v393_v60, %v401_v59  ;;  %v2701_v13 = vrot.slane %v448_v4, 10  ;;  %v520_v18 = vshrl.u32 %v509_v5, 16  ;;  %s2956_s28 = smov 36  }
  0x36   : > { %423 = vrot.lane.b32.xlu0 %v372_v57, %s2941_s30  ;;  %v413_v10 = vrot.slane %v411_v61, 4  ;;  %v421_v11 = vor.u32 %v420_v63, %v417_v62  ;;  %v529_v20 = vshrl.u32 %v510_v7, 16  ;;  %v532_v21 = vshll.u32 %v510_v7, 16 }
  0x37   : > { %v412_v15 = vsel %vm3124_vm8, %v403_v3, %v411_v61  ;;  %v523_v22 = vshll.u32 %v509_v5, 16  ;;  %v470_v23 = vrot.slane %v450_v12, 6  ;;  %v469_v26 = vrot.slane %v467_v6, 4 }
  0x38   : > { %v422_v25 = vsel %vm3124_vm8, %v413_v10, %v421_v11  ;;  %v468_v27 = vsel %vm3148_vm11, %v2701_v13, %v467_v6  ;;  %v473_v29 = vrot.slane %v451_v17, 6  ;;  %v479_v32 = vrot.slane %v453_v19, 6 }
  0x39   : > { %425 = vrot.lane.b32.xlu1 %v382_v58, %s2941_s30  ;;  %v472_v31 = vrot.slane %v470_v23, 4  ;;  %v522_v33 = vrot.slane %v520_v18, 6  ;;  %v525_v34 = vrot.slane %v523_v22, 7  ;;  %v531_v14 = vrot.slane %v529_v20, 6  ;;  %v3195_v20 = vld [vmem:[%s3048_s27 + $0x8] sm:$0xf] }
  0x3a   : > { %427 = vrot.lane.b32.xlu0 %v392_v2, %s2941_s30  ;;  %v534_v35 = vrot.slane %v532_v21, 7  ;;  %v539_v36 = vshrl.u32 %v511_v24, 16  ;;  %v542_v37 = vshll.u32 %v511_v24, 16  ;;  %v476_v38 = vrot.slane %v452_v28, 6  ;;  %v612_v21 = vld [vmem:[%s3048_s27] sm:$0x8] }
  0x3b   : > { %v549_v39 = vshrl.u32 %v512_v30, 16  ;;  %v552_v40 = vshll.u32 %v512_v30, 16  ;;  %v471_v42 = vsel %vm3148_vm11, %v469_v26, %v470_v23  ;;  %v475_v43 = vrot.slane %v473_v29, 4  ;;  %v3199_v22 = vld [vmem:[%s3048_s27 + $0x4] sm:$0xf] }
  0x3c   : > { %v474_v45 = vsel %vm3148_vm11, %v472_v31, %v473_v29  ;;  %v482_v47 = vrot.slane %v454_v9, 6  ;;  %v478_v48 = vrot.slane %v476_v38, 4  ;;  %v526_v49 = vor.u32 %v525_v34, %v522_v33  ;;  %v676_v30 = vld [vmem:[%s3048_s27 + $0xc] sm:$0xf]  ;;  %v677_v34 = vld [vmem:[%s3048_s27 + $0x10] sm:$0xf] }
  0x3d   : > { %429 = vrot.lane.b32.xlu1 %v402_v8, %s2941_s30  ;;  %v481_v51 = vrot.slane %v479_v32, 4  ;;  %v535_v52 = vor.u32 %v534_v35, %v531_v14  ;;  %v541_v53 = vrot.slane %v539_v36, 6  ;;  %v544_v54 = vrot.slane %v542_v37, 7  ;;  %v615_v9 = vld [vmem:[%s3048_s27 + $0xc] sm:$0xf] }
  0x3e   : > { %431 = vrot.lane.b32.xlu0 %v412_v15, %s2941_s30  ;;  %v551_v55 = vrot.slane %v549_v39, 6  ;;  %v554_v56 = vrot.slane %v552_v40, 7  ;;  %v559_v57 = vshrl.u32 %v513_v44, 16  ;;  %v562_v58 = vshll.u32 %v513_v44, 16  ;;  %v805_v40 = vld [vmem:[%s3048_s27 + $0xc] sm:$0xf] }
  0x3f   : > { %v477_v59 = vsel %vm3148_vm11, %v475_v43, %v476_v38  ;;  %v569_v60 = vshrl.u32 %v514_v50, 16  ;;  %v572_v61 = vshll.u32 %v514_v50, 16  ;;  %v480_v62 = vsel %vm3148_vm11, %v478_v48, %v479_v32  ;;  %v3228_v44 = vld [vmem:[%s3048_s27 + $0x10] sm:$0xf] }
  0x40   : > { %v527_v63 = vrot.slane %v526_v49, 4  ;;  %v483_v2 = vsel %vm3148_vm11, %v481_v51, %v482_v47  ;;  %v545_v4 = vor.u32 %v544_v54, %v541_v53  ;;  %v537_v5 = vrot.slane %v535_v52, 4  ;;  %v174_v47 = vld [vmem:[%s3048_s27 + $0x8] sm:$0xf]  ;;  %v806_v51 = vld [vmem:[%s3048_s27 + $0x10] sm:$0xf] }
  0x41   : > { %433 = vrot.lane.b32.xlu1 %v422_v25, %s2941_s30  ;;  %v555_v6 = vor.u32 %v554_v56, %v551_v55  ;;  %v561_v7 = vrot.slane %v559_v57, 6  ;;  %v564_v8 = vrot.slane %v562_v58, 7  ;;  %v571_v10 = vrot.slane %v569_v60, 6  ;;  %181 = vst.msk [vmem:[#allocation2 + $0x8] sm:$0xf] %vm178_vm1, %v174_v47  ;;  %s2958_s30 = smov 40  }
  0x42   : > { %484 = vrot.lane.b32.xlu0 %v468_v27, %s2942_s3  ;;  %v574_v11 = vrot.slane %v572_v61, 7  ;;  %v579_v12 = vshrl.u32 %v515_v1, 16  ;;  %v582_v13 = vshll.u32 %v515_v1, 16  ;;  %v536_v15 = vsel %vm3183_vm14, %v527_v63, %v535_v52  ;;  %v3203_v27 = vld [vmem:[%s3048_s27 + $0x8] sm:$0xf] }
  0x43   : > { %v547_v17 = vrot.slane %v545_v4, 4  ;;  %v546_v18 = vsel %vm3183_vm14, %v537_v5, %v545_v4  ;;  %v565_v19 = vor.u32 %v564_v8, %v561_v7  ;;  %v557_v23 = vrot.slane %v555_v6, 4  ;;  %v173_v56 = vld [vmem:[%s3048_s27 + $0x4] sm:$0xf]  ;;  %v175_v61 = vld [vmem:[%s3048_s27 + $0xc] sm:$0xf] }
  0x44   : > { %v575_v24 = vor.u32 %v574_v11, %v571_v10  ;;  %v581_v25 = vrot.slane %v579_v12, 6  ;;  %v584_v26 = vrot.slane %v582_v13, 7  ;;  %v634_v31 = vrot.slane %v3195_v20, 7  ;;  %180 = vst.msk [vmem:[#allocation2 + $0x4] sm:$0xf] %vm178_vm1, %v173_v56 }
  0x45   : > { %486 = vrot.lane.b32.xlu1 %v471_v42, %s2942_s3  ;;  %v556_v28 = vsel %vm3183_vm14, %v547_v17, %v555_v6  ;;  %v567_v29 = vrot.slane %v565_v19, 4  ;;  %v2702_v32 = vrot.slane %v612_v21, 11  ;;  %v631_v33 = vrot.slane %v3199_v22, 7  ;;  %v172_v42 = vld [vmem:[%s3048_s27] sm:$0xf] }
  0x46   : > { %488 = vrot.lane.b32.xlu0 %v474_v45, %s2942_s3  ;;  %v698_v35 = vshrl.u32 %v3203_v27, 16  ;;  %v566_v36 = vsel %vm3183_vm14, %v557_v23, %v565_v19  ;;  %v577_v37 = vrot.slane %v575_v24, 4  ;;  %v585_v38 = vor.u32 %v584_v26, %v581_v25  ;;  %179 = vst.msk [vmem:[#allocation2] sm:$0xf] %vm178_vm1, %v172_v42  ;;  %182 = vst.msk [vmem:[#allocation2 + $0xc] sm:$0xf] %vm178_vm1, %v175_v61 }
  0x47   : > { %v707_v39 = vshrl.u32 %v676_v30, 16  ;;  %v576_v43 = vsel %vm3183_vm14, %v567_v29, %v575_v24  ;;  %v716_v45 = vshrl.u32 %v677_v34, 16  ;;  %v636_v48 = vrot.slane %v634_v31, 4  ;;  %v177_v6 = vld [vmem:[%s3048_s27 + $0x14] sm:$0xf] }
  0x48   : > { %v637_v49 = vrot.slane %v615_v9, 7  ;;  %v632_v50 = vsel %vm3215_vm2, %v2702_v32, %v631_v33  ;;  %v3241_v52 = vrot.slane %v698_v35, 7  ;;  %v710_v53 = vshll.u32 %v676_v30, 16  ;;  %184 = vst.msk [vmem:[#allocation2 + $0x14] sm:$0xf] %vm178_vm1, %v177_v6 }
  0x49   : > { %490 = vrot.lane.b32.xlu1 %v477_v59, %s2942_s3  ;;  %v830_v54 = vshll.u32 %v805_v40, 16  ;;  %v834_v55 = vshrl.u32 %v805_v40, 16  ;;  %v586_v57 = vsel %vm3183_vm14, %v577_v37, %v585_v38  ;;  %v709_v58 = vrot.slane %v707_v39, 7  ;;  %v176_v12 = vld [vmem:[%s3048_s27 + $0x10] sm:$0xf] }
  0x4a   : > { %492 = vrot.lane.b32.xlu0 %v480_v62, %s2942_s3  ;;  %v639_v59 = vrot.slane %v637_v49, 4  ;;  %v640_v60 = vrot.slane %v3228_v44, 7  ;;  %v3250_v62 = vrot.slane %v716_v45, 7  ;;  %v719_v63 = vshll.u32 %v677_v34, 16  ;;  %v959_v21 = vld [vmem:[%s3048_s27 + $0xc] sm:$0xf] }
  0x4b   : > { %v840_v1 = vshll.u32 %v806_v51, 16  ;;  %v3254_v4 = vrot.slane %v830_v54, 5  ;;  %v836_v5 = vrot.slane %v834_v55, 4  ;;  %v638_v7 = vsel %vm3215_vm2, %v636_v48, %v637_v49  ;;  %183 = vst.msk [vmem:[#allocation2 + $0x10] sm:$0xf] %vm178_vm1, %v176_v12 }
  0x4c   : > { %v705_v8 = vrot.slane %v3241_v52, 4  ;;  %v712_v10 = vor.u32 %v710_v53, %v709_v58  ;;  %v641_v11 = vsel %vm3215_vm2, %v639_v59, %v640_v60  ;;  %v721_v17 = vor.u32 %v719_v63, %v3250_v62  ;;  %v3275_v23 = vld [vmem:[%s3048_s27 + $0x14] sm:$0xf]  ;;  %v3280_v25 = vld [vmem:[%s3048_s27 + $0xc] sm:$0xf] }
  0x4d   : > { %494 = vrot.lane.b32.xlu1 %v483_v2, %s2942_s3  ;;  %v844_v2 = vshrl.u32 %v806_v51, 16  ;;  %v837_v24 = vor.u32 %v836_v5, %v3254_v4  ;;  %v984_v29 = vshrl.u32 %v959_v21, 16  ;;  %v987_v30 = vshll.u32 %v959_v21, 16  ;;  %v902_v34 = vld [vmem:[%s3048_s27 + $0x10] sm:$0xf] }
  0x4e   : > { %587 = vrot.lane.b32.xlu0 %v536_v15, %s2943_s4  ;;  %v714_v15 = vrot.slane %v709_v58, 4  ;;  %v713_v26 = vsel %vm3267_vm7, %v705_v8, %v712_v10  ;;  %v850_v35 = vshll.u32 %v3275_v23, 16  ;;  %v918_v37 = vrot.slane %v3280_v25, 5  ;;  %v961_v38 = vld [vmem:[%s3048_s27 + $0x14] sm:$0xf] }
  0x4f   : > { %v846_v19 = vrot.slane %v844_v2, 4  ;;  %v838_v39 = vrot.slane %v837_v24, 4  ;;  %v769_v40 = vld [vmem:[%s3048_s27 + $0x10] sm:$0xf]  ;;  %v921_v45 = vrot.slane %v902_v34, 5  ;;  %v986_v47 = vrot.slane %v984_v29, 5 }
  0x50   : > { %v722_v32 = vsel %vm3267_vm7, %v714_v15, %v721_v17  ;;  %v989_v48 = vrot.slane %v987_v30, 6  ;;  %v3297_v49 = vld [vmem:[%s3048_s27 + $0x14] sm:$0xf]  ;;  %v3299_v51 = vrot.slane %v850_v35, 5  ;;  %v1004_v53 = vshrl.u32 %v961_v38, 16 }
  0x51   : > { %589 = vrot.lane.b32.xlu1 %v546_v18, %s2943_s4  ;;  %v842_v18 = vrot.slane %v840_v1, 5  ;;  %v1007_v54 = vshll.u32 %v961_v38, 16  ;;  %v1117_v55 = vld [vmem:[%s3048_s27 + $0xc] sm:$0xf]  ;;  %v920_v56 = vrot.slane %v918_v37, 4  ;;  %v923_v61 = vrot.slane %v921_v45, 4 }
  0x52   : > { %591 = vrot.lane.b32.xlu0 %v556_v28, %s2943_s4  ;;  %v960_v28 = vld [vmem:[%s3048_s27 + $0x10] sm:$0xf]  ;;  %v3308_v63 = vld [vmem:[%s3048_s27 + $0xc] sm:$0xf]  ;;  %v3311_v1 = vor.u32 %v989_v48, %v986_v47  ;;  %v924_v2 = vrot.slane %v3297_v49, 5  ;;  %v1142_v6 = vshrl.u32 %v1117_v55, 16 }
  0x53   : > { %v847_v9 = vor.u32 %v846_v19, %v842_v18  ;;  %v994_v42 = vshrl.u32 %v960_v28, 16  ;;  %v1118_v5 = vld [vmem:[%s3048_s27 + $0x10] sm:$0xf]  ;;  %v1006_v10 = vrot.slane %v1004_v53, 5  ;;  %v922_v12 = vsel %vm3050_vm3, %v920_v56, %v921_v45  ;;  %v1119_v15 = vld [vmem:[%s3048_s27 + $0x14] sm:$0xf] }
  0x54   : > { %v1076_v19 = vrot.slane %v3308_v63, 6  ;;  %v1152_v21 = vshrl.u32 %v1118_v5, 16  ;;  %v1155_v24 = vshll.u32 %v1118_v5, 16  ;;  %v1144_v29 = vrot.slane %v1142_v6, 6  ;;  %v617_v6 = vld [vmem:[%s3048_s27 + $0x14] sm:$0xf] }
  0x55   : > { %593 = vrot.lane.b32.xlu1 %v566_v36, %s2943_s4  ;;  %v768_v36 = vld [vmem:[%s3048_s27 + $0xc] sm:$0xf]  ;;  %v996_v58 = vrot.slane %v994_v42, 5  ;;  %v1162_v35 = vshrl.u32 %v1119_v15, 16  ;;  %v3393_v44 = vld [vmem:[%s3048_s27 + $0x14] sm:$0xf] }
  0x56   : > { %595 = vrot.lane.b32.xlu0 %v576_v43, %s2943_s4  ;;  %v997_v43 = vshll.u32 %v960_v28, 16  ;;  %v925_v28 = vsel %vm3050_vm3, %v923_v61, %v924_v2  ;;  %v1157_v42 = vrot.slane %v1155_v24, 7  ;;  %v679_v20 = vld [vmem:[%s3048_s27 + $0x18] sm:$0xf]  ;;  %vm441_vm12 = vcmask 60464  }
  0x57   : > { %v3525_v49 = vld [vmem:[%s3048_s27 + $0x18] sm:$0xf]  ;;  %vm502_vm13 = vcmask 76864   ;;  %vm605_vm15 = vcmask 93264   ;;  %vm666_vm0 = vcmask 109664   ;;  %vm759_vm1 = vcmask 126064  }
  0x58   : > { %v999_v59 = vrot.slane %v997_v43, 6  ;;  %v1404_v43 = vld [vmem:[%s3048_s27 + $0x18] sm:$0xf]  ;;  %vm796_vm4 = vcmask 142464   ;;  %vm892_vm6 = vcmask 158864  }
  0x59   : > { %597 = vrot.lane.b32.xlu1 %v586_v57, %s2943_s4  ;;  %v843_v57 = vsel %vm3084_vm5, %v838_v39, %v842_v18  ;;  %v1060_v18 = vld [vmem:[%s3048_s27 + $0x10] sm:$0xf]  ;;  %v1078_v39 = vrot.slane %v1076_v19, 4  ;;  %v1447_v56 = vshll.u32 %v1404_v43, 16  ;;  %s2959_s4 = smov 42  }
  0x5a   : > { %648 = vrot.lane.b32.xlu0 %v632_v50, %s2944_s5  ;;  %v848_v50 = vrot.slane %v847_v9, 4  ;;  %v1000_v17 = vor.u32 %v999_v59, %v996_v58  ;;  %v3333_v9 = vld [vmem:[%s3048_s27 + $0x14] sm:$0xf]  ;;  %v1079_v38 = vrot.slane %v1060_v18, 6  ;;  %v1451_v58 = vshrl.u32 %v1404_v43, 16 }
  0x5b   : > { %v643_v18 = vrot.slane %v617_v6, 7  ;;  %v734_v6 = vshrl.u32 %v679_v20, 16 }
  0x5c   : > { %v853_v8 = vsel %vm3084_vm5, %v848_v50, %v3299_v51  ;;  %v1081_v48 = vrot.slane %v1079_v38, 4  ;;  %v1082_v50 = vrot.slane %v3333_v9, 6  ;;  %v1080_v59 = vsel %vm3148_vm11, %v1078_v39, %v1079_v38 }
  0x5d   : > { %652 = vrot.lane.b32.xlu1 %v638_v7, %s2944_s5  ;;  %v1145_v7 = vshll.u32 %v1117_v55, 16  ;;  %v645_v38 = vrot.slane %v643_v18, 4 }
  0x5e   : > { %654 = vrot.lane.b32.xlu0 %v641_v11, %s2944_s5  ;;  %v1009_v11 = vrot.slane %v1007_v54, 6  ;;  %v1164_v54 = vrot.slane %v1162_v35, 6  ;;  %v1083_v5 = vsel %vm3148_vm11, %v1081_v48, %v1082_v50  ;;  %v678_v35 = vld [vmem:[%s3048_s27 + $0x14] sm:$0xf] }
  0x5f   : > { %v1147_v30 = vrot.slane %v1145_v7, 7  ;;  %v3359_v7 = vld [vmem:[%s3048_s27 + $0xc] sm:$0xf] }
  0x60   : > { %v3330_v34 = vor.u32 %v1009_v11, %v1006_v10  ;;  %v674_v11 = vld [vmem:[%s3048_s27 + $0x4] sm:$0xf] }
  0x61   : > { %745 = vrot.lane.b32.xlu1 %v713_v26, %s2945_s6  ;;  %v992_v26 = vrot.slane %v3311_v1, 4  ;;  %v3342_v47 = vor.u32 %v1147_v30, %v1144_v29  ;;  %v1234_v29 = vrot.slane %v3359_v7, 7  ;;  %v689_v30 = vshrl.u32 %v674_v11, 16 }
  0x62   : > { %747 = vrot.lane.b32.xlu0 %v722_v32, %s2945_s6  ;;  %v1002_v32 = vrot.slane %v1000_v17, 4 }
  0x63   : > { %v1001_v45 = vsel %vm3124_vm8, %v992_v26, %v1000_v17  ;;  %v1150_v61 = vrot.slane %v3342_v47, 4  ;;  %v633_v17 = vrot.slane %v631_v33, 4  ;;  %v618_v26 = vld [vmem:[%s3048_s27 + $0x18] sm:$0x7]  ;;  %v642_v33 = vrot.slane %v640_v60, 4 }
  0x64   : > { %v1011_v53 = vsel %vm3124_vm8, %v1002_v32, %v3330_v34  ;;  %v673_v32 = vld [vmem:[%s3048_s27] sm:$0x8]  ;;  %v646_v39 = vrot.slane %v618_v26, 7  ;;  %v1236_v60 = vrot.slane %v1234_v29, 4 }
  0x65   : > { %782 = vrot.lane.b32.xlu1 %v768_v36, %s2946_s7  ;;  %v1165_v36 = vshll.u32 %v1119_v15, 16  ;;  %v3366_v15 = vrot.slane %v1451_v58, 4  ;;  %v684_v43 = vshrl.u32 %v673_v32, 16  ;;  %v644_v48 = vsel %vm3215_vm2, %v642_v33, %v643_v18 }
  0x66   : > { %784 = vrot.lane.b32.xlu0 %v769_v40, %s2946_s7  ;;  %v1154_v40 = vrot.slane %v1152_v21, 6  ;;  %v701_v58 = vshll.u32 %v3203_v27, 16  ;;  %v736_v33 = vrot.slane %v734_v6, 7  ;;  %v723_v32 = vrot.slane %v3250_v62, 4 }
  0x67   : > { %v1167_v55 = vrot.slane %v1165_v36, 7  ;;  %v635_v36 = vsel %vm3215_vm2, %v633_v17, %v634_v31  ;;  %v1276_v31 = vld [vmem:[%s3048_s27 + $0x10] sm:$0xf]  ;;  %v1277_v17 = vld [vmem:[%s3048_s27 + $0x14] sm:$0xf] }
  0x68   : > { %v1304_v18 = vshrl.u32 %v1276_v31, 16  ;;  %v1316_v62 = vshll.u32 %v1277_v17, 16 }
  0x69   : > { %878 = vrot.lane.b32.xlu1 %v843_v57, %s2947_s8  ;;  %v1158_v57 = vor.u32 %v1157_v42, %v1154_v40  ;;  %v3361_v10 = vor.u32 %v1167_v55, %v1164_v54  ;;  %v691_v42 = vrot.slane %v689_v30, 7  ;;  %v3402_v54 = vld [vmem:[%s3048_s27 + $0xc] sm:$0xf]  ;;  %v647_v55 = vsel %vm3215_vm2, %v645_v38, %v646_v39 }
  0x6a   : > { %880 = vrot.lane.b32.xlu0 %v853_v8, %s2947_s8  ;;  %v737_v30 = vshll.u32 %v679_v20, 16  ;;  %v1306_v38 = vrot.slane %v1304_v18, 7  ;;  %v808_v18 = vld [vmem:[%s3048_s27 + $0x18] sm:$0xf] }
  0x6b   : > { %v1160_v8 = vrot.slane %v1158_v57, 4  ;;  %v1159_v24 = vsel %vm3183_vm14, %v1150_v61, %v1158_v57  ;;  %v1240_v57 = vrot.slane %v3393_v44, 7  ;;  %v2703_v61 = vrot.slane %v684_v43, 11 }
  0x6c   : > { %v696_v26 = vrot.slane %v691_v42, 4 }
  0x6d   : > { %936 = vrot.lane.b32.xlu1 %v922_v12, %s2948_s15  ;;  %v3364_v12 = vrot.slane %v1447_v56, 5  ;;  %v1169_v22 = vsel %vm3183_vm14, %v1160_v8, %v3361_v10 }
  0x6e   : > { %938 = vrot.lane.b32.xlu0 %v925_v28, %s2948_s15  ;;  %v1218_v28 = vld [vmem:[%s3048_s27 + $0x10] sm:$0xf] }
  0x6f   : > { %v1454_v21 = vor.u32 %v3366_v15, %v3364_v12  ;;  %v1237_v40 = vrot.slane %v1218_v28, 7  ;;  %v703_v28 = vor.u32 %v701_v58, %v3241_v52  ;;  %v804_v58 = vld [vmem:[%s3048_s27 + $0x8] sm:$0xf] }
  0x70   : > { %v820_v6 = vshll.u32 %v804_v58, 16 }
  0x71   : > { %1036 = vrot.lane.b32.xlu1 %v1001_v45, %s2949_s16  ;;  %v692_v45 = vshll.u32 %v674_v11, 16  ;;  %v1239_v56 = vrot.slane %v1237_v40, 4  ;;  %v728_v11 = vshll.u32 %v678_v35, 16  ;;  %v704_v52 = vsel %vm3267_vm7, %v696_v26, %v703_v28 }
  0x72   : > { %1038 = vrot.lane.b32.xlu0 %v1011_v53, %s2949_s16  ;;  %v725_v53 = vshrl.u32 %v678_v35, 16  ;;  %v1313_v35 = vshrl.u32 %v1277_v17, 16 }
  0x73   : > { %v1241_v27 = vsel %vm3215_vm2, %v1239_v56, %v1240_v57 }
  0x74   : > { %v727_v8 = vrot.slane %v725_v53, 7  ;;  %v3430_v43 = vrot.slane %v1313_v35, 7  ;;  %v803_v53 = vld [vmem:[%s3048_s27 + $0x4] sm:$0xf]  ;;  %v767_v35 = vld [vmem:[%s3048_s27 + $0x8] sm:$0xf] }
  0x75   : > { %1094 = vrot.lane.b32.xlu1 %v1080_v59, %s2950_s18  ;;  %v1238_v59 = vsel %vm3215_vm2, %v1236_v60, %v1237_v40  ;;  %v1307_v40 = vshll.u32 %v1276_v31, 16 }
  0x76   : > { %1096 = vrot.lane.b32.xlu0 %v1083_v5, %s2950_s18  ;;  %v694_v5 = vor.u32 %v692_v45, %v691_v42  ;;  %v732_v60 = vrot.slane %v727_v8, 4  ;;  %v739_v42 = vor.u32 %v737_v30, %v736_v33  ;;  %v1318_v56 = vor.u32 %v1316_v62, %v3430_v43  ;;  %v1402_v30 = vld [vmem:[%s3048_s27 + $0x10] sm:$0xf] }
  0x77   : > { %v1309_v20 = vor.u32 %v1307_v40, %v1306_v38  ;;  %v822_v33 = vrot.slane %v820_v6, 5  ;;  %v1427_v62 = vshll.u32 %v1402_v30, 16 }
  0x78   : > { %v740_v31 = vsel %vm3267_vm7, %v732_v60, %v739_v42  ;;  %v1403_v42 = vld [vmem:[%s3048_s27 + $0x14] sm:$0xf] }
  0x79   : > { %1194 = vrot.lane.b32.xlu1 %v1159_v24, %s2951_s20  ;;  %v1295_v24 = vshrl.u32 %v3402_v54, 16 }
  0x7a   : > { %1196 = vrot.lane.b32.xlu0 %v1169_v22, %s2951_s20  ;;  %v695_v22 = vsel %vm3267_vm7, %v2703_v61, %v694_v5  ;;  %v811_v61 = vshrl.u32 %v803_v53, 16  ;;  %v814_v5 = vshll.u32 %v803_v53, 16 }
  0x7b   : > { %v3424_v39 = vrot.slane %v1295_v24, 7 }
  0x7c   : > { %v813_v26 = vrot.slane %v811_v61, 4  ;;  %v816_v28 = vrot.slane %v814_v5, 5  ;;  %v1441_v61 = vshrl.u32 %v1403_v42, 16  ;;  %v1365_v5 = vld [vmem:[%s3048_s27 + $0x10] sm:$0xf] }
  0x7d   : > { %650 = vrot.lane.b32.xlu1 %v635_v36, %s2944_s5  ;;  %v730_v36 = vor.u32 %v728_v11, %v727_v8  ;;  %v824_v8 = vshrl.u32 %v804_v58, 16  ;;  %v854_v11 = vshrl.u32 %v3275_v23, 16 }
  0x7e   : > { %656 = vrot.lane.b32.xlu0 %v644_v48, %s2944_s5  ;;  %v1302_v48 = vrot.slane %v3424_v39, 4  ;;  %v817_v60 = vor.u32 %v816_v28, %v813_v26 }
  0x7f   : > { %v731_v45 = vsel %vm3267_vm7, %v723_v32, %v730_v36  ;;  %v826_v23 = vrot.slane %v824_v8, 4  ;;  %v860_v32 = vshll.u32 %v808_v18, 16  ;;  %v864_v36 = vshrl.u32 %v808_v18, 16 }
  0x80   : > { %v818_v6 = vrot.slane %v817_v60, 4  ;;  %v3463_v8 = vrot.slane %v1427_v62, 5 }
  0x81   : > { %658 = vrot.lane.b32.xlu1 %v647_v55, %s2944_s5  ;;  %v1311_v55 = vrot.slane %v1306_v38, 4  ;;  %v856_v38 = vrot.slane %v854_v11, 4  ;;  %v827_v53 = vor.u32 %v826_v23, %v822_v33  ;;  %s2960_s5 = smov 44  }
  0x82   : > { %1252 = vrot.lane.b32.xlu0 %v1238_v59, %s2952_s23  ;;  %v1310_v59 = vsel %vm3267_vm7, %v1302_v48, %v1309_v20  ;;  %v771_v20 = vld [vmem:[%s3048_s27 + $0x18] sm:$0xf] }
  0x83   : > { %v1319_v17 = vsel %vm3267_vm7, %v1311_v55, %v1318_v56  ;;  %v862_v55 = vrot.slane %v860_v32, 5  ;;  %v866_v56 = vrot.slane %v864_v36, 4  ;;  %v857_v58 = vor.u32 %v856_v38, %v3299_v51 }
  0x84   : > { %v828_v26 = vrot.slane %v827_v53, 4  ;;  %v823_v32 = vsel %vm3084_vm5, %v818_v6, %v822_v33  ;;  %v899_v53 = vld [vmem:[%s3048_s27 + $0x4] sm:$0xe] }
  0x85   : > { %1254 = vrot.lane.b32.xlu1 %v1241_v27, %s2952_s23  ;;  %v766_v27 = vld [vmem:[%s3048_s27 + $0x4] sm:$0xf]  ;;  %v867_v51 = vor.u32 %v866_v56, %v862_v55  ;;  %v958_v56 = vld [vmem:[%s3048_s27 + $0x8] sm:$0xf] }
  0x86   : > { %741 = vrot.lane.b32.xlu0 %v695_v22, %s2945_s6  ;;  %v833_v33 = vsel %vm3084_vm5, %v828_v26, %v3254_v4  ;;  %v977_v26 = vshll.u32 %v958_v56, 16 }
  0x89   : > { %743 = vrot.lane.b32.xlu1 %v704_v52, %s2945_s6  ;;  %v770_v52 = vld [vmem:[%s3048_s27 + $0x14] sm:$0xf] }
  0x8a   : > { %749 = vrot.lane.b32.xlu0 %v731_v45, %s2945_s6  ;;  %v1431_v45 = vshrl.u32 %v1402_v30, 16  ;;  %v1443_v30 = vrot.slane %v1441_v61, 4  ;;  %v2704_v61 = vrot.slane %v899_v53, 9 }
  0x8c   : > { %v1433_v11 = vrot.slane %v1431_v45, 4 }
  0x8d   : > { %751 = vrot.lane.b32.xlu1 %v740_v31, %s2945_s6  ;;  %v809_v31 = vld [vmem:[%s3048_s27 + $0x1c] sm:$0x1]  ;;  %s2961_s6 = smov 46  }
  0x8e   : > { %1342 = vrot.lane.b32.xlu0 %v1310_v59, %s2953_s24  ;;  %v1437_v59 = vshll.u32 %v1403_v42, 16  ;;  %v870_v18 = vshll.u32 %v809_v31, 16  ;;  %v1434_v36 = vor.u32 %v1433_v11, %v3463_v8  ;;  %v957_v31 = vld [vmem:[%s3048_s27 + $0x4] sm:$0xe] }
  0x8f   : > { %v321_v24 = vpop.permute.xlu0 %320  ;;  %v965_v6 = vshrl.u32 %v957_v31, 16  ;;  %v968_v11 = vshll.u32 %v957_v31, 16 }
  0x90   : > { %v1439_v28 = vrot.slane %v1437_v59, 5  ;;  %v872_v60 = vrot.slane %v870_v18, 5  ;;  %v3505_v18 = vld [vmem:[%s3048_s27 + $0x10] sm:$0xf] }
  0x91   : > { %1344 = vrot.lane.b32.xlu1 %v1319_v17, %s2953_s24  ;;  %v323_v22 = vpop.permute.xlu1 %322 }
  0x92   : > { %778 = vrot.lane.b32.xlu0 %v766_v27, %s2946_s7  ;;  %v1366_v27 = vld [vmem:[%s3048_s27 + $0x14] sm:$0xf]  ;;  %v1444_v42 = vor.u32 %v1443_v30, %v1439_v28 }
  0x93   : > { %v325_v40 = vpop.permute.xlu0 %324 }
  0x95   : > { %780 = vrot.lane.b32.xlu1 %v767_v35, %s2946_s7  ;;  %v327_v48 = vpop.permute.xlu1 %326  ;;  %v858_v35 = vrot.slane %v857_v58, 4 }
  0x96   : > { %786 = vrot.lane.b32.xlu0 %v770_v52, %s2946_s7  ;;  %v868_v52 = vrot.slane %v867_v51, 4  ;;  %v962_v51 = vld [vmem:[%s3048_s27 + $0x18] sm:$0xf] }
  0x97   : > { %v863_v45 = vsel %vm3084_vm5, %v858_v35, %v862_v55 }
  0x98   : > { %v260_v17 = vpop.permute.xlu0 %259 }
  0x99   : > { %788 = vrot.lane.b32.xlu1 %v771_v20, %s2946_s7  ;;  %278 = vst.msk [vmem:[#allocation2] sm:$0xf] %vm277_vm9, %v260_v17  ;;  %v900_v20 = vld [vmem:[%s3048_s27 + $0x8] sm:$0xf]  ;;  %v1499_v17 = vld [vmem:[%s3048_s27 + $0x14] sm:$0xf] }
  0x9a   : > { %1379 = vrot.lane.b32.xlu0 %v1365_v5, %s2954_s25  ;;  %339 = vst.msk [vmem:[#allocation2] sm:$0xf] %vm338_vm10, %v321_v24  ;;  %v1298_v24 = vshll.u32 %v3402_v54, 16  ;;  %v915_v55 = vrot.slane %v900_v20, 5  ;;  %v904_v5 = vld [vmem:[%s3048_s27 + $0x18] sm:$0xf] }
  0x9b   : > { %v264_v23 = vpop.permute.xlu1 %263  ;;  %v1017_v20 = vshll.u32 %v962_v51, 16  ;;  %s2962_s7 = smov 48  }
  0x9c   : > { %280 = vst.msk [vmem:[#allocation2 + $0x8] sm:$0xf] %vm277_vm9, %v264_v23  ;;  %v262_v38 = vpop.permute.xlu0 %261  ;;  %v3487_v54 = vor.u32 %v1298_v24, %v3424_v39  ;;  %v1445_v39 = vrot.slane %v1444_v42, 4  ;;  %v917_v30 = vrot.slane %v915_v55, 4  ;;  %v927_v23 = vrot.slane %v904_v5, 5 }
  0x9d   : > { %1381 = vrot.lane.b32.xlu1 %v1366_v27, %s2954_s25  ;;  %279 = vst.msk [vmem:[#allocation2 + $0x4] sm:$0xf] %vm277_vm9, %v262_v38  ;;  %v974_v27 = vshrl.u32 %v958_v56, 16  ;;  %v905_v38 = vld [vmem:[%s3048_s27 + $0x1c] sm:$0x1]  ;;  %v1515_v24 = vrot.slane %v3505_v18, 5 }
  0x9e   : > { %341 = vst.msk [vmem:[#allocation2 + $0x8] sm:$0xf] %vm338_vm10, %v325_v40  ;;  %874 = vrot.lane.b32.xlu0 %v823_v32, %s2947_s8  ;;  %340 = vst.msk [vmem:[#allocation2 + $0x4] sm:$0xf] %vm338_vm10, %v323_v22  ;;  %v1435_v40 = vrot.slane %v1434_v36, 4  ;;  %v873_v22 = vsel %vm3084_vm5, %v868_v52, %v872_v60  ;;  %v926_v32 = vrot.slane %v924_v2, 4  ;;  %v916_v36 = vsel %vm3050_vm3, %v2704_v61, %v915_v55 }
  0x9f   : > { %v266_v62 = vpop.permute.xlu1 %265  ;;  %v970_v52 = vrot.slane %v968_v11, 6  ;;  %v1518_v42 = vrot.slane %v1499_v17, 5  ;;  %v976_v2 = vrot.slane %v974_v27, 5  ;;  %v929_v53 = vrot.slane %v927_v23, 4 }
  0xa0   : > { %281 = vst.msk [vmem:[#allocation2 + $0xc] sm:$0xf] %vm277_vm9, %v266_v62  ;;  %v268_v4 = vpop.permute.xlu0 %267  ;;  %v1440_v59 = vsel %vm3084_vm5, %v1435_v40, %v1439_v28  ;;  %v1450_v28 = vsel %vm3084_vm5, %v1445_v39, %v3364_v12  ;;  %v1014_v62 = vshrl.u32 %v962_v51, 16  ;;  %v979_v40 = vrot.slane %v977_v26, 6  ;;  %v963_v39 = vld [vmem:[%s3048_s27 + $0x1c] sm:$0x3] }
  0xa1   : > { %876 = vrot.lane.b32.xlu1 %v833_v33, %s2947_s8  ;;  %282 = vst.msk [vmem:[#allocation2 + $0x10] sm:$0xf] %vm277_vm9, %v268_v4  ;;  %v967_v33 = vrot.slane %v965_v6, 5  ;;  %v919_v4 = vsel %vm3050_vm3, %v917_v30, %v918_v37  ;;  %v930_v31 = vrot.slane %v905_v38, 5  ;;  %v1517_v56 = vrot.slane %v1515_v24, 4 }
  0xa2   : > { %342 = vst.msk [vmem:[#allocation2 + $0xc] sm:$0xf] %vm338_vm10, %v327_v48  ;;  %882 = vrot.lane.b32.xlu0 %v863_v45, %s2947_s8  ;;  %v1556_v45 = vld [vmem:[%s3048_s27 + $0x10] sm:$0xf]  ;;  %v1520_v37 = vrot.slane %v1518_v42, 4  ;;  %v1521_v6 = vrot.slane %v3525_v49, 5 }
  0xa3   : > { %v270_v58 = vpop.permute.xlu1 %269  ;;  %v1581_v61 = vshrl.u32 %v1556_v45, 16  ;;  %v1584_v5 = vshll.u32 %v1556_v45, 16  ;;  %v1016_v11 = vrot.slane %v1014_v62, 5  ;;  %v1019_v17 = vrot.slane %v1017_v20, 6  ;;  %v2153_v49 = vld [vmem:[%s3048_s27 + $0x14] sm:$0xf] }
  0xa4   : > { %283 = vst.msk [vmem:[#allocation2 + $0x14] sm:$0xf] %vm277_vm9, %v270_v58  ;;  %v329_v48 = vpop.permute.xlu0 %328  ;;  %v971_v58 = vor.u32 %v970_v52, %v967_v33  ;;  %v1024_v27 = vshrl.u32 %v963_v39, 16  ;;  %v1027_v26 = vshll.u32 %v963_v39, 16  ;;  %v931_v51 = vsel %vm3050_vm3, %v929_v53, %v930_v31 }
  0xa5   : > { %884 = vrot.lane.b32.xlu1 %v873_v22, %s2947_s8  ;;  %343 = vst.msk [vmem:[#allocation2 + $0x10] sm:$0xf] %vm338_vm10, %v329_v48  ;;  %v928_v22 = vsel %vm3050_vm3, %v926_v32, %v927_v23  ;;  %v980_v48 = vor.u32 %v979_v40, %v976_v2  ;;  %v1519_v32 = vsel %vm3050_vm3, %v1517_v56, %v1518_v42  ;;  %v1583_v38 = vrot.slane %v1581_v61, 5  ;;  %s2963_s8 = smov 50  }
  0xa6   : > { %1475 = vrot.lane.b32.xlu0 %v1440_v59, %s2955_s26  ;;  %v1557_v59 = vld [vmem:[%s3048_s27 + $0x14] sm:$0xf]  ;;  %v1586_v33 = vrot.slane %v1584_v5, 6  ;;  %v1020_v45 = vor.u32 %v1019_v17, %v1016_v11  ;;  %v1026_v42 = vrot.slane %v1024_v27, 5  ;;  %v1029_v2 = vrot.slane %v1027_v26, 6 }
  0xa7   : > { %v331_v35 = vpop.permute.xlu1 %330  ;;  %v1594_v30 = vshll.u32 %v1557_v59, 16  ;;  %v982_v62 = vrot.slane %v980_v48, 4  ;;  %v1012_v39 = vrot.slane %v3330_v34, 4  ;;  %v1058_v17 = vld [vmem:[%s3048_s27 + $0x8] sm:$0xf]  ;;  %vm950_vm9 = vcmask 175264  }
  0xa8   : > { %344 = vst.msk [vmem:[#allocation2 + $0x14] sm:$0xf] %vm338_vm10, %v331_v35  ;;  %v424_v60 = vpop.permute.xlu0 %423  ;;  %v972_v35 = vrot.slane %v971_v58, 4  ;;  %v1022_v34 = vrot.slane %v1020_v45, 4  ;;  %v1115_v26 = vld [vmem:[%s3048_s27 + $0x4] sm:$0xc] }
  0xa9   : > { %1477 = vrot.lane.b32.xlu1 %v1450_v28, %s2955_s26  ;;  %442 = vst.msk [vmem:[#allocation2] sm:$0xf] %vm441_vm12, %v424_v60  ;;  %v1591_v28 = vshrl.u32 %v1557_v59, 16  ;;  %v1522_v60 = vsel %vm3050_vm3, %v1520_v37, %v1521_v6  ;;  %v1596_v20 = vrot.slane %v1594_v30, 6  ;;  %v991_v58 = vsel %vm3124_vm8, %v982_v62, %v3311_v1  ;;  %v1057_v1 = vld [vmem:[%s3048_s27 + $0x4] sm:$0xc] }
  0xaa   : > { %932 = vrot.lane.b32.xlu0 %v916_v36, %s2948_s15  ;;  %v1558_v36 = vld [vmem:[%s3048_s27 + $0x18] sm:$0xf]  ;;  %v1030_v59 = vor.u32 %v1029_v2, %v1026_v42  ;;  %v1021_v11 = vsel %vm3124_vm8, %v1012_v39, %v1020_v45  ;;  %v3588_v45 = vld [vmem:[%s3048_s27 + $0x10] sm:$0xf]  ;;  %v1657_v2 = vld [vmem:[%s3048_s27 + $0x14] sm:$0xf] }
  0xab   : > { %v426_v55 = vpop.permute.xlu1 %425  ;;  %v1593_v40 = vrot.slane %v1591_v28, 5  ;;  %v1604_v53 = vshll.u32 %v1558_v36, 16  ;;  %vm1050_vm10 = vcmask 191664  }
  0xac   : > { %443 = vst.msk [vmem:[#allocation2 + $0x4] sm:$0xf] %vm441_vm12, %v426_v55  ;;  %v428_v25 = vpop.permute.xlu0 %427  ;;  %v3559_v55 = vor.u32 %v1586_v33, %v1583_v38  ;;  %v2705_v33 = vrot.slane %v1057_v1, 10 }
  0xad   : > { %934 = vrot.lane.b32.xlu1 %v919_v4, %s2948_s15  ;;  %444 = vst.msk [vmem:[#allocation2 + $0x8] sm:$0xf] %vm441_vm12, %v428_v25  ;;  %v1601_v4 = vshrl.u32 %v1558_v36, 16  ;;  %v1597_v61 = vor.u32 %v1596_v20, %v1593_v40  ;;  %v1606_v25 = vrot.slane %v1604_v53, 6 }
  0xae   : > { %940 = vrot.lane.b32.xlu0 %v928_v22, %s2948_s15  ;;  %v981_v22 = vsel %vm3124_vm8, %v972_v35, %v980_v48  ;;  %v1589_v48 = vrot.slane %v3559_v55, 4  ;;  %v1116_v35 = vld [vmem:[%s3048_s27 + $0x8] sm:$0xf] }
  0xaf   : > { %v430_v23 = vpop.permute.xlu1 %429  ;;  %v1603_v5 = vrot.slane %v1601_v4, 5  ;;  %v1599_v28 = vrot.slane %v1597_v61, 4  ;;  %v1132_v40 = vshrl.u32 %v1116_v35, 16  ;;  %v1135_v20 = vshll.u32 %v1116_v35, 16 }
  0xb0   : > { %445 = vst.msk [vmem:[#allocation2 + $0xc] sm:$0xf] %vm441_vm12, %v430_v23  ;;  %v432_v52 = vpop.permute.xlu0 %431  ;;  %v1073_v23 = vrot.slane %v1058_v17, 6  ;;  %v1598_v38 = vsel %vm3124_vm8, %v1589_v48, %v1597_v61  ;;  %v1120_v61 = vld [vmem:[%s3048_s27 + $0x18] sm:$0xf] }
  0xb1   : > { %942 = vrot.lane.b32.xlu1 %v931_v51, %s2948_s15  ;;  %446 = vst.msk [vmem:[#allocation2 + $0x10] sm:$0xf] %vm441_vm12, %v432_v52  ;;  %v1031_v51 = vsel %vm3124_vm8, %v1022_v34, %v1030_v59  ;;  %v3580_v30 = vor.u32 %v1606_v25, %v1603_v5  ;;  %v1123_v52 = vshrl.u32 %v1115_v26, 16  ;;  %v1676_v25 = vrot.slane %v1657_v2, 6  ;;  %s2964_s15 = smov 52  }
  0xb2   : > { %1533 = vrot.lane.b32.xlu0 %v1519_v32, %s2956_s28  ;;  %v1062_v32 = vld [vmem:[%s3048_s27 + $0x18] sm:$0xf]  ;;  %v1075_v53 = vrot.slane %v1073_v23, 4  ;;  %v1134_v48 = vrot.slane %v1132_v40, 6  ;;  %v1137_v17 = vrot.slane %v1135_v20, 7 }
  0xb3   : > { %v434_v31 = vpop.permute.xlu1 %433  ;;  %v1085_v42 = vrot.slane %v1062_v32, 6  ;;  %v1608_v4 = vsel %vm3124_vm8, %v1599_v28, %v3580_v30  ;;  %v1125_v59 = vrot.slane %v1123_v52, 6  ;;  %v1175_v28 = vshll.u32 %v1120_v61, 16 }
  0xb4   : > { %447 = vst.msk [vmem:[#allocation2 + $0x14] sm:$0xf] %vm441_vm12, %v434_v31  ;;  %v485_v56 = vpop.permute.xlu0 %484  ;;  %v1063_v31 = vld [vmem:[%s3048_s27 + $0x1c] sm:$0x3]  ;;  %vm1108_vm12 = vcmask 208064  }
  0xb5   : > { %1535 = vrot.lane.b32.xlu1 %v1522_v60, %s2956_s28  ;;  %503 = vst.msk [vmem:[#allocation2] sm:$0xf] %vm502_vm13, %v485_v56  ;;  %v1126_v60 = vshll.u32 %v1115_v26, 16  ;;  %v1074_v56 = vsel %vm3148_vm11, %v2705_v33, %v1073_v23  ;;  %v1087_v9 = vrot.slane %v1085_v42, 4  ;;  %v1121_v26 = vld [vmem:[%s3048_s27 + $0x1c] sm:$0x7] }
  0xb6   : > { %1032 = vrot.lane.b32.xlu0 %v981_v22, %s2949_s16  ;;  %v1084_v22 = vrot.slane %v1082_v50, 4  ;;  %v1088_v50 = vrot.slane %v1063_v31, 6  ;;  %v1678_v33 = vrot.slane %v1676_v25, 4  ;;  %v1185_v2 = vshll.u32 %v1121_v26, 16 }
  0xb7   : > { %v487_v37 = vpop.permute.xlu1 %486  ;;  %v1128_v34 = vrot.slane %v1126_v60, 7  ;;  %v1177_v20 = vrot.slane %v1175_v28, 7  ;;  %v1170_v28 = vrot.slane %v3361_v10, 4 }
  0xb8   : > { %504 = vst.msk [vmem:[#allocation2 + $0x4] sm:$0xf] %vm502_vm13, %v487_v37  ;;  %v489_v27 = vpop.permute.xlu0 %488  ;;  %v1714_v37 = vld [vmem:[%s3048_s27 + $0x10] sm:$0xf]  ;;  %v1086_v1 = vsel %vm3148_vm11, %v1084_v22, %v1085_v42  ;;  %v1089_v60 = vsel %vm3148_vm11, %v1087_v9, %v1088_v50  ;;  %v1182_v42 = vshrl.u32 %v1121_v26, 16  ;;  %v1187_v50 = vrot.slane %v1185_v2, 7 }
  0xb9   : > { %1034 = vrot.lane.b32.xlu1 %v991_v58, %s2949_s16  ;;  %505 = vst.msk [vmem:[#allocation2 + $0x8] sm:$0xf] %vm502_vm13, %v489_v27  ;;  %v1673_v58 = vrot.slane %v3588_v45, 6  ;;  %v1077_v27 = vsel %vm3148_vm11, %v1075_v53, %v1076_v19  ;;  %v1129_v35 = vor.u32 %v1128_v34, %v1125_v59  ;;  %v1742_v63 = vshll.u32 %v1714_v37, 16  ;;  %v1215_v2 = vld [vmem:[%s3048_s27 + $0x4] sm:$0x8] }
  0xba   : > { %1040 = vrot.lane.b32.xlu0 %v1021_v11, %s2949_s16  ;;  %v3609_v11 = vld [vmem:[%s3048_s27 + $0x18] sm:$0xf]  ;;  %v1184_v9 = vrot.slane %v1182_v42, 6  ;;  %v1216_v42 = vld [vmem:[%s3048_s27 + $0x8] sm:$0xf] }
  0xbb   : > { %v491_v36 = vpop.permute.xlu1 %490  ;;  %v1675_v32 = vrot.slane %v1673_v58, 4  ;;  %v1679_v52 = vrot.slane %v3609_v11, 6  ;;  %v1744_v34 = vrot.slane %v1742_v63, 7  ;;  %v2311_v11 = vld [vmem:[%s3048_s27 + $0x14] sm:$0xf] }
  0xbc   : > { %506 = vst.msk [vmem:[#allocation2 + $0xc] sm:$0xf] %vm502_vm13, %v491_v36  ;;  %v493_v62 = vpop.permute.xlu0 %492  ;;  %v1715_v36 = vld [vmem:[%s3048_s27 + $0x14] sm:$0xf] }
  0xbd   : > { %1042 = vrot.lane.b32.xlu1 %v1031_v51, %s2949_s16  ;;  %507 = vst.msk [vmem:[#allocation2 + $0x10] sm:$0xf] %vm502_vm13, %v493_v62  ;;  %v1172_v51 = vshrl.u32 %v1120_v61, 16  ;;  %v1138_v62 = vor.u32 %v1137_v17, %v1134_v48  ;;  %v1749_v53 = vshrl.u32 %v1715_v36, 16  ;;  %v1752_v31 = vshll.u32 %v1715_v36, 16  ;;  %s2965_s16 = smov 54  }
  0xbe   : > { %1633 = vrot.lane.b32.xlu0 %v1598_v38, %s2957_s29  ;;  %v1739_v38 = vshrl.u32 %v1714_v37, 16  ;;  %v1188_v36 = vor.u32 %v1187_v50, %v1184_v9  ;;  %v1221_v9 = vld [vmem:[%s3048_s27 + $0x1c] sm:$0x7] }
  0xbf   : > { %v495_v39 = vpop.permute.xlu1 %494  ;;  %v1174_v40 = vrot.slane %v1172_v51, 6  ;;  %v1140_v37 = vrot.slane %v1138_v62, 4  ;;  %v1751_v17 = vrot.slane %v1749_v53, 6 }
  0xc0   : > { %508 = vst.msk [vmem:[#allocation2 + $0x14] sm:$0xf] %vm502_vm13, %v495_v39  ;;  %v588_v5 = vpop.permute.xlu0 %587  ;;  %v1677_v39 = vsel %vm3148_vm11, %v1675_v32, %v1676_v25  ;;  %v1741_v59 = vrot.slane %v1739_v38, 6  ;;  %vm1208_vm13 = vcmask 224464  }
  0xc1   : > { %1635 = vrot.lane.b32.xlu1 %v1608_v4, %s2957_s29  ;;  %606 = vst.msk [vmem:[#allocation2] sm:$0xf] %vm605_vm15, %v588_v5  ;;  %v1716_v4 = vld [vmem:[%s3048_s27 + $0x18] sm:$0xf]  ;;  %v1680_v5 = vsel %vm3148_vm11, %v1678_v33, %v1679_v52  ;;  %v1178_v48 = vor.u32 %v1177_v20, %v1174_v40  ;;  %v1872_v40 = vld [vmem:[%s3048_s27 + $0x10] sm:$0xf] }
  0xc2   : > { %1090 = vrot.lane.b32.xlu0 %v1074_v56, %s2950_s18  ;;  %v1130_v56 = vrot.slane %v1129_v35, 4  ;;  %v1759_v25 = vshrl.u32 %v1716_v4, 16  ;;  %v1149_v35 = vsel %vm3183_vm14, %v1140_v37, %v3342_v47  ;;  %v1892_v37 = vshrl.u32 %v1872_v40, 16 }
  0xc3   : > { %v590_v23 = vpop.permute.xlu1 %589  ;;  %v1180_v10 = vrot.slane %v1178_v48, 4 }
  0xc4   : > { %607 = vst.msk [vmem:[#allocation2 + $0x4] sm:$0xf] %vm605_vm15, %v590_v23  ;;  %v592_v19 = vpop.permute.xlu0 %591  ;;  %v1139_v51 = vsel %vm3183_vm14, %v1130_v56, %v1138_v62  ;;  %v3643_v23 = vor.u32 %v1744_v34, %v1741_v59  ;;  %v1761_v63 = vrot.slane %v1759_v25, 6  ;;  %v2706_v59 = vrot.slane %v1215_v2, 11  ;;  %v3670_v34 = vld [vmem:[%s3048_s27 + $0x10] sm:$0xf] }
  0xc5   : > { %1092 = vrot.lane.b32.xlu1 %v1077_v27, %s2950_s18  ;;  %608 = vst.msk [vmem:[#allocation2 + $0x8] sm:$0xf] %vm605_vm15, %v592_v19  ;;  %v1754_v27 = vrot.slane %v1752_v31, 7  ;;  %v1189_v20 = vsel %vm3183_vm14, %v1180_v10, %v1188_v36  ;;  %v1231_v31 = vrot.slane %v1216_v42, 7  ;;  %v1278_v36 = vld [vmem:[%s3048_s27 + $0x18] sm:$0xf] }
  0xc6   : > { %1098 = vrot.lane.b32.xlu0 %v1086_v1, %s2950_s18  ;;  %v1762_v1 = vshll.u32 %v1716_v4, 16  ;;  %v1747_v62 = vrot.slane %v3643_v23, 4  ;;  %v3690_v10 = vrot.slane %v1892_v37, 7  ;;  %v1279_v42 = vld [vmem:[%s3048_s27 + $0x1c] sm:$0xf] }
  0xc7   : > { %v594_v22 = vpop.permute.xlu1 %593  ;;  %v1755_v38 = vor.u32 %v1754_v27, %v1751_v17  ;;  %v1815_v17 = vld [vmem:[%s3048_s27 + $0x14] sm:$0xf]  ;;  %v1831_v27 = vrot.slane %v3670_v34, 7  ;;  %v1331_v37 = vshrl.u32 %v1279_v42, 16 }
  0xc8   : > { %609 = vst.msk [vmem:[#allocation2 + $0xc] sm:$0xf] %vm605_vm15, %v594_v22  ;;  %v596_v61 = vpop.permute.xlu0 %595  ;;  %v1764_v19 = vrot.slane %v1762_v1, 7  ;;  %v1220_v22 = vld [vmem:[%s3048_s27 + $0x18] sm:$0xf]  ;;  %v1834_v44 = vrot.slane %v1815_v17, 7 }
  0xc9   : > { %1100 = vrot.lane.b32.xlu1 %v1089_v60, %s2950_s18  ;;  %610 = vst.msk [vmem:[#allocation2 + $0x10] sm:$0xf] %vm605_vm15, %v596_v61  ;;  %v1179_v60 = vsel %vm3183_vm14, %v1170_v28, %v1178_v48  ;;  %v1757_v4 = vrot.slane %v1755_v38, 4  ;;  %v1756_v56 = vsel %vm3183_vm14, %v1747_v62, %v1755_v38  ;;  %v1243_v50 = vrot.slane %v1220_v22, 7  ;;  %v1273_v1 = vld [vmem:[%s3048_s27 + $0x4] sm:$0x8] }
  0xca   : > { %1691 = vrot.lane.b32.xlu0 %v1677_v39, %s2958_s30  ;;  %v3664_v53 = vor.u32 %v1764_v19, %v1761_v63  ;;  %v1233_v48 = vrot.slane %v1231_v31, 4  ;;  %v1242_v28 = vrot.slane %v1240_v57, 4  ;;  %v1895_v38 = vshll.u32 %v1872_v40, 16  ;;  %v1873_v22 = vld [vmem:[%s3048_s27 + $0x14] sm:$0xf]  ;;  %s2966_s18 = smov 56  }
  0xcb   : > { %v598_v26 = vpop.permute.xlu1 %597  ;;  %v1245_v63 = vrot.slane %v1243_v50, 4  ;;  %v1246_v19 = vrot.slane %v1221_v9, 7  ;;  %v1281_v57 = vshrl.u32 %v1273_v1, 16  ;;  %v1833_v62 = vrot.slane %v1831_v27, 4 }
  0xcc   : > { %611 = vst.msk [vmem:[#allocation2 + $0x14] sm:$0xf] %vm605_vm15, %v598_v26  ;;  %v649_v32 = vpop.permute.xlu0 %648  ;;  %v1766_v25 = vsel %vm3183_vm14, %v1757_v4, %v3664_v53  ;;  %v1244_v40 = vsel %vm3215_vm2, %v1242_v28, %v1243_v50  ;;  %v1322_v4 = vshrl.u32 %v1278_v36, 16  ;;  %v1325_v1 = vshll.u32 %v1278_v36, 16 }
  0xcd   : > { %1693 = vrot.lane.b32.xlu1 %v1680_v5, %s2958_s30  ;;  %667 = vst.msk [vmem:[#allocation2] sm:$0xf] %vm666_vm0, %v649_v32  ;;  %v1274_v5 = vld [vmem:[%s3048_s27 + $0x8] sm:$0xf]  ;;  %v1333_v36 = vrot.slane %v1331_v37, 7  ;;  %vm1266_vm15 = vcmask 240864  }
  0xce   : > { %1190 = vrot.lane.b32.xlu0 %v1139_v51, %s2951_s20  ;;  %v1232_v51 = vsel %vm3215_vm2, %v2706_v59, %v1231_v31  ;;  %v1286_v32 = vshrl.u32 %v1274_v5, 16  ;;  %v2001_v31 = vld [vmem:[%s3048_s27 + $0x1c] sm:$0xf]  ;;  %v1324_v17 = vrot.slane %v1322_v4, 7 }
  0xcf   : > { %v653_v33 = vpop.permute.xlu1 %652  ;;  %v2044_v9 = vshll.u32 %v2001_v31, 16  ;;  %v2048_v50 = vshrl.u32 %v2001_v31, 16 }
  0xd0   : > { %669 = vst.msk [vmem:[#allocation2 + $0x8] sm:$0xf] %vm666_vm0, %v653_v33  ;;  %v655_v47 = vpop.permute.xlu0 %654  ;;  %v1235_v33 = vsel %vm3215_vm2, %v1233_v48, %v1234_v29  ;;  %v1288_v7 = vrot.slane %v1286_v32, 7  ;;  %v1329_v4 = vrot.slane %v1324_v17, 4 }
  0xd1   : > { %1192 = vrot.lane.b32.xlu1 %v1149_v35, %s2951_s20  ;;  %670 = vst.msk [vmem:[#allocation2 + $0xc] sm:$0xf] %vm666_vm0, %v655_v47  ;;  %v3706_v47 = vor.u32 %v1895_v38, %v3690_v10  ;;  %v1334_v38 = vshll.u32 %v1279_v42, 16 }
  0xd2   : > { %1198 = vrot.lane.b32.xlu0 %v1179_v60, %s2951_s20  ;;  %v3700_v60 = vld [vmem:[%s3048_s27 + $0x18] sm:$0xf] }
  0xd3   : > { %v746_v39 = vpop.permute.xlu1 %745  ;;  %v1837_v59 = vrot.slane %v3700_v60, 7  ;;  %v1336_v31 = vor.u32 %v1334_v38, %v1333_v36 }
  0xd4   : > { %762 = vst.msk [vmem:[#allocation2 + $0x8] sm:$0xf] %vm759_vm1, %v746_v39  ;;  %v748_v61 = vpop.permute.xlu0 %747  ;;  %v1247_v39 = vsel %vm3215_vm2, %v1245_v63, %v1246_v19  ;;  %v1320_v63 = vrot.slane %v3430_v43, 4 }
  0xd5   : > { %1200 = vrot.lane.b32.xlu1 %v1189_v20, %s2951_s20  ;;  %763 = vst.msk [vmem:[#allocation2 + $0xc] sm:$0xf] %vm759_vm1, %v748_v61  ;;  %v1289_v20 = vshll.u32 %v1274_v5, 16  ;;  %v2707_v61 = vrot.slane %v1281_v57, 11  ;;  %v1835_v5 = vsel %vm3215_vm2, %v1833_v62, %v1834_v44  ;;  %v3733_v57 = vrot.slane %v2048_v50, 4  ;;  %s2970_s20 = smov 60  }
  0xd6   : > { %1791 = vrot.lane.b32.xlu0 %v1756_v56, %s2959_s4  ;;  %v1836_v56 = vrot.slane %v1834_v44, 4  ;;  %v3731_v44 = vrot.slane %v2044_v9, 5  ;;  %v1400_v9 = vld [vmem:[%s3048_s27 + $0x8] sm:$0xf] }
  0xd7   : > { %v783_v26 = vpop.permute.xlu1 %782  ;;  %v1291_v48 = vor.u32 %v1289_v20, %v1288_v7  ;;  %v1904_v20 = vshll.u32 %v1873_v22, 16 }
  0xd8   : > { %799 = vst.msk [vmem:[#allocation2 + $0x8] sm:$0xf] %vm796_vm4, %v783_v26  ;;  %v785_v35 = vpop.permute.xlu0 %784  ;;  %v1874_v26 = vld [vmem:[%s3048_s27 + $0x18] sm:$0xf]  ;;  %v1838_v32 = vsel %vm3215_vm2, %v1836_v56, %v1837_v59  ;;  %v2051_v43 = vor.u32 %v3733_v57, %v3731_v44  ;;  %v2098_v57 = vld [vmem:[%s3048_s27 + $0x20] sm:$0xf] }
  0xd9   : > { %1793 = vrot.lane.b32.xlu1 %v1766_v25, %s2959_s4  ;;  %800 = vst.msk [vmem:[#allocation2 + $0xc] sm:$0xf] %vm796_vm4, %v785_v35  ;;  %v1293_v35 = vrot.slane %v1288_v7, 4  ;;  %v1910_v19 = vshrl.u32 %v1874_v26, 16  ;;  %v1292_v62 = vsel %vm3267_vm7, %v2707_v61, %v1291_v48  ;;  %v1899_v61 = vrot.slane %v3690_v10, 4 }
  0xda   : > { %1248 = vrot.lane.b32.xlu0 %v1232_v51, %s2952_s23  ;;  %v1901_v51 = vshrl.u32 %v1873_v22, 16  ;;  %v1913_v22 = vshll.u32 %v1874_v26, 16  ;;  %v1401_v10 = vld [vmem:[%s3048_s27 + $0xc] sm:$0xf]  ;;  %v1411_v26 = vshll.u32 %v1400_v9, 16 }
  0xdb   : > { %v879_v2 = vpop.permute.xlu1 %878  ;;  %v1301_v7 = vsel %vm3267_vm7, %v1293_v35, %v3487_v54  ;;  %v1337_v54 = vsel %vm3267_vm7, %v1329_v4, %v1336_v31 }
  0xdc   : > { %895 = vst.msk [vmem:[#allocation2 + $0x8] sm:$0xf] %vm892_vm6, %v879_v2  ;;  %v881_v29 = vpop.permute.xlu0 %880  ;;  %v1327_v2 = vor.u32 %v1325_v1, %v1324_v17  ;;  %v1408_v1 = vshrl.u32 %v1400_v9, 16  ;;  %v1368_v9 = vld [vmem:[%s3048_s27 + $0x1c] sm:$0xf] }
  0xdd   : > { %1250 = vrot.lane.b32.xlu1 %v1235_v33, %s2952_s23  ;;  %896 = vst.msk [vmem:[#allocation2 + $0xc] sm:$0xf] %vm892_vm6, %v881_v29  ;;  %v3746_v29 = vrot.slane %v1910_v19, 7  ;;  %v1413_v19 = vrot.slane %v1411_v26, 5  ;;  %v1962_v26 = vld [vmem:[%s3048_s27 + $0x14] sm:$0xf] }
  0xde   : > { %1256 = vrot.lane.b32.xlu0 %v1244_v40, %s2952_s23  ;;  %v1903_v40 = vrot.slane %v1901_v51, 7  ;;  %v1328_v56 = vsel %vm3267_vm7, %v1320_v63, %v1327_v2  ;;  %v1363_v63 = vld [vmem:[%s3048_s27 + $0x8] sm:$0xf]  ;;  %v1410_v36 = vrot.slane %v1408_v1, 4  ;;  %v1999_v2 = vld [vmem:[%s3048_s27 + $0x14] sm:$0xf] }
  0xdf   : > { %v937_v25 = vpop.permute.xlu1 %936 }
  0xe0   : > { %953 = vst.msk [vmem:[#allocation2 + $0x8] sm:$0xf] %vm950_vm9, %v937_v25  ;;  %v939_v28 = vpop.permute.xlu0 %938  ;;  %v1908_v50 = vrot.slane %v1903_v40, 4  ;;  %v1915_v25 = vor.u32 %v1913_v22, %v3746_v29  ;;  %v1367_v22 = vld [vmem:[%s3048_s27 + $0x18] sm:$0xf] }
  0xe1   : > { %1258 = vrot.lane.b32.xlu1 %v1247_v39, %s2952_s23  ;;  %954 = vst.msk [vmem:[#allocation2 + $0xc] sm:$0xf] %vm950_vm9, %v939_v28  ;;  %v1417_v28 = vshll.u32 %v1401_v10, 16 }
  0xe2   : > { %1849 = vrot.lane.b32.xlu0 %v1835_v5, %s2960_s5  ;;  %v1906_v5 = vor.u32 %v1904_v20, %v1903_v40  ;;  %v1916_v35 = vsel %vm3267_vm7, %v1908_v50, %v1915_v25  ;;  %v1406_v50 = vld [vmem:[%s3048_s27 + $0x20] sm:$0x1] }
  0xe3   : > { %v1037_v33 = vpop.permute.xlu1 %1036  ;;  %v1419_v40 = vrot.slane %v1417_v28, 5 }
  0xe4   : > { %1053 = vst.msk [vmem:[#allocation2 + $0x8] sm:$0xf] %vm1050_vm10, %v1037_v33  ;;  %v1039_v42 = vpop.permute.xlu0 %1038  ;;  %v1907_v17 = vsel %vm3267_vm7, %v1899_v61, %v1906_v5  ;;  %v1405_v33 = vld [vmem:[%s3048_s27 + $0x1c] sm:$0xf]  ;;  %v2024_v61 = vshll.u32 %v1999_v2, 16  ;;  %v2028_v5 = vshrl.u32 %v1999_v2, 16 }
  0xe5   : > { %1851 = vrot.lane.b32.xlu1 %v1838_v32, %s2960_s5  ;;  %1054 = vst.msk [vmem:[#allocation2 + $0xc] sm:$0xf] %vm1050_vm10, %v1039_v42  ;;  %v1421_v32 = vshrl.u32 %v1401_v10, 16  ;;  %v1364_v42 = vld [vmem:[%s3048_s27 + $0xc] sm:$0xf]  ;;  %v1461_v4 = vshrl.u32 %v1405_v33, 16 }
  0xe6   : > { %1338 = vrot.lane.b32.xlu0 %v1292_v62, %s2953_s24  ;;  %v3785_v28 = vrot.slane %v2024_v61, 5 }
  0xe7   : > { %v1095_v39 = vpop.permute.xlu1 %1094  ;;  %v1423_v20 = vrot.slane %v1421_v32, 4  ;;  %v1463_v10 = vrot.slane %v1461_v4, 4  ;;  %v2030_v32 = vrot.slane %v2028_v5, 4  ;;  %v1496_v5 = vld [vmem:[%s3048_s27 + $0x8] sm:$0xe] }
  0xe8   : > { %1111 = vst.msk [vmem:[#allocation2 + $0x8] sm:$0xf] %vm1108_vm12, %v1095_v39  ;;  %v1097_v37 = vpop.permute.xlu0 %1096  ;;  %v1414_v39 = vor.u32 %v1413_v19, %v1410_v36 }
  0xe9   : > { %1340 = vrot.lane.b32.xlu1 %v1301_v7, %s2953_s24  ;;  %1112 = vst.msk [vmem:[#allocation2 + $0xc] sm:$0xf] %vm1108_vm12, %v1097_v37  ;;  %v1457_v7 = vshll.u32 %v1405_v33, 16 }
  0xea   : > { %1346 = vrot.lane.b32.xlu0 %v1328_v56, %s2953_s24  ;;  %v2000_v56 = vld [vmem:[%s3048_s27 + $0x18] sm:$0xf] }
  0xeb   : > { %v1195_v48 = vpop.permute.xlu1 %1194  ;;  %v1459_v25 = vrot.slane %v1457_v7, 5  ;;  %v2031_v7 = vor.u32 %v2030_v32, %v3785_v28  ;;  %v3822_v32 = vld [vmem:[%s3048_s27 + $0x14] sm:$0xf] }
  0xec   : > { %1211 = vst.msk [vmem:[#allocation2 + $0x8] sm:$0xf] %vm1208_vm13, %v1195_v48  ;;  %v1197_v51 = vpop.permute.xlu0 %1196  ;;  %v2034_v48 = vshll.u32 %v2000_v56, 16 }
  0xed   : > { %1348 = vrot.lane.b32.xlu1 %v1337_v54, %s2953_s24  ;;  %1212 = vst.msk [vmem:[#allocation2 + $0xc] sm:$0xf] %vm1208_vm13, %v1197_v51  ;;  %v1424_v54 = vor.u32 %v1423_v20, %v1419_v40  ;;  %v1415_v51 = vrot.slane %v1414_v39, 4  ;;  %v1464_v19 = vor.u32 %v1463_v10, %v1459_v25  ;;  %s2971_s24 = smov [#allocation3]  }
  0xee   : > { %1939 = vrot.lane.b32.xlu0 %v1907_v17, %s2961_s6  ;;  %v2038_v17 = vshrl.u32 %v2000_v56, 16  ;;  %v2036_v33 = vrot.slane %v2034_v48, 5  ;;  %v2032_v56 = vrot.slane %v2031_v7, 4  ;;  %v2708_v48 = vrot.slane %v1496_v5, 9 }
  0xef   : > { %v651_v38 = vpop.permute.xlu1 %650  ;;  %v1425_v36 = vrot.slane %v1424_v54, 4  ;;  %v1420_v20 = vsel %vm3084_vm5, %v1415_v51, %v1419_v40  ;;  %v1465_v12 = vrot.slane %v1464_v19, 4  ;;  %v2112_v7 = vrot.slane %v3822_v32, 5 }
  0xf0   : > { %668 = vst.msk [vmem:[#allocation2 + $0x4] sm:$0xf] %vm666_vm0, %v651_v38  ;;  %v657_v62 = vpop.permute.xlu0 %656  ;;  %v1467_v38 = vshll.u32 %v1406_v50, 16  ;;  %v1555_v50 = vld [vmem:[%s3048_s27 + $0xc] sm:$0xf]  ;;  %v2037_v10 = vsel %vm3084_vm5, %v2032_v56, %v2036_v33 }
  0xf1   : > { %1941 = vrot.lane.b32.xlu1 %v1916_v35, %s2961_s6  ;;  %671 = vst.msk [vmem:[#allocation2 + $0x10] sm:$0xf] %vm666_vm0, %v657_v62  ;;  %v2040_v62 = vrot.slane %v2038_v17, 4  ;;  %v1430_v40 = vsel %vm3084_vm5, %v1425_v36, %v3463_v8  ;;  %v1501_v17 = vld [vmem:[%s3048_s27 + $0x1c] sm:$0xf]  ;;  %v1574_v36 = vshll.u32 %v1555_v50, 16 }
  0xf2   : > { %1375 = vrot.lane.b32.xlu0 %v1363_v63, %s2954_s25  ;;  %v1963_v63 = vld [vmem:[%s3048_s27 + $0x18] sm:$0xf]  ;;  %v1469_v15 = vrot.slane %v1467_v38, 5  ;;  %v2114_v18 = vrot.slane %v2112_v7, 4 }
  0xf3   : > { %v659_v31 = vpop.permute.xlu1 %658  ;;  %v2096_v38 = vld [vmem:[%s3048_s27 + $0x18] sm:$0xf]  ;;  %v1576_v56 = vrot.slane %v1574_v36, 6 }
  0xf4   : > { %672 = vst.msk [vmem:[#allocation2 + $0x14] sm:$0xf] %vm666_vm0, %v659_v31  ;;  %v1253_v37 = vpop.permute.xlu0 %1252  ;;  %vm1356_vm0 = vcmask 257264   ;;  %v1497_v31 = vld [vmem:[%s3048_s27 + $0xc] sm:$0xf] }
  0xf5   : > { %1377 = vrot.lane.b32.xlu1 %v1364_v42, %s2954_s25  ;;  %1269 = vst.msk [vmem:[#allocation2 + $0x8] sm:$0xf] %vm1266_vm15, %v1253_v37  ;;  %v1455_v42 = vrot.slane %v1454_v21, 4  ;;  %v2041_v21 = vor.u32 %v2040_v62, %v2036_v33  ;;  %v1554_v37 = vld [vmem:[%s3048_s27 + $0x8] sm:$0xe]  ;;  %v1512_v8 = vrot.slane %v1497_v31, 5 }
  0xf6   : > { %1383 = vrot.lane.b32.xlu0 %v1367_v22, %s2954_s25  ;;  %v1502_v33 = vld [vmem:[%s3048_s27 + $0x20] sm:$0x1]  ;;  %v1524_v62 = vrot.slane %v1501_v17, 5  ;;  %v2115_v31 = vrot.slane %v2096_v38, 5 }
  0xf7   : > { %v1255_v1 = vpop.permute.xlu1 %1254  ;;  %v1460_v39 = vsel %vm3084_vm5, %v1455_v42, %v1459_v25  ;;  %v2042_v54 = vrot.slane %v2041_v21, 4  ;;  %v1513_v42 = vsel %vm3050_vm3, %v2708_v48, %v1512_v8  ;;  %v3840_v21 = vld [vmem:[%s3048_s27 + $0x1c] sm:$0xf] }
  0xf8   : > { %1270 = vst.msk [vmem:[#allocation2 + $0xc] sm:$0xf] %vm1266_vm15, %v1255_v1  ;;  %v742_v35 = vpop.permute.xlu0 %741  ;;  %v1562_v1 = vshrl.u32 %v1554_v37, 16  ;;  %v1526_v5 = vrot.slane %v1524_v62, 4  ;;  %v2117_v17 = vrot.slane %v2115_v31, 4 }
  0xf9   : > { %1385 = vrot.lane.b32.xlu1 %v1368_v9, %s2954_s25  ;;  %760 = vst.msk [vmem:[#allocation2] sm:$0xf] %vm759_vm1, %v742_v35  ;;  %v1470_v9 = vsel %vm3084_vm5, %v1465_v12, %v1469_v15  ;;  %v1514_v35 = vrot.slane %v1512_v8, 4  ;;  %v2047_v19 = vsel %vm3084_vm5, %v2042_v54, %v3731_v44  ;;  %v1559_v12 = vld [vmem:[%s3048_s27 + $0x1c] sm:$0xf]  ;;  %s2865_s25 = sshll.u32 %s2971_s24, 4  ;;  %s2866_s25 = int_to_ptr.vmem [resolvable:$false] %s2865_s25 }
  0xfa   : > { %1976 = vrot.lane.b32.xlu0 %v1962_v26, %s2962_s7  ;;  %v1565_v26 = vshll.u32 %v1554_v37, 16  ;;  %v1611_v8 = vshrl.u32 %v1559_v12, 16  ;;  %v2154_v54 = vld [vmem:[%s3048_s27 + $0x18] sm:$0xf] }
  0xfb   : > { %v744_v2 = vpop.permute.xlu1 %743  ;;  %v2188_v38 = vshrl.u32 %v2154_v54, 16 }
  0xfc   : > { %761 = vst.msk [vmem:[#allocation2 + $0x4] sm:$0xf] %vm759_vm1, %v744_v2  ;;  %v750_v4 = vpop.permute.xlu0 %749  ;;  %v1523_v2 = vrot.slane %v1521_v6, 4  ;;  %v1516_v6 = vsel %vm3050_vm3, %v1514_v35, %v1515_v24  ;;  %v2181_v24 = vshll.u32 %v2153_v49, 16  ;;  %v1613_v36 = vrot.slane %v1611_v8, 5 }
  0xfd   : > { %1978 = vrot.lane.b32.xlu1 %v1963_v63, %s2962_s7  ;;  %764 = vst.msk [vmem:[#allocation2 + $0x10] sm:$0xf] %vm759_vm1, %v750_v4  ;;  %v1571_v63 = vshrl.u32 %v1555_v50, 16  ;;  %v1564_v4 = vrot.slane %v1562_v1, 5  ;;  %v2118_v1 = vrot.slane %v3840_v21, 5 }
  0xfe   : > { %1471 = vrot.lane.b32.xlu0 %v1420_v20, %s2955_s26  ;;  %v1525_v37 = vsel %vm3050_vm3, %v1523_v2, %v1524_v62  ;;  %v2116_v2 = vsel %vm3050_vm3, %v2114_v18, %v2115_v31  ;;  %v2190_v31 = vrot.slane %v2188_v38, 5  ;;  %v1654_v38 = vld [vmem:[%s3048_s27 + $0x8] sm:$0xc] }
  0xff   : > { %v752_v22 = vpop.permute.xlu1 %751 }
 0x100   : > { %765 = vst.msk [vmem:[#allocation2 + $0x14] sm:$0xf] %vm759_vm1, %v752_v22  ;;  %v1343_v61 = vpop.permute.xlu0 %1342  ;;  %vm1393_vm1 = vcmask 273664   ;;  %v1527_v22 = vrot.slane %v1502_v33, 5  ;;  %v2191_v33 = vshll.u32 %v2154_v54, 16 }
 0x101   : > { %1473 = vrot.lane.b32.xlu1 %v1430_v40, %s2955_s26  ;;  %1359 = vst.msk [vmem:[#allocation2 + $0x8] sm:$0xf] %vm1356_vm0, %v1343_v61  ;;  %v1567_v40 = vrot.slane %v1565_v26, 6  ;;  %v1560_v61 = vld [vmem:[%s3048_s27 + $0x20] sm:$0x3] }
 0x102   : > { %1479 = vrot.lane.b32.xlu0 %v1460_v39, %s2955_s26  ;;  %v1573_v39 = vrot.slane %v1571_v63, 5  ;;  %v1624_v35 = vshll.u32 %v1560_v61, 16  ;;  %v1528_v63 = vsel %vm3050_vm3, %v1526_v5, %v1527_v22 }
 0x103   : > { %v1345_v25 = vpop.permute.xlu1 %1344 }
 0x104   : > { %1360 = vst.msk [vmem:[#allocation2 + $0xc] sm:$0xf] %vm1356_vm0, %v1345_v25  ;;  %v779_v51 = vpop.permute.xlu0 %778  ;;  %v1568_v25 = vor.u32 %v1567_v40, %v1564_v4  ;;  %v1577_v26 = vor.u32 %v1576_v56, %v1573_v39  ;;  %v2183_v40 = vrot.slane %v2181_v24, 6  ;;  %v1626_v22 = vrot.slane %v1624_v35, 6  ;;  %v1655_v35 = vld [vmem:[%s3048_s27 + $0xc] sm:$0xf] }
 0x105   : > { %1481 = vrot.lane.b32.xlu1 %v1470_v9, %s2955_s26  ;;  %797 = vst.msk [vmem:[#allocation2] sm:$0xf] %vm796_vm4, %v779_v51  ;;  %v1614_v9 = vshll.u32 %v1559_v12, 16  ;;  %v1621_v51 = vshrl.u32 %v1560_v61, 16  ;;  %v2193_v56 = vrot.slane %v2191_v33, 6  ;;  %s2968_s26 = smov 58  }
 0x106   : > { %2072 = vrot.lane.b32.xlu0 %v2037_v10, %s2963_s8  ;;  %v2178_v10 = vshrl.u32 %v2153_v49, 16  ;;  %v1579_v49 = vrot.slane %v1577_v26, 4 }
 0x107   : > { %v781_v20 = vpop.permute.xlu1 %780 }
 0x108   : > { %798 = vst.msk [vmem:[#allocation2 + $0x4] sm:$0xf] %vm796_vm4, %v781_v20  ;;  %v787_v15 = vpop.permute.xlu0 %786  ;;  %v1569_v20 = vrot.slane %v1568_v25, 4  ;;  %v2180_v4 = vrot.slane %v2178_v10, 5  ;;  %v1588_v18 = vsel %vm3124_vm8, %v1579_v49, %v3559_v55  ;;  %v2194_v10 = vor.u32 %v2193_v56, %v2190_v31 }
 0x109   : > { %2074 = vrot.lane.b32.xlu1 %v2047_v19, %s2963_s8  ;;  %801 = vst.msk [vmem:[#allocation2 + $0x10] sm:$0xf] %vm796_vm4, %v787_v15  ;;  %v1616_v19 = vrot.slane %v1614_v9, 6  ;;  %v2119_v15 = vsel %vm3050_vm3, %v2117_v17, %v2118_v1  ;;  %v1609_v9 = vrot.slane %v3580_v30, 4 }
 0x10a   : > { %1529 = vrot.lane.b32.xlu0 %v1513_v42, %s2956_s28  ;;  %v2155_v42 = vld [vmem:[%s3048_s27 + $0x1c] sm:$0xf]  ;;  %v1578_v8 = vsel %vm3124_vm8, %v1569_v20, %v1577_v26  ;;  %v3877_v54 = vor.u32 %v2183_v40, %v2180_v4  ;;  %v2196_v33 = vrot.slane %v2194_v10, 4  ;;  %v2709_v4 = vrot.slane %v1654_v38, 10 }
 0x10b   : > { %v789_v50 = vpop.permute.xlu1 %788  ;;  %v1617_v39 = vor.u32 %v1616_v19, %v1613_v36  ;;  %v2198_v61 = vshrl.u32 %v2155_v42, 16  ;;  %v2201_v5 = vshll.u32 %v2155_v42, 16  ;;  %v1713_v36 = vld [vmem:[%s3048_s27 + $0xc] sm:$0xf]  ;;  %v1659_v40 = vld [vmem:[%s3048_s27 + $0x1c] sm:$0xf] }
 0x10c   : > { %802 = vst.msk [vmem:[#allocation2 + $0x14] sm:$0xf] %vm796_vm4, %v789_v50  ;;  %v1380_v48 = vpop.permute.xlu0 %1379  ;;  %vm1489_vm4 = vcmask 290064   ;;  %v1732_v31 = vshll.u32 %v1713_v36, 16 }
 0x10d   : > { %1531 = vrot.lane.b32.xlu1 %v1516_v6, %s2956_s28  ;;  %1396 = vst.msk [vmem:[#allocation2 + $0x8] sm:$0xf] %vm1393_vm1, %v1380_v48  ;;  %v1623_v6 = vrot.slane %v1621_v51, 5  ;;  %v1619_v30 = vrot.slane %v1617_v39, 4  ;;  %v2200_v24 = vrot.slane %v2198_v61, 5  ;;  %v2203_v48 = vrot.slane %v2201_v5, 6 }
 0x10e   : > { %1537 = vrot.lane.b32.xlu0 %v1525_v37, %s2956_s28  ;;  %v1618_v26 = vsel %vm3124_vm8, %v1609_v9, %v1617_v39  ;;  %v2186_v51 = vrot.slane %v3877_v54, 4  ;;  %v2254_v39 = vld [vmem:[%s3048_s27 + $0x18] sm:$0xf]  ;;  %v1682_v5 = vrot.slane %v1659_v40, 6  ;;  %v2339_v40 = vshll.u32 %v2311_v11, 16 }
 0x10f   : > { %v1382_v62 = vpop.permute.xlu1 %1381  ;;  %v1627_v25 = vor.u32 %v1626_v22, %v1623_v6  ;;  %v3906_v6 = vld [vmem:[%s3048_s27 + $0x14] sm:$0xf]  ;;  %v1729_v22 = vshrl.u32 %v1713_v36, 16 }
 0x110   : > { %1397 = vst.msk [vmem:[#allocation2 + $0xc] sm:$0xf] %vm1393_vm1, %v1382_v62  ;;  %v875_v12 = vpop.permute.xlu0 %874  ;;  %v3899_v62 = vor.u32 %v2203_v48, %v2200_v24  ;;  %v2195_v42 = vsel %vm3124_vm8, %v2186_v51, %v2194_v10  ;;  %v2273_v48 = vrot.slane %v2254_v39, 6  ;;  %v1684_v38 = vrot.slane %v1682_v5, 4 }
 0x111   : > { %1539 = vrot.lane.b32.xlu1 %v1528_v63, %s2956_s28  ;;  %893 = vst.msk [vmem:[#allocation2] sm:$0xf] %vm892_vm6, %v875_v12  ;;  %v1712_v63 = vld [vmem:[%s3048_s27 + $0x8] sm:$0xc]  ;;  %v1628_v19 = vsel %vm3124_vm8, %v1619_v30, %v1627_v25  ;;  %v2270_v25 = vrot.slane %v3906_v6, 6 }
 0x112   : > { %2130 = vrot.lane.b32.xlu0 %v2116_v2, %s2964_s15  ;;  %v1670_v2 = vrot.slane %v1655_v35, 6  ;;  %v1720_v12 = vshrl.u32 %v1712_v63, 16  ;;  %v2205_v56 = vsel %vm3124_vm8, %v2196_v33, %v3899_v62 }
 0x113   : > { %v877_v37 = vpop.permute.xlu1 %876 }
 0x114   : > { %894 = vst.msk [vmem:[#allocation2 + $0x4] sm:$0xf] %vm892_vm6, %v877_v37  ;;  %v883_v50 = vpop.permute.xlu0 %882  ;;  %v1672_v61 = vrot.slane %v1670_v2, 4  ;;  %v1681_v37 = vrot.slane %v1679_v52, 4  ;;  %v1722_v30 = vrot.slane %v1720_v12, 6 }
 0x115   : > { %2132 = vrot.lane.b32.xlu1 %v2119_v15, %s2964_s15  ;;  %897 = vst.msk [vmem:[#allocation2 + $0x10] sm:$0xf] %vm892_vm6, %v883_v50  ;;  %v1723_v15 = vshll.u32 %v1712_v63, 16  ;;  %v1671_v50 = vsel %vm3148_vm11, %v2709_v4, %v1670_v2  ;;  %v3927_v52 = vld [vmem:[%s3048_s27 + $0x1c] sm:$0xf]  ;;  %v2272_v2 = vrot.slane %v2270_v25, 4 }
 0x116   : > { %1629 = vrot.lane.b32.xlu0 %v1578_v8, %s2957_s29  ;;  %v1717_v8 = vld [vmem:[%s3048_s27 + $0x1c] sm:$0xf]  ;;  %v1683_v36 = vsel %vm3148_vm11, %v1681_v37, %v1682_v5  ;;  %v2336_v4 = vshrl.u32 %v2311_v11, 16  ;;  %v2276_v12 = vrot.slane %v3927_v52, 6 }
 0x117   : > { %v885_v17 = vpop.permute.xlu1 %884  ;;  %v1725_v10 = vrot.slane %v1723_v15, 7  ;;  %v1769_v51 = vshrl.u32 %v1717_v8, 16  ;;  %v1772_v35 = vshll.u32 %v1717_v8, 16  ;;  %v2274_v8 = vsel %vm3148_vm11, %v2272_v2, %v2273_v48 }
 0x118   : > { %898 = vst.msk [vmem:[#allocation2 + $0x14] sm:$0xf] %vm892_vm6, %v885_v17  ;;  %v1476_v55 = vpop.permute.xlu0 %1475  ;;  %v1731_v17 = vrot.slane %v1729_v22, 6  ;;  %vm4360_vm6 = vcmask 306464  }
 0x119   : > { %1631 = vrot.lane.b32.xlu1 %v1588_v18, %s2957_s29  ;;  %1492 = vst.msk [vmem:[#allocation2 + $0x8] sm:$0xf] %vm1489_vm4, %v1476_v55  ;;  %v1660_v18 = vld [vmem:[%s3048_s27 + $0x20] sm:$0x3]  ;;  %v1674_v55 = vsel %vm3148_vm11, %v1672_v61, %v1673_v58  ;;  %v2275_v58 = vrot.slane %v2273_v48, 4  ;;  %v1774_v22 = vrot.slane %v1772_v35, 7 }
 0x11a   : > { %1637 = vrot.lane.b32.xlu0 %v1618_v26, %s2957_s29  ;;  %v1734_v26 = vrot.slane %v1732_v31, 7  ;;  %v1685_v63 = vrot.slane %v1660_v18, 6  ;;  %v2338_v18 = vrot.slane %v2336_v4, 6 }
 0x11b   : > { %v1478_v20 = vpop.permute.xlu1 %1477 }
 0x11c   : > { %1493 = vst.msk [vmem:[#allocation2 + $0xc] sm:$0xf] %vm1489_vm4, %v1478_v20  ;;  %v933_v49 = vpop.permute.xlu0 %932  ;;  %v1726_v20 = vor.u32 %v1725_v10, %v1722_v30  ;;  %v1735_v15 = vor.u32 %v1734_v26, %v1731_v17  ;;  %v2341_v30 = vrot.slane %v2339_v40, 7 }
 0x11d   : > { %1639 = vrot.lane.b32.xlu1 %v1628_v19, %s2957_s29  ;;  %951 = vst.msk [vmem:[#allocation2] sm:$0xf] %vm950_vm9, %v933_v49  ;;  %v1718_v19 = vld [vmem:[%s3048_s27 + $0x20] sm:$0x7]  ;;  %v1771_v49 = vrot.slane %v1769_v51, 6 }
 0x11e   : > { %2230 = vrot.lane.b32.xlu0 %v2195_v42, %s2965_s16  ;;  %v2312_v42 = vld [vmem:[%s3048_s27 + $0x18] sm:$0xf]  ;;  %v1779_v31 = vshrl.u32 %v1718_v19, 16  ;;  %v1782_v39 = vshll.u32 %v1718_v19, 16  ;;  %v1737_v17 = vrot.slane %v1735_v15, 4  ;;  %v1767_v19 = vrot.slane %v3664_v53, 4 }
 0x11f   : > { %v935_v9 = vpop.permute.xlu1 %934  ;;  %v2346_v61 = vshrl.u32 %v2312_v42, 16  ;;  %v2349_v5 = vshll.u32 %v2312_v42, 16  ;;  %v1775_v26 = vor.u32 %v1774_v22, %v1771_v49  ;;  %v1813_v22 = vld [vmem:[%s3048_s27 + $0xc] sm:$0xf] }
 0x120   : > { %952 = vst.msk [vmem:[#allocation2 + $0x4] sm:$0xf] %vm950_vm9, %v935_v9  ;;  %v941_v24 = vpop.permute.xlu0 %940  ;;  %v1727_v9 = vrot.slane %v1726_v20, 4  ;;  %v1781_v11 = vrot.slane %v1779_v31, 6  ;;  %v1784_v48 = vrot.slane %v1782_v39, 7  ;;  %v1746_v20 = vsel %vm3183_vm14, %v1737_v17, %v3643_v23 }
 0x121   : > { %2232 = vrot.lane.b32.xlu1 %v2205_v56, %s2965_s16  ;;  %955 = vst.msk [vmem:[#allocation2 + $0x10] sm:$0xf] %vm950_vm9, %v941_v24  ;;  %v1686_v56 = vsel %vm3148_vm11, %v1684_v38, %v1685_v63  ;;  %v2277_v24 = vsel %vm3148_vm11, %v2275_v58, %v2276_v12  ;;  %v2348_v51 = vrot.slane %v2346_v61, 6  ;;  %v2351_v35 = vrot.slane %v2349_v5, 7  ;;  %v2854_v31 = vld [vmem:[%s4358_s1 + $0x18] sm:$0x7f]  }
 0x122   : > { %1687 = vrot.lane.b32.xlu0 %v1671_v50, %s2958_s30  ;;  %v2313_v50 = vld [vmem:[%s3048_s27 + $0x1c] sm:$0xf]  ;;  %v1785_v42 = vor.u32 %v1784_v48, %v1781_v11  ;;  %v1777_v53 = vrot.slane %v1775_v26, 4  ;;  %v1812_v39 = vld [vmem:[%s3048_s27 + $0x8] sm:$0x8]  ;;  %v2855_v11 = vld [vmem:[%s4358_s1 + $0x10] sm:$0xff]  }
 0x123   : > { %v943_v33 = vpop.permute.xlu1 %942  ;;  %v2359_v38 = vshll.u32 %v2313_v50, 16  ;;  %v2352_v4 = vor.u32 %v2351_v35, %v2348_v51  ;;  %v1818_v48 = vld [vmem:[%s3048_s27 + $0x20] sm:$0x7] }
 0x124   : > { %956 = vst.msk [vmem:[#allocation2 + $0x14] sm:$0xf] %vm950_vm9, %v943_v33  ;;  %v1534_v45 = vpop.permute.xlu0 %1533  ;;  %v3961_v33 = vor.u32 %v2341_v30, %v2338_v18  ;;  %vm1647_vm9 = vcmask 322864   ;;  %v1786_v5 = vsel %vm3183_vm14, %v1777_v53, %v1785_v42  ;;  %v2710_v30 = vrot.slane %v1812_v39, 11  ;;  %v1870_v42 = vld [vmem:[%s3048_s27 + $0x8] sm:$0x8] }
 0x125   : > { %1689 = vrot.lane.b32.xlu1 %v1674_v55, %s2958_s30  ;;  %1550 = vst.msk [vmem:[#allocation2 + $0x8] sm:$0xf] %vm4360_vm6, %v1534_v45  ;;  %v2356_v55 = vshrl.u32 %v2313_v50, 16  ;;  %v2361_v45 = vrot.slane %v2359_v38, 7  ;;  %v2412_v38 = vld [vmem:[%s3048_s27 + $0x18] sm:$0xf] }
 0x126   : > { %1695 = vrot.lane.b32.xlu0 %v1683_v36, %s2958_s30  ;;  %v1736_v36 = vsel %vm3183_vm14, %v1727_v9, %v1735_v15  ;;  %v1776_v15 = vsel %vm3183_vm14, %v1767_v19, %v1775_v26  ;;  %v2344_v49 = vrot.slane %v3961_v33, 4  ;;  %v1828_v9 = vrot.slane %v1813_v22, 7  ;;  %v3997_v26 = vld [vmem:[%s3048_s27 + $0xc] sm:$0xf] }
 0x127   : > { %v1536_v37 = vpop.permute.xlu1 %1535  ;;  %v2358_v40 = vrot.slane %v2356_v55, 6  ;;  %v1843_v60 = vrot.slane %v1818_v48, 7  ;;  %v1878_v22 = vshrl.u32 %v1870_v42, 16  ;;  %v1886_v34 = vshll.u32 %v3997_v26, 16 }
 0x128   : > { %1551 = vst.msk [vmem:[#allocation2 + $0xc] sm:$0xf] %vm4360_vm6, %v1536_v37  ;;  %v1033_v10 = vpop.permute.xlu0 %1032  ;;  %vm2529_vm6 = vcmask 1046528   ;;  %v2354_v37 = vrot.slane %v2352_v4, 4  ;;  %v2353_v18 = vsel %vm3183_vm14, %v2344_v49, %v2352_v4  ;;  %v1830_v35 = vrot.slane %v1828_v9, 4 }
 0x129   : > { %1697 = vrot.lane.b32.xlu1 %v1686_v56, %s2958_s30  ;;  %1051 = vst.msk [vmem:[#allocation2] sm:$0xf] %vm1050_vm10, %v1033_v10  ;;  %v2967_v56 = vmov 0.0   ;;  %v2531_v61 = vsel %vm2529_vm6, %v2854_v31, 0  ;;  %v1817_v10 = vld [vmem:[%s3048_s27 + $0x1c] sm:$0xf]  ;;  %v1829_v19 = vsel %vm3215_vm2, %v2710_v30, %v1828_v9 }
 0x12a   : > { %2288 = vrot.lane.b32.xlu0 %v2274_v8, %s2966_s18  ;;  %2755 = vmatprep.subr.bf16.mxu1 %v2967_v56  ;;  %v3985_v8 = vor.u32 %v2361_v45, %v2358_v40  ;;  %v1840_v55 = vrot.slane %v1817_v10, 7  ;;  %v1875_v4 = vld [vmem:[%s3048_s27 + $0x1c] sm:$0xf]  ;;  %v2856_v40 = vld [vmem:[%s4358_s1 + $0x8] sm:$0xff]   ;;  %v1832_v45 = vsel %vm3215_vm2, %v1830_v35, %v1831_v27  ;;  %v2711_v10 = vrot.slane %v1878_v22, 11 }
 0x12b   : > { %v1035_v63 = vpop.permute.xlu1 %1034  ;;  %2759 = vmatpush3.bf16.msra.mxu1 %v2531_v61  ;;  %2735 = vmatprep.subr.bf16.mxu0 %v2967_v56  ;;  %vm1805_vm6 = vcmask 355664  }
 0x12c   : > { %1052 = vst.msk [vmem:[#allocation2 + $0x4] sm:$0xf] %vm1050_vm10, %v1035_v63  ;;  %v1041_v2 = vpop.permute.xlu0 %1040  ;;  %2756 = vmatprep.subr.bf16.mxu1 %v2967_v56  ;;  %2736 = vmatpush3.bf16.msra.mxu0 %v2531_v61  ;;  %v2363_v51 = vsel %vm3183_vm14, %v2354_v37, %v3985_v8  ;;  %v1876_v61 = vld [vmem:[%s3048_s27 + $0x20] sm:$0xf] }
 0x12d   : > { %2290 = vrot.lane.b32.xlu1 %v2277_v24, %s2966_s18  ;;  %1055 = vst.msk [vmem:[#allocation2 + $0x10] sm:$0xf] %vm1050_vm10, %v1041_v2  ;;  %v3991_v24 = vld [vmem:[%s3048_s27 + $0x14] sm:$0xf]  ;;  %2737 = vmatprep.subr.bf16.mxu0 %v2967_v56  ;;  %v1839_v2 = vrot.slane %v1837_v59, 4  ;;  %v2431_v59 = vrot.slane %v2412_v38, 7 }
 0x12e   : > { %1787 = vrot.lane.b32.xlu0 %v1736_v36, %s2959_s4  ;;  %v2428_v63 = vrot.slane %v3991_v24, 7  ;;  %v2857_v37 = vld [vmem:[%s4358_s1] sm:$0xff]  }
 0x12f   : > { %v1043_v58 = vpop.permute.xlu1 %1042  ;;  %2760 = vmatpush3.bf16.msra.mxu1 %v2855_v11  ;;  %v2433_v9 = vrot.slane %v2431_v59, 4 }
 0x130   : > { %1056 = vst.msk [vmem:[#allocation2 + $0x14] sm:$0xf] %vm1050_vm10, %v1043_v58  ;;  %v1634_v23 = vpop.permute.xlu0 %1633  ;;  %2757 = vmatprep.subr.bf16.mxu1 %v2967_v56  ;;  %2738 = vmatpush3.bf16.msra.mxu0 %v2855_v11  ;;  %vm1705_vm10 = vcmask 339264   ;;  %v1842_v58 = vrot.slane %v1840_v55, 4  ;;  %v2430_v49 = vrot.slane %v2428_v63, 4 }
 0x131   : > { %1789 = vrot.lane.b32.xlu1 %v1746_v20, %s2959_s4  ;;  %1650 = vst.msk [vmem:[#allocation2 + $0x8] sm:$0xf] %vm1647_vm9, %v1634_v23  ;;  %v1883_v20 = vshrl.u32 %v3997_v26, 16  ;;  %2739 = vmatprep.subr.bf16.mxu0 %v2967_v56  ;;  %v1841_v23 = vsel %vm3215_vm2, %v1839_v2, %v1840_v55  ;;  %v1997_v55 = vld [vmem:[%s3048_s27 + $0xc] sm:$0xf]  ;;  %v1931_v2 = vshll.u32 %v1876_v61, 16 }
 0x132   : > { %1795 = vrot.lane.b32.xlu0 %v1776_v15, %s2959_s4  ;;  %v4033_v15 = vld [vmem:[%s3048_s27 + $0x1c] sm:$0xf]  ;;  %v2432_v30 = vsel %vm3215_vm2, %v2430_v49, %v2431_v59  ;;  %v2008_v59 = vshll.u32 %v1997_v55, 16 }
 0x133   : > { %v1636_v50 = vpop.permute.xlu1 %1635  ;;  %2761 = vmatpush3.bf16.msra.mxu1 %v2856_v40  ;;  %v1885_v39 = vrot.slane %v1883_v20, 7  ;;  %v1917_v20 = vrot.slane %v3746_v29, 4 }
 0x134   : > { %1651 = vst.msk [vmem:[#allocation2 + $0xc] sm:$0xf] %vm1647_vm9, %v1636_v50  ;;  %v1091_v17 = vpop.permute.xlu0 %1090  ;;  %2758 = vmatprep.subr.bf16.mxu1 %v2967_v56  ;;  %2740 = vmatpush3.bf16.msra.mxu0 %v2856_v40  ;;  %v2434_v50 = vrot.slane %v4033_v15, 7  ;;  %v1998_v40 = vld [vmem:[%s3048_s27 + $0x10] sm:$0xf] }
 0x135   : > { %1797 = vrot.lane.b32.xlu1 %v1786_v5, %s2959_s4  ;;  %1109 = vst.msk [vmem:[#allocation2] sm:$0xf] %vm1108_vm12, %v1091_v17  ;;  %v1919_v5 = vshrl.u32 %v1875_v4, 16  ;;  %2741 = vmatprep.subr.bf16.mxu0 %v2967_v56  ;;  %v1928_v17 = vshrl.u32 %v1876_v61, 16  ;;  %v1888_v11 = vor.u32 %v1886_v34, %v1885_v39  ;;  %v1890_v38 = vrot.slane %v1885_v39, 4 }
 0x136   : > { %2388 = vrot.lane.b32.xlu0 %v2353_v18, %s2968_s26  ;;  %v1844_v18 = vsel %vm3215_vm2, %v1842_v58, %v1843_v60  ;;  %v2005_v60 = vshrl.u32 %v1997_v55, 16  ;;  %v2014_v22 = vshll.u32 %v1998_v40, 16  ;;  %v2003_v55 = vld [vmem:[%s3048_s27 + $0x24] sm:$0x1] }
 0x137   : > { %v1093_v36 = vpop.permute.xlu1 %1092  ;;  %2762 = vmatpush3.bf16.msra.mxu1 %v2857_v37  ;;  %v1921_v48 = vrot.slane %v1919_v5, 7  ;;  %v1898_v29 = vsel %vm3267_vm7, %v1890_v38, %v3706_v47  ;;  %v2010_v5 = vrot.slane %v2008_v59, 5 }
 0x138   : > { %1110 = vst.msk [vmem:[#allocation2 + $0x4] sm:$0xf] %vm1108_vm12, %v1093_v36  ;;  %v1099_v53 = vpop.permute.xlu0 %1098  ;;  %2742 = vmatpush3.bf16.msra.mxu0 %v2857_v37  ;;  %v2435_v36 = vsel %vm3215_vm2, %v2433_v9, %v2434_v50  ;;  %v2007_v61 = vrot.slane %v2005_v60, 4  ;;  %v2094_v60 = vld [vmem:[%s3048_s27 + $0x10] sm:$0xf] }
 0x139   : > { %2390 = vrot.lane.b32.xlu1 %v2363_v51, %s2968_s26  ;;  %1113 = vst.msk [vmem:[#allocation2 + $0x10] sm:$0xf] %vm1108_vm12, %v1099_v53  ;;  %v1922_v51 = vshll.u32 %v1875_v4, 16  ;;  %v1889_v53 = vsel %vm3267_vm7, %v2711_v10, %v1888_v11  ;;  %v1926_v58 = vrot.slane %v1921_v48, 4 }
 0x13a   : > { %1845 = vrot.lane.b32.xlu0 %v1829_v19, %s2960_s5  ;;  %v1930_v19 = vrot.slane %v1928_v17, 7  ;;  %v1960_v17 = vld [vmem:[%s3048_s27 + $0xc] sm:$0xf] }
 0x13b   : > { %v1101_v31 = vpop.permute.xlu1 %1100  ;;  %v1924_v4 = vor.u32 %v1922_v51, %v1921_v48  ;;  %v1961_v51 = vld [vmem:[%s3048_s27 + $0x10] sm:$0xf] }
 0x13c   : > { %1114 = vst.msk [vmem:[#allocation2 + $0x14] sm:$0xf] %vm1108_vm12, %v1101_v31  ;;  %v1692_v27 = vpop.permute.xlu0 %1691  ;;  %vm2969_vm12 = vmmov 0   ;;  %v1933_v49 = vor.u32 %v1931_v2, %v1930_v19  ;;  %v2018_v31 = vshrl.u32 %v1998_v40, 16 }
 0x13d   : > { %1847 = vrot.lane.b32.xlu1 %v1832_v45, %s2960_s5  ;;  %1708 = vst.msk [vmem:[#allocation2 + $0x8] sm:$0xf] %vm1705_vm10, %v1692_v27  ;;  %2747 = vmatprep.mubr.msk.bf16.mxu1 %vm2969_vm12, %v2967_v56  ;;  %v1925_v34 = vsel %vm3267_vm7, %v1917_v20, %v1924_v4  ;;  %v2151_v20 = vld [vmem:[%s3048_s27 + $0xc] sm:$0xe]  ;;  %v1965_v4 = vld [vmem:[%s3048_s27 + $0x20] sm:$0xf] }
 0x13e   : > { %1853 = vrot.lane.b32.xlu0 %v1841_v23, %s2960_s5  ;;  %2743 = vmatprep.mubr.msk.bf16.mxu0 %vm2969_vm12, %v2967_v56  ;;  %v2002_v23 = vld [vmem:[%s3048_s27 + $0x20] sm:$0xf]  ;;  %v1934_v9 = vsel %vm3267_vm7, %v1926_v58, %v1933_v49  ;;  %vm1863_vm7 = vcmask 372064   ;;  %v2152_v58 = vld [vmem:[%s3048_s27 + $0x10] sm:$0xf]  ;;  %v2159_v49 = vshrl.u32 %v2151_v20, 16 }
 0x13f   : > { %v1694_v26 = vpop.permute.xlu1 %1693  ;;  %v2054_v47 = vshll.u32 %v2002_v23, 16  ;;  %v2058_v37 = vshrl.u32 %v2002_v23, 16  ;;  %v2093_v23 = vld [vmem:[%s3048_s27 + $0xc] sm:$0xe] }
 0x140   : > { %1709 = vst.msk [vmem:[#allocation2 + $0xc] sm:$0xf] %vm1705_vm10, %v1694_v26  ;;  %v1191_v35 = vpop.permute.xlu0 %1190  ;;  %v2011_v26 = vor.u32 %v2010_v5, %v2007_v61  ;;  %v2109_v61 = vrot.slane %v2094_v60, 5  ;;  %v2171_v5 = vshll.u32 %v2152_v58, 16 }
 0x141   : > { %1855 = vrot.lane.b32.xlu1 %v1844_v18, %s2960_s5  ;;  %1209 = vst.msk [vmem:[#allocation2] sm:$0xf] %vm1208_vm13, %v1191_v35  ;;  %v2016_v18 = vrot.slane %v2014_v22, 5  ;;  %v2056_v48 = vrot.slane %v2054_v47, 5  ;;  %v2060_v13 = vrot.slane %v2058_v37, 4  ;;  %v2162_v22 = vshll.u32 %v2151_v20, 16 }
 0x142   : > { %2446 = vrot.lane.b32.xlu0 %v2432_v30, %s2970_s20  ;;  %v2020_v30 = vrot.slane %v2018_v31, 4  ;;  %v2012_v19 = vrot.slane %v2011_v26, 4  ;;  %v2712_v37 = vrot.slane %v2093_v23, 9  ;;  %v2099_v26 = vld [vmem:[%s3048_s27 + $0x24] sm:$0x1] }
 0x143   : > { %v1193_v42 = vpop.permute.xlu1 %1192 }
 0x144   : > { %1210 = vst.msk [vmem:[#allocation2 + $0x4] sm:$0xf] %vm1208_vm13, %v1193_v42  ;;  %v1199_v45 = vpop.permute.xlu0 %1198  ;;  %v2021_v35 = vor.u32 %v2020_v30, %v2016_v18  ;;  %v2061_v42 = vor.u32 %v2060_v13, %v2056_v48  ;;  %v2156_v30 = vld [vmem:[%s3048_s27 + $0x20] sm:$0xf]  ;;  %v2173_v13 = vrot.slane %v2171_v5, 6 }
 0x145   : > { %2448 = vrot.lane.b32.xlu1 %v2435_v36, %s2970_s20  ;;  %1213 = vst.msk [vmem:[#allocation2 + $0x10] sm:$0xf] %vm1208_vm13, %v1199_v45  ;;  %v1964_v36 = vld [vmem:[%s3048_s27 + $0x1c] sm:$0xf]  ;;  %v2017_v45 = vsel %vm3084_vm5, %v2012_v19, %v2016_v18  ;;  %v2164_v18 = vrot.slane %v2162_v22, 6  ;;  %v2120_v19 = vrot.slane %v2118_v1, 4 }
 0x146   : > { %1935 = vrot.lane.b32.xlu0 %v1889_v53, %s2961_s6  ;;  %v2064_v53 = vshll.u32 %v2003_v55, 16  ;;  %v2022_v40 = vrot.slane %v2021_v35, 4  ;;  %v2208_v35 = vshrl.u32 %v2156_v30, 16  ;;  %v2211_v55 = vshll.u32 %v2156_v30, 16 }
 0x147   : > { %v1201_v39 = vpop.permute.xlu1 %1200 }
 0x148   : > { %1214 = vst.msk [vmem:[#allocation2 + $0x14] sm:$0xf] %vm1208_vm13, %v1201_v39  ;;  %v1792_v27 = vpop.permute.xlu0 %1791  ;;  %v2062_v39 = vrot.slane %v2061_v42, 4  ;;  %v2027_v44 = vsel %vm3084_vm5, %v2022_v40, %v3785_v28  ;;  %v2213_v40 = vrot.slane %v2211_v55, 6 }
 0x149   : > { %1937 = vrot.lane.b32.xlu1 %v1898_v29, %s2961_s6  ;;  %1808 = vst.msk [vmem:[#allocation2 + $0x8] sm:$0xf] %vm1805_vm6, %v1792_v27  ;;  %v2052_v29 = vrot.slane %v2051_v43, 4  ;;  %v2168_v43 = vshrl.u32 %v2152_v58, 16 }
 0x14a   : > { %1943 = vrot.lane.b32.xlu0 %v1925_v34, %s2961_s6  ;;  %v2066_v34 = vrot.slane %v2064_v53, 5  ;;  %v2124_v53 = vrot.slane %v2099_v26, 5 }
 0x14b   : > { %v1794_v10 = vpop.permute.xlu1 %1793  ;;  %v2057_v47 = vsel %vm3084_vm5, %v2052_v29, %v2056_v48  ;;  %v2170_v48 = vrot.slane %v2168_v43, 5 }
 0x14c   : > { %1809 = vst.msk [vmem:[#allocation2 + $0xc] sm:$0xf] %vm1805_vm6, %v1794_v10  ;;  %v1249_v11 = vpop.permute.xlu0 %1248  ;;  %v2067_v28 = vsel %vm3084_vm5, %v2062_v39, %v2066_v34  ;;  %vm1953_vm5 = vcmask 388464   ;;  %v2310_v34 = vld [vmem:[%s3048_s27 + $0x10] sm:$0xf] }
 0x14d   : > { %1945 = vrot.lane.b32.xlu1 %v1934_v9, %s2961_s6  ;;  %1267 = vst.msk [vmem:[#allocation2] sm:$0xf] %vm1266_vm15, %v1249_v11  ;;  %v2161_v9 = vrot.slane %v2159_v49, 5  ;;  %v2121_v11 = vrot.slane %v2098_v57, 5  ;;  %v2174_v1 = vor.u32 %v2173_v13, %v2170_v48  ;;  %v2252_v49 = vld [vmem:[%s3048_s27 + $0x10] sm:$0xf] }
 0x14e   : > { %1972 = vrot.lane.b32.xlu0 %v1960_v17, %s2962_s7  ;;  %v2111_v17 = vrot.slane %v2109_v61, 4  ;;  %v2206_v57 = vrot.slane %v3899_v62, 4  ;;  %v2314_v13 = vld [vmem:[%s3048_s27 + $0x20] sm:$0xf] }
 0x14f   : > { %v1251_v38 = vpop.permute.xlu1 %1250  ;;  %v2123_v42 = vrot.slane %v2121_v11, 4  ;;  %v2176_v22 = vrot.slane %v2174_v1, 4 }
 0x150   : > { %1268 = vst.msk [vmem:[#allocation2 + $0x4] sm:$0xf] %vm1266_vm15, %v1251_v38  ;;  %v1257_v2 = vpop.permute.xlu0 %1256  ;;  %v2113_v20 = vsel %vm3050_vm3, %v2111_v17, %v2112_v7  ;;  %v2309_v7 = vld [vmem:[%s3048_s27 + $0xc] sm:$0xc] }
 0x151   : > { %1974 = vrot.lane.b32.xlu1 %v1961_v51, %s2962_s7  ;;  %1271 = vst.msk [vmem:[#allocation2 + $0x10] sm:$0xf] %vm1266_vm15, %v1257_v2  ;;  %v2157_v51 = vld [vmem:[%s3048_s27 + $0x24] sm:$0x3]  ;;  %v2165_v2 = vor.u32 %v2164_v18, %v2161_v9  ;;  %v2125_v58 = vsel %vm3050_vm3, %v2123_v42, %v2124_v53  ;;  %v2317_v43 = vshrl.u32 %v2309_v7, 16  ;;  %v2320_v5 = vshll.u32 %v2309_v7, 16 }
 0x152   : > { %1980 = vrot.lane.b32.xlu0 %v1964_v36, %s2962_s7  ;;  %v2110_v36 = vsel %vm3050_vm3, %v2712_v37, %v2109_v61  ;;  %v2218_v21 = vshrl.u32 %v2157_v51, 16  ;;  %v2221_v60 = vshll.u32 %v2157_v51, 16  ;;  %v2326_v37 = vshrl.u32 %v2310_v34, 16 }
 0x153   : > { %v1259_v59 = vpop.permute.xlu1 %1258  ;;  %v2166_v29 = vrot.slane %v2165_v2, 4  ;;  %v2329_v9 = vshll.u32 %v2310_v34, 16  ;;  %v2185_v18 = vsel %vm3124_vm8, %v2176_v22, %v3877_v54  ;;  %v2322_v48 = vrot.slane %v2320_v5, 7 }
 0x154   : > { %1272 = vst.msk [vmem:[#allocation2 + $0x14] sm:$0xf] %vm1266_vm15, %v1259_v59  ;;  %v1850_v31 = vpop.permute.xlu0 %1849  ;;  %v2220_v23 = vrot.slane %v2218_v21, 5  ;;  %v2223_v39 = vrot.slane %v2221_v60, 6  ;;  %v2328_v55 = vrot.slane %v2326_v37, 6  ;;  %v2366_v2 = vshrl.u32 %v2314_v13, 16 }
 0x155   : > { %1982 = vrot.lane.b32.xlu1 %v1965_v4, %s2962_s7  ;;  %1866 = vst.msk [vmem:[#allocation2 + $0x8] sm:$0xf] %vm1863_vm7, %v1850_v31  ;;  %v2210_v4 = vrot.slane %v2208_v35, 5  ;;  %v2278_v53 = vrot.slane %v2276_v12, 4  ;;  %vm2144_vm15 = vcmask 437664  }
 0x156   : > { %2068 = vrot.lane.b32.xlu0 %v2017_v45, %s2963_s8  ;;  %v2122_v45 = vsel %vm3050_vm3, %v2120_v19, %v2121_v11  ;;  %v2224_v30 = vor.u32 %v2223_v39, %v2220_v23  ;;  %v2319_v11 = vrot.slane %v2317_v43, 6  ;;  %vm1990_vm3 = vcmask 404864   ;;  %v2257_v19 = vld [vmem:[%s3048_s27 + $0x24] sm:$0x3]  ;;  %v2409_v43 = vld [vmem:[%s3048_s27 + $0xc] sm:$0x8] }
 0x157   : > { %v1852_v27 = vpop.permute.xlu1 %1851  ;;  %v2214_v31 = vor.u32 %v2213_v40, %v2210_v4  ;;  %v2282_v60 = vrot.slane %v2257_v19, 6  ;;  %v2368_v52 = vrot.slane %v2366_v2, 6  ;;  %v2714_v37 = vrot.slane %v2409_v43, 11 }
 0x158   : > { %1867 = vst.msk [vmem:[#allocation2 + $0xc] sm:$0xf] %vm1863_vm7, %v1852_v27  ;;  %v1339_v10 = vpop.permute.xlu0 %1338  ;;  %v2251_v27 = vld [vmem:[%s3048_s27 + $0xc] sm:$0xc]  ;;  %v2323_v21 = vor.u32 %v2322_v48, %v2319_v11 }
 0x159   : > { %2070 = vrot.lane.b32.xlu1 %v2027_v44, %s2963_s8  ;;  %1357 = vst.msk [vmem:[#allocation2] sm:$0xf] %vm1356_vm0, %v1339_v10  ;;  %v2175_v44 = vsel %vm3124_vm8, %v2166_v29, %v2174_v1  ;;  %v2216_v62 = vrot.slane %v2214_v31, 4  ;;  %v2256_v10 = vld [vmem:[%s3048_s27 + $0x20] sm:$0xf]  ;;  %v2215_v17 = vsel %vm3124_vm8, %v2206_v57, %v2214_v31  ;;  %v2713_v26 = vrot.slane %v2251_v27, 10 }
 0x15a   : > { %2076 = vrot.lane.b32.xlu0 %v2057_v47, %s2963_s8  ;;  %v2267_v47 = vrot.slane %v2252_v49, 6  ;;  %v2279_v35 = vrot.slane %v2256_v10, 6  ;;  %v2315_v1 = vld [vmem:[%s3048_s27 + $0x24] sm:$0x7] }
 0x15b   : > { %v1341_v38 = vpop.permute.xlu1 %1340  ;;  %v2379_v29 = vshll.u32 %v2315_v1, 16 }
 0x15c   : > { %1358 = vst.msk [vmem:[#allocation2 + $0x4] sm:$0xf] %vm1356_vm0, %v1341_v38  ;;  %v1347_v41 = vpop.permute.xlu0 %1346  ;;  %v2269_v54 = vrot.slane %v2267_v47, 4  ;;  %v2331_v38 = vrot.slane %v2329_v9, 7  ;;  %v2268_v42 = vsel %vm3148_vm11, %v2713_v26, %v2267_v47  ;;  %v2281_v40 = vrot.slane %v2279_v35, 4 }
 0x15d   : > { %2078 = vrot.lane.b32.xlu1 %v2067_v28, %s2963_s8  ;;  %1361 = vst.msk [vmem:[#allocation2 + $0x10] sm:$0xf] %vm1356_vm0, %v1347_v41  ;;  %v2369_v41 = vshll.u32 %v2314_v13, 16  ;;  %v2280_v7 = vsel %vm3148_vm11, %v2278_v53, %v2279_v35  ;;  %v2381_v23 = vrot.slane %v2379_v29, 7  ;;  %v2414_v9 = vld [vmem:[%s3048_s27 + $0x20] sm:$0xf] }
 0x15e   : > { %2126 = vrot.lane.b32.xlu0 %v2110_v36, %s2964_s15  ;;  %v2225_v36 = vsel %vm3124_vm8, %v2216_v62, %v2224_v30  ;;  %v2271_v46 = vsel %vm3148_vm11, %v2269_v54, %v2270_v25  ;;  %v2283_v25 = vsel %vm3148_vm11, %v2281_v40, %v2282_v60  ;;  %vm2086_vm8 = vcmask 421264   ;;  %s2765_s8 = smul.u32 768, %s2929_s12 }
 0x15f   : > { %v1349_v59 = vpop.permute.xlu1 %1348  ;;  %v2371_v12 = vrot.slane %v2369_v41, 7  ;;  %v2437_v30 = vrot.slane %v2414_v9, 7  ;;  %v2436_v26 = vrot.slane %v2434_v50, 4  ;;  %vm4377_vm11 = vcmask 306464  }
 0x160   : > { %1362 = vst.msk [vmem:[#allocation2 + $0x14] sm:$0xf] %vm1356_vm0, %v1349_v59  ;;  %v1940_v32 = vpop.permute.xlu0 %1939  ;;  %v2332_v59 = vor.u32 %v2331_v38, %v2328_v55  ;;  %vm4379_vm13 = vmmov %vm4377_vm11 }
 0x161   : > { %2128 = vrot.lane.b32.xlu1 %v2113_v20, %s2964_s15  ;;  %1956 = vst.msk [vmem:[#allocation2 + $0x8] sm:$0xf] %vm1953_vm5, %v1940_v32  ;;  %v2372_v22 = vor.u32 %v2371_v12, %v2368_v52  ;;  %v2439_v48 = vrot.slane %v2437_v30, 4  ;;  %v2438_v15 = vsel %vm3215_vm2, %v2436_v26, %v2437_v30  ;;  %vm4380_vm0 = vmmov %vm4377_vm11 }
 0x162   : > { %2134 = vrot.lane.b32.xlu0 %v2122_v45, %s2964_s15  ;;  %v2376_v45 = vshrl.u32 %v2315_v1, 16  ;;  %v2334_v49 = vrot.slane %v2332_v59, 4 }
 0x163   : > { %v1942_v61 = vpop.permute.xlu1 %1941  ;;  %v2374_v5 = vrot.slane %v2372_v22, 4 }
 0x164   : > { %1957 = vst.msk [vmem:[#allocation2 + $0xc] sm:$0xf] %vm1953_vm5, %v1942_v61  ;;  %v1376_v0 = vpop.permute.xlu0 %1375  ;;  %v2378_v31 = vrot.slane %v2376_v45, 6  ;;  %v2364_v61 = vrot.slane %v3985_v8, 4  ;;  %v2343_v16 = vsel %vm3183_vm14, %v2334_v49, %v3961_v33 }
 0x165   : > { %2136 = vrot.lane.b32.xlu1 %v2125_v58, %s2964_s15  ;;  %1394 = vst.msk [vmem:[#allocation2] sm:$0xf] %vm1393_vm1, %v1376_v0  ;;  %v2324_v58 = vrot.slane %v2323_v21, 4 }
 0x166   : > { %2226 = vrot.lane.b32.xlu0 %v2175_v44, %s2965_s16  ;;  %v2410_v44 = vld [vmem:[%s3048_s27 + $0x10] sm:$0xf]  ;;  %v2382_v0 = vor.u32 %v2381_v23, %v2378_v31  ;;  %v2373_v47 = vsel %vm3183_vm14, %v2364_v61, %v2372_v22 }
 0x167   : > { %v1378_v28 = vpop.permute.xlu1 %1377  ;;  %v2333_v34 = vsel %vm3183_vm14, %v2324_v58, %v2332_v59  ;;  %v2425_v8 = vrot.slane %v2410_v44, 7 }
 0x168   : > { %1395 = vst.msk [vmem:[#allocation2 + $0x4] sm:$0xf] %vm1393_vm1, %v1378_v28  ;;  %v1384_v51 = vpop.permute.xlu0 %1383  ;;  %v2383_v33 = vsel %vm3183_vm14, %v2374_v5, %v2382_v0  ;;  %vm4378_vm14 = vmmov %vm4377_vm11 }
 0x169   : > { %2228 = vrot.lane.b32.xlu1 %v2185_v18, %s2965_s16  ;;  %1398 = vst.msk [vmem:[#allocation2 + $0x10] sm:$0xf] %vm1393_vm1, %v1384_v51  ;;  %v2427_v62 = vrot.slane %v2425_v8, 4  ;;  %v2426_v28 = vsel %vm3215_vm2, %v2714_v37, %v2425_v8 }
 0x16a   : > { %2234 = vrot.lane.b32.xlu0 %v2215_v17, %s2965_s16  ;;  %v2415_v17 = vld [vmem:[%s3048_s27 + $0x24] sm:$0x7]  ;;  %s158_s27 = sand.u32 1, %s2921_s10  }
 0x16b   : > { %v1386_v20 = vpop.permute.xlu1 %1385  ;;  %v2429_v3 = vsel %vm3215_vm2, %v2427_v62, %v2428_v63  ;;  %v2440_v13 = vrot.slane %v2415_v17, 7  ;;  %s2763_s5 = smul.u32 48, %s158_s27  ;;  %s4311_s12 = scalar_lea.sflag [#allocation4], %s158_s27 }
 0x16c   : > { %1399 = vst.msk [vmem:[#allocation2 + $0x14] sm:$0xf] %vm1393_vm1, %v1386_v20  ;;  %v1977_v4 = vpop.permute.xlu0 %1976  ;;  %vm2302_vm1 = vcmask 470464  }
 0x16d   : > { %2236 = vrot.lane.b32.xlu1 %v2225_v36, %s2965_s16  ;;  %1993 = vst.msk [vmem:[#allocation2 + $0x8] sm:$0xf] %vm1990_vm3, %v1977_v4  ;;  %v2441_v24 = vsel %vm3215_vm2, %v2439_v48, %v2440_v13  ;;  %vm2244_vm2 = vcmask 454064   ;;  %s160_s6 = scalar_lea.vmem [#allocation3], %s2763_s5 }
 0x16e   : > { %2284 = vrot.lane.b32.xlu0 %v2268_v42, %s2966_s18  ;;  %s2612_s7 = sshll.u32 %s160_s6, 4  ;;  %s4304_s7 = int_to_ptr.vmem [resolvable:$true] %s2612_s7 }
 0x16f   : > { %v1979_v32 = vpop.permute.xlu1 %1978  ;;  %s2861_s23 = scalar_lea.vmem %s4304_s7, 768  ;;  %p2868_p1 = scmp.lt.s32.totalorder %s4304_s7, %s2866_s25 }
 0x170   : > { %1994 = vst.msk [vmem:[#allocation2 + $0xc] sm:$0xf] %vm1990_vm3, %v1979_v32  ;;  %v1472_v6 = vpop.permute.xlu0 %1471  ;;  %p2862_p12 = scmp.ne.s32.totalorder %s4304_s7, %s2861_s23 }
 0x171   : > { %2286 = vrot.lane.b32.xlu1 %v2271_v46, %s2966_s18  ;;  %1490 = vst.msk [vmem:[#allocation2] sm:$0xf] %vm1489_vm4, %v1472_v6 }
 0x172   : > { %2292 = vrot.lane.b32.xlu0 %v2280_v7, %s2966_s18  ;;  %p2863_p13 = pnand %p2862_p12, %p3028_p4 }
 0x173   : > { %v1474_v39 = vpop.permute.xlu1 %1473 }
 0x174   : > { %1491 = vst.msk [vmem:[#allocation2 + $0x4] sm:$0xf] %vm1489_vm4, %v1474_v39  ;;  %v1480_v57 = vpop.permute.xlu0 %1479  ;;  %p2864_p0 = pneg %p2863_p13 }
 0x175   : > { %2294 = vrot.lane.b32.xlu1 %v2283_v25, %s2966_s18  ;;  %1494 = vst.msk [vmem:[#allocation2 + $0x10] sm:$0xf] %vm1489_vm4, %v1480_v57  ;;  %s4309_s18 = scalar_lea.hbm %s4359_s2, %s2765_s8 }
 0x176   : > { %2384 = vrot.lane.b32.xlu0 %v2333_v34, %s2968_s26 }
 0x177   : > { %v1482_v27 = vpop.permute.xlu1 %1481 }
 0x178   : > { %1495 = vst.msk [vmem:[#allocation2 + $0x14] sm:$0xf] %vm1489_vm4, %v1482_v27  ;;  %v2073_v18 = vpop.permute.xlu0 %2072  ;;  %vm2402_vm4 = vcmask 486864  }
 0x179   : > { %2386 = vrot.lane.b32.xlu1 %v2343_v16, %s2968_s26  ;;  %2089 = vst.msk [vmem:[#allocation2 + $0x8] sm:$0xf] %vm2086_vm8, %v2073_v18 }
 0x17a   : > { %2392 = vrot.lane.b32.xlu0 %v2373_v47, %s2968_s26 }
 0x17b   : > { %v2075_v10 = vpop.permute.xlu1 %2074 }
 0x17c   : > { %2090 = vst.msk [vmem:[#allocation2 + $0xc] sm:$0xf] %vm2086_vm8, %v2075_v10  ;;  %v1530_v11 = vpop.permute.xlu0 %1529 }
 0x17d   : > { %2394 = vrot.lane.b32.xlu1 %v2383_v33, %s2968_s26  ;;  %1548 = vst.msk [vmem:[#allocation2] sm:$0xf] %vm4377_vm11, %v1530_v11  ;;  %s2867_s26 = scalar_lea.vmem %s2866_s25, 1536 }
 0x17e   : > { %2442 = vrot.lane.b32.xlu0 %v2426_v28, %s2970_s20  ;;  %p2869_p2 = scmp.lt.s32.totalorder %s2867_s26, %s2861_s23 }
 0x17f   : > { %v1532_v51 = vpop.permute.xlu1 %1531 }
 0x180   : > { %1549 = vst.msk [vmem:[#allocation2 + $0x4] sm:$0xf] %vm4378_vm14, %v1532_v51  ;;  %v1538_v50 = vpop.permute.xlu0 %1537  ;;  %p2870_p3 = por %p2869_p2, %p2868_p1 }
 0x181   : > { %2444 = vrot.lane.b32.xlu1 %v2429_v3, %s2970_s20  ;;  %1552 = vst.msk [vmem:[#allocation2 + $0x10] sm:$0xf] %vm4379_vm13, %v1538_v50 }
 0x182   : > { %2450 = vrot.lane.b32.xlu0 %v2438_v15, %s2970_s20  ;;  %p2871_p5 = pnand %p2870_p3, %p2864_p0 }
 0x183   : > { %v1540_v63 = vpop.permute.xlu1 %1539 }
 0x184   : > { %1553 = vst.msk [vmem:[#allocation2 + $0x14] sm:$0xf] %vm4380_vm0, %v1540_v63  ;;  %v2131_v54 = vpop.permute.xlu0 %2130 }
 0x185   : > { %2452 = vrot.lane.b32.xlu1 %v2441_v24, %s2970_s20  ;;  %2147 = vst.msk [vmem:[#allocation2 + $0x8] sm:$0xf] %vm2144_vm15, %v2131_v54 }
 0x187   : > { %v2133_v35 = vpop.permute.xlu1 %2132 }
 0x188   : > { %2148 = vst.msk [vmem:[#allocation2 + $0xc] sm:$0xf] %vm2144_vm15, %v2133_v35  ;;  %v1630_v55 = vpop.permute.xlu0 %1629 }
 0x189   : > { %1648 = vst.msk [vmem:[#allocation2] sm:$0xf] %vm1647_vm9, %v1630_v55 }
 0x18b   : > { %v1632_v38 = vpop.permute.xlu1 %1631 }
 0x18c   : > { %1649 = vst.msk [vmem:[#allocation2 + $0x4] sm:$0xf] %vm1647_vm9, %v1632_v38  ;;  %v1638_v14 = vpop.permute.xlu0 %1637 }
 0x18d   : > { %1652 = vst.msk [vmem:[#allocation2 + $0x10] sm:$0xf] %vm1647_vm9, %v1638_v14 }
 0x18f   : > { %v1640_v36 = vpop.permute.xlu1 %1639 }
 0x190   : > { %1653 = vst.msk [vmem:[#allocation2 + $0x14] sm:$0xf] %vm1647_vm9, %v1640_v36  ;;  %v2231_v19 = vpop.permute.xlu0 %2230  ;;  %vm2460_vm9 = vcmask 503264  }
 0x191   : > { %2247 = vst.msk [vmem:[#allocation2 + $0x8] sm:$0xf] %vm2244_vm2, %v2231_v19 }
 0x193   : > { %v2233_v2 = vpop.permute.xlu1 %2232 }
 0x194   : > { %2248 = vst.msk [vmem:[#allocation2 + $0xc] sm:$0xf] %vm2244_vm2, %v2233_v2  ;;  %v1688_v41 = vpop.permute.xlu0 %1687 }
 0x195   : > { %1706 = vst.msk [vmem:[#allocation2] sm:$0xf] %vm1705_vm10, %v1688_v41 }
 0x197   : > { %v1690_v20 = vpop.permute.xlu1 %1689 }
 0x198   : > { %1707 = vst.msk [vmem:[#allocation2 + $0x4] sm:$0xf] %vm1705_vm10, %v1690_v20  ;;  %v1696_v42 = vpop.permute.xlu0 %1695 }
 0x199   : > { %1710 = vst.msk [vmem:[#allocation2 + $0x10] sm:$0xf] %vm1705_vm10, %v1696_v42 }
 0x19b   : > { %v1698_v53 = vpop.permute.xlu1 %1697 }
 0x19c   : > { %1711 = vst.msk [vmem:[#allocation2 + $0x14] sm:$0xf] %vm1705_vm10, %v1698_v53  ;;  %v2289_v21 = vpop.permute.xlu0 %2288  ;;  %vm2519_vm10 = vcmask 506880  }
 0x19d   : > { %2305 = vst.msk [vmem:[#allocation2 + $0x8] sm:$0xf] %vm2302_vm1, %v2289_v21 }
 0x19f   : > { %v2291_v1 = vpop.permute.xlu1 %2290 }
 0x1a0   : > { %2306 = vst.msk [vmem:[#allocation2 + $0xc] sm:$0xf] %vm2302_vm1, %v2291_v1  ;;  %v1788_v4 = vpop.permute.xlu0 %1787 }
 0x1a1   : > { %1806 = vst.msk [vmem:[#allocation2] sm:$0xf] %vm1805_vm6, %v1788_v4 }
 0x1a3   : > { %v1790_v46 = vpop.permute.xlu1 %1789 }
 0x1a4   : > { %1807 = vst.msk [vmem:[#allocation2 + $0x4] sm:$0xf] %vm1805_vm6, %v1790_v46  ;;  %v1796_v40 = vpop.permute.xlu0 %1795 }
 0x1a5   : > { %1810 = vst.msk [vmem:[#allocation2 + $0x10] sm:$0xf] %vm1805_vm6, %v1796_v40 }
 0x1a7   : > { %v1798_v60 = vpop.permute.xlu1 %1797 }
 0x1a8   : > { %1811 = vst.msk [vmem:[#allocation2 + $0x14] sm:$0xf] %vm1805_vm6, %v1798_v60  ;;  %v2389_v59 = vpop.permute.xlu0 %2388 }
 0x1a9   : > { %2405 = vst.msk [vmem:[#allocation2 + $0x8] sm:$0xf] %vm2402_vm4, %v2389_v59 }
 0x1ab   : > { %v2391_v52 = vpop.permute.xlu1 %2390 }
 0x1ac   : > { %2406 = vst.msk [vmem:[#allocation2 + $0xc] sm:$0xf] %vm2402_vm4, %v2391_v52  ;;  %v1846_v12 = vpop.permute.xlu0 %1845 }
 0x1ad   : > { %1864 = vst.msk [vmem:[#allocation2] sm:$0xf] %vm1863_vm7, %v1846_v12 }
 0x1af   : > { %v1848_v45 = vpop.permute.xlu1 %1847 }
 0x1b0   : > { %1865 = vst.msk [vmem:[#allocation2 + $0x4] sm:$0xf] %vm1863_vm7, %v1848_v45  ;;  %v1854_v29 = vpop.permute.xlu0 %1853 }
 0x1b1   : > { %1868 = vst.msk [vmem:[#allocation2 + $0x10] sm:$0xf] %vm1863_vm7, %v1854_v29 }
 0x1b3   : > { %v1856_v32 = vpop.permute.xlu1 %1855 }
 0x1b4   : > { %1869 = vst.msk [vmem:[#allocation2 + $0x14] sm:$0xf] %vm1863_vm7, %v1856_v32  ;;  %v2447_v7 = vpop.permute.xlu0 %2446 }
 0x1b5   : > { %2463 = vst.msk [vmem:[#allocation2 + $0x8] sm:$0xf] %vm2460_vm9, %v2447_v7 }
 0x1b7   : > { %v2449_v58 = vpop.permute.xlu1 %2448 }
 0x1b8   : > { %2464 = vst.msk [vmem:[#allocation2 + $0xc] sm:$0xf] %vm2460_vm9, %v2449_v58  ;;  %v1936_v6 = vpop.permute.xlu0 %1935 }
 0x1b9   : > { %1954 = vst.msk [vmem:[#allocation2] sm:$0xf] %vm1953_vm5, %v1936_v6 }
 0x1bb   : > { %v1938_v25 = vpop.permute.xlu1 %1937 }
 0x1bc   : > { %1955 = vst.msk [vmem:[#allocation2 + $0x4] sm:$0xf] %vm1953_vm5, %v1938_v25  ;;  %v1944_v49 = vpop.permute.xlu0 %1943 }
 0x1bd   : > { %1958 = vst.msk [vmem:[#allocation2 + $0x10] sm:$0xf] %vm1953_vm5, %v1944_v49 }
 0x1bf   : > { %v1946_v22 = vpop.permute.xlu1 %1945  ;;  %v2858_v31 = vld [vmem:[#allocation2 + $0x8] sm:$0xff]  }
 0x1c0   : > { %1959 = vst.msk [vmem:[#allocation2 + $0x14] sm:$0xf] %vm1953_vm5, %v1946_v22  ;;  %v1973_v23 = vpop.permute.xlu0 %1972  ;;  %2748 = vmatmul.mubr.msk.bf16.vlgmr.msra.gmra.mxu1 %vm2519_vm10, %v2858_v31 }
 0x1c1   : > { %1991 = vst.msk [vmem:[#allocation2] sm:$0xf] %vm1990_vm3, %v1973_v23  ;;  %2751 = vmatprep.mubr.msk.bf16.mxu1 %vm2969_vm12, %v2967_v56 }
 0x1c3   : > { %v1975_v39 = vpop.permute.xlu1 %1974 }
 0x1c4   : > { %1992 = vst.msk [vmem:[#allocation2 + $0x4] sm:$0xf] %vm1990_vm3, %v1975_v39  ;;  %v1981_v34 = vpop.permute.xlu0 %1980 }
 0x1c5   : > { %1995 = vst.msk [vmem:[#allocation2 + $0x10] sm:$0xf] %vm1990_vm3, %v1981_v34 }
 0x1c7   : > { %v1983_v61 = vpop.permute.xlu1 %1982 }
 0x1c8   : > { %1996 = vst.msk [vmem:[#allocation2 + $0x14] sm:$0xf] %vm1990_vm3, %v1983_v61  ;;  %v2069_v44 = vpop.permute.xlu0 %2068 }
 0x1c9   : > { %2087 = vst.msk [vmem:[#allocation2] sm:$0xf] %vm2086_vm8, %v2069_v44 }
 0x1cb   : > { %v2071_v57 = vpop.permute.xlu1 %2070 }
 0x1cc   : > { %2088 = vst.msk [vmem:[#allocation2 + $0x4] sm:$0xf] %vm2086_vm8, %v2071_v57  ;;  %v2077_v43 = vpop.permute.xlu0 %2076 }
 0x1cd   : > { %2091 = vst.msk [vmem:[#allocation2 + $0x10] sm:$0xf] %vm2086_vm8, %v2077_v43 }
 0x1cf   : > { %v2079_v16 = vpop.permute.xlu1 %2078 }
 0x1d0   : > { %2092 = vst.msk [vmem:[#allocation2 + $0x14] sm:$0xf] %vm2086_vm8, %v2079_v16  ;;  %v2127_v56 = vpop.permute.xlu0 %2126 }
 0x1d1   : > { %2145 = vst.msk [vmem:[#allocation2] sm:$0xf] %vm2144_vm15, %v2127_v56 }
 0x1d3   : > { %v2129_v5 = vpop.permute.xlu1 %2128 }
 0x1d4   : > { %2146 = vst.msk [vmem:[#allocation2 + $0x4] sm:$0xf] %vm2144_vm15, %v2129_v5  ;;  %v2135_v0 = vpop.permute.xlu0 %2134 }
 0x1d5   : > { %2149 = vst.msk [vmem:[#allocation2 + $0x10] sm:$0xf] %vm2144_vm15, %v2135_v0 }
 0x1d7   : > { %v2137_v8 = vpop.permute.xlu1 %2136 }
 0x1d8   : > { %2150 = vst.msk [vmem:[#allocation2 + $0x14] sm:$0xf] %vm2144_vm15, %v2137_v8  ;;  %v2227_v27 = vpop.permute.xlu0 %2226 }
 0x1d9   : > { %2245 = vst.msk [vmem:[#allocation2] sm:$0xf] %vm2244_vm2, %v2227_v27 }
 0x1db   : > { %v2229_v47 = vpop.permute.xlu1 %2228 }
 0x1dc   : > { %2246 = vst.msk [vmem:[#allocation2 + $0x4] sm:$0xf] %vm2244_vm2, %v2229_v47  ;;  %v2235_v37 = vpop.permute.xlu0 %2234 }
 0x1dd   : > { %2249 = vst.msk [vmem:[#allocation2 + $0x10] sm:$0xf] %vm2244_vm2, %v2235_v37 }
 0x1df   : > { %v2237_v9 = vpop.permute.xlu1 %2236 }
 0x1e0   : > { %2250 = vst.msk [vmem:[#allocation2 + $0x14] sm:$0xf] %vm2244_vm2, %v2237_v9  ;;  %v2285_v18 = vpop.permute.xlu0 %2284 }
 0x1e1   : > { %2303 = vst.msk [vmem:[#allocation2] sm:$0xf] %vm2302_vm1, %v2285_v18 }
 0x1e3   : > { %v2287_v33 = vpop.permute.xlu1 %2286 }
 0x1e4   : > { %2304 = vst.msk [vmem:[#allocation2 + $0x4] sm:$0xf] %vm2302_vm1, %v2287_v33  ;;  %v2293_v62 = vpop.permute.xlu0 %2292 }
 0x1e5   : > { %2307 = vst.msk [vmem:[#allocation2 + $0x10] sm:$0xf] %vm2302_vm1, %v2293_v62 }
 0x1e7   : > { %v2295_v30 = vpop.permute.xlu1 %2294 }
 0x1e8   : > { %2308 = vst.msk [vmem:[#allocation2 + $0x14] sm:$0xf] %vm2302_vm1, %v2295_v30  ;;  %v2385_v10 = vpop.permute.xlu0 %2384 }
 0x1e9   : > { %2403 = vst.msk [vmem:[#allocation2] sm:$0xf] %vm2402_vm4, %v2385_v10 }
 0x1eb   : > { %v2387_v28 = vpop.permute.xlu1 %2386 }
 0x1ec   : > { %2404 = vst.msk [vmem:[#allocation2 + $0x4] sm:$0xf] %vm2402_vm4, %v2387_v28  ;;  %v2393_v17 = vpop.permute.xlu0 %2392 }
 0x1ed   : > { %2407 = vst.msk [vmem:[#allocation2 + $0x10] sm:$0xf] %vm2402_vm4, %v2393_v17 }
 0x1ef   : > { %v2395_v26 = vpop.permute.xlu1 %2394 }
 0x1f0   : > { %2408 = vst.msk [vmem:[#allocation2 + $0x14] sm:$0xf] %vm2402_vm4, %v2395_v26  ;;  %v2443_v11 = vpop.permute.xlu0 %2442 }
 0x1f1   : > { %2461 = vst.msk [vmem:[#allocation2] sm:$0xf] %vm2460_vm9, %v2443_v11 }
 0x1f3   : > { %v2445_v3 = vpop.permute.xlu1 %2444 }
 0x1f4   : > { %2462 = vst.msk [vmem:[#allocation2 + $0x4] sm:$0xf] %vm2460_vm9, %v2445_v3  ;;  %v2451_v48 = vpop.permute.xlu0 %2450 }
 0x1f5   : > { %2465 = vst.msk [vmem:[#allocation2 + $0x10] sm:$0xf] %vm2460_vm9, %v2451_v48 }
 0x1f7   : > { %v2453_v13 = vpop.permute.xlu1 %2452 }
 0x1f8   : > { %2466 = vst.msk [vmem:[#allocation2 + $0x14] sm:$0xf] %vm2460_vm9, %v2453_v13 }
 0x1fb   : > { %v2859_v51 = vld [vmem:[#allocation2] sm:$0xff]  }
 0x1fc   : > { %2744 = vmatmul.mubr.msk.bf16.vlgmr.msra.gmra.mxu0 %vm2519_vm10, %v2859_v51 }
 0x1ff   : > { %v2860_v15 = vld [vmem:[#allocation2 + $0x10] sm:$0xff]  }
 0x200   : > { %2752 = vmatmul.mubr.msk.bf16.gmra.mxu1 %vm2519_vm10, %v2860_v15 }
 0x280   : > { %v2575_v50 = vpop.f32.mrf.mxu1 }
 0x281   : > { %2592 = vst [vmem:[%s160_s6 + $0x10] sm:$0xff] %v2575_v50 }
 0x282   : > { %v2749_v24 = vpop.f32.mrf.mxu1 }
 0x284   : > { %v2578_v63 = vpop.f32.mrf.mxu1 }
 0x285   : > { %2593 = vst [vmem:[%s160_s6 + $0x18] sm:$0xff] %v2578_v63 }
 0x286   : > { %v2750_v54 = vpop.f32.mrf.mxu1 }
 0x2bc   : > { %v2567_v35 = vpop.f32.mrf.mxu0 }
 0x2bd   : > { %2590 = vst [vmem:[%s160_s6] sm:$0xff] %v2567_v35 }
 0x2be   : > { %v2745_v55 = vpop.f32.mrf.mxu0 }
 0x2c0   : > { %v2570_v38 = vpop.f32.mrf.mxu0  ;;  %v2583_v14 = vpop.f32.mrf.mxu1 }
 0x2c1   : > { %2591 = vst [vmem:[%s160_s6 + $0x8] sm:$0xff] %v2570_v38  ;;  %2594 = vst [vmem:[%s160_s6 + $0x20] sm:$0xff] %v2583_v14 }
 0x2c2   : > { %v2746_v36 = vpop.f32.mrf.mxu0  ;;  %v2753_v19 = vpop.f32.mrf.mxu1 }
 0x2c4   : > { %v2586_v2 = vpop.f32.mrf.mxu1 }
 0x2c5   : > { %2595 = vst [vmem:[%s160_s6 + $0x28] sm:$0xff] %v2586_v2 }
 0x2c6   : > { %v2754_v41 = vpop.f32.mrf.mxu1 }
 0x2c7   : > { %2874 = shalt.err (!%p2871_p5)
}
 0x2c8   : > { %s2875_s28 = scalar_lea.hbm %s4309_s18, 768  ;;  %s2879_s4 = scalar_lea.hbm %s4359_s2, 1536 }
 0x2c9   : > { %p2876_p6 = scmp.ne.s32.totalorder %s4309_s18, %s2875_s28  ;;  %p2880_p10 = scmp.lt.s32.totalorder %s4309_s18, %s4359_s2 }
 0x2ca   : > { %p2881_p11 = scmp.lt.s32.totalorder %s2879_s4, %s2875_s28 }
 0x2cb   : > { %p2877_p7 = pnand %p2876_p6, %p3028_p4 }
 0x2cc   : > { %p2882_p12 = por %p2881_p11, %p2880_p10 }
 0x2cd   : > { %p2878_p9 = pneg %p2877_p7 }
 0x2cf   : > { %p2883_p13 = pnand %p2882_p12, %p2878_p9 }
 0x2d1   : > { %2886 = shalt.err (!%p2883_p13)
}
 0x2d2   : > { %s2972_s5 = smov 128  }
 0x2d3   : > { %2766 = dma.vmem_to_hbm [thread:$0]  (%p3028_p4), %s4304_s7, 768, %s4309_s18, %s4311_s12, %s2972_s5, %s2972_s5, %s2942_s3  }
 0x2d4 PF: > { %p2772_p0 = scmp.ge.s32.totalorder %s2937_s14, 2  ;;  %s2627_s6 = sand.u32 1, %s2917_s9  }
 0x2d5   : > { %s2628_s8 = scalar_lea.sflag [#allocation4], %s2627_s6 }
 0x2d6   : > { %p2769_p1 = pnand %p2772_p0, %p3035_p8 }
 0x2d8   : > { %p2770_p2 = pneg %p2769_p1 }
 0x2da   : > { %2912 = dma.done.wait (%p2770_p2), %s2628_s8, 768  }
 0x2db   : > { %2914 = vsyncadd (%p2770_p2), %s2628_s8, 4294966528  ;;  %s15_s14 = sadd.s32 1, %s2937_s14   ;;  %s4381_s9 = smov %s2921_s10 }
 0x2dc   : > { %p12_p3 = scmp.ge.s32.totalorder %s15_s14, 4   ;;  %s4382_s10 = smov %s2925_s11 }
 0x2dd   : > { %s4383_s11 = smov %s3041_s22  ;;  %s4384_s12 = smov %s2933_s13 }
 0x2de   : > { %s4385_s13 = smov %s4387_s17  ;;  %14 = sbr.rel (!%p12_p3) target bundleno = 4 (0x4), region = 63 }
 0x2e3   :  { %2633 = vsyncpa [#allocation4], 1 }
 0x2e4   :  { %2635 = vsyncpa [#allocation4 + $0x1], 1 }

</bundles_post_ra>
